<compile_context>
chip_gen: v7x
topology: tpu7x:2x2x1
jax: 0.10.0
libtpu: 0.0.40
codegen_flags: <defaults>
</compile_context>

<pallas_src>
import functools

import jax
import jax.numpy as jnp
from jax import lax
from jax.experimental import pallas as pl
from jax.experimental.pallas import tpu as pltpu

RES_SCALE = 1.0
REDUCTION = 16
LANE = 128


# -----------------------------------------------------------------------------
# Kernel
# -----------------------------------------------------------------------------
def ssb_kernel(x_ref,
               sw1_ref, sb1_ref, sw2_ref, sb2_ref,          # spatial 3x3 convs (im2col layout)
               cw1_ref, cb1_ref, cw2_ref, cb2_ref,          # spectral 1x1 convs
               aw1_ref, ab1_ref, aw2_ref, ab2_ref,          # channel-attention MLP (f32)
               o_ref, pad_ref):
    Bt, Hp2, Wp2, Cp = pad_ref.shape
    H, W = Hp2 - 2, Wp2 - 2
    M = Bt * H * W

    # Zero the 1-pixel border of the padding scratch every step.  (Cheap: a few
    # thin strips.)  This must NOT be gated on program_id == 0 because the batch
    # axis is "parallel": on v7x each TensorCore owns its own scratch instance.
    zrow = jnp.zeros((Bt, 1, Wp2, Cp), jnp.float32)
    zcol = jnp.zeros((Bt, Hp2, 1, Cp), jnp.float32)
    pad_ref[:, 0:1, :, :] = zrow
    pad_ref[:, H + 1:H + 2, :, :] = zrow
    pad_ref[:, :, 0:1, :] = zcol
    pad_ref[:, :, W + 1:W + 2, :] = zcol

    def conv3x3(v4d, w_ref, b_ref):
        """SAME 3x3 conv as a single im2col matmul on the MXU.

        v4d:   (Bt, H, W, Cp) f32 value.
        w_ref: (9*Cp, Cp) weights, rows ordered (ky, kx, cin) to match the
               window concatenation below (possibly bf16).
        b_ref: (1, Cp) f32 bias.
        Returns the conv output as an (M, Cp) f32 register value.
        """
        w = w_ref[...]
        # Write the interior once; the zero border persists.
        pad_ref[:, 1:H + 1, 1:W + 1, :] = v4d
        cols = []
        for ky in range(3):
            for kx in range(3):
                win = pad_ref[:, ky:ky + H, kx:kx + W, :]          # (Bt, H, W, Cp)
                cols.append(win.reshape(M, Cp).astype(w.dtype))
        patches = jnp.concatenate(cols, axis=1)                    # (M, 9*Cp), lane-tile aligned
        out = jnp.dot(patches, w, preferred_element_type=jnp.float32)
        return out + b_ref[...]                                    # (M, Cp) f32

    x = x_ref[...]                                                 # (Bt, H, W, Cp) f32
    xf = x.reshape(M, Cp)

    # ---- SpatialResBlock: y = x + conv3x3(relu(conv3x3(x))) ----
    t = jnp.maximum(conv3x3(x, sw1_ref, sb1_ref), 0.0)
    y = xf + RES_SCALE * conv3x3(t.reshape(Bt, H, W, Cp), sw2_ref, sb2_ref)

    # ---- SpectralAttentionResBlock (1x1 convs are pure channel matmuls) ----
    cw1 = cw1_ref[...]
    cw2 = cw2_ref[...]
    u = jnp.maximum(
        jnp.dot(y.astype(cw1.dtype), cw1, preferred_element_type=jnp.float32)
        + cb1_ref[...], 0.0)
    body = (jnp.dot(u.astype(cw2.dtype), cw2, preferred_element_type=jnp.float32)
            + cb2_ref[...])

    # CALayer: global average pool over H*W, then squeeze->relu->excite->sigmoid (f32).
    body3 = body.reshape(Bt, H * W, Cp)
    pooled = jnp.mean(body3, axis=1)                               # (Bt, Cp)
    h1 = jnp.maximum(
        jnp.dot(pooled, aw1_ref[...], preferred_element_type=jnp.float32)
        + ab1_ref[...], 0.0)                                       # (Bt, Crp)
    att = jax.nn.sigmoid(
        jnp.dot(h1, aw2_ref[...], preferred_element_type=jnp.float32)
        + ab2_ref[...])                                            # (Bt, Cp)

    out3 = y.reshape(Bt, H * W, Cp) + RES_SCALE * body3 * att[:, None, :]
    # Full 128-lane (Cp) last dim -> unmasked full-lane store.
    o_ref[...] = out3.reshape(Bt, H, W, Cp).astype(o_ref.dtype)


# -----------------------------------------------------------------------------
# Wrapper
# -----------------------------------------------------------------------------
def _round_up(v, m):
    return (v + m - 1) // m * m


def _pad_to(a, axis, target):
    amount = target - a.shape[axis]
    if amount == 0:
        return a
    pad = [(0, 0)] * a.ndim
    pad[axis] = (0, amount)
    return jnp.pad(a, pad)


@functools.partial(jax.jit, static_argnames=("mxu_dtype",))
def ssb_forward(x_nchw, params, mxu_dtype=jnp.bfloat16):
    """SSB forward.  NCHW in / NCHW out (PyTorch convention).

    Inside the kernel: NHWC with channels zero-padded to a multiple of 128
    (lane-dense), matmul operands cast to `mxu_dtype` (f32 accumulation).
    """
    x = jnp.transpose(x_nchw, (0, 2, 3, 1)).astype(jnp.float32)
    N, H, W, C = x.shape
    Cr = params["ca_w1"].shape[1]
    Cp = _round_up(C, LANE)          # lane-dense channel width
    Crp = _round_up(Cr, LANE)

    xp = _pad_to(x, 3, Cp)           # zero channels stay exactly zero end-to-end

    def pad2(w, rows, cols):
        return _pad_to(_pad_to(w, w.ndim - 1, cols), w.ndim - 2, rows)

    # 3x3 conv weights: (3,3,C,C) -> (3,3,Cp,Cp) -> im2col layout (9*Cp, Cp), MXU dtype.
    sw1 = pad2(params["spa_w1"], Cp, Cp).reshape(9 * Cp, Cp).astype(mxu_dtype)
    sw2 = pad2(params["spa_w2"], Cp, Cp).reshape(9 * Cp, Cp).astype(mxu_dtype)
    sb1 = _pad_to(params["spa_b1"], 1, Cp)
    sb2 = _pad_to(params["spa_b2"], 1, Cp)
    # 1x1 conv weights: (C,C) -> (Cp,Cp), MXU dtype.
    cw1 = pad2(params["spc_w1"], Cp, Cp).astype(mxu_dtype)
    cw2 = pad2(params["spc_w2"], Cp, Cp).astype(mxu_dtype)
    cb1 = _pad_to(params["spc_b1"], 1, Cp)
    cb2 = _pad_to(params["spc_b2"], 1, Cp)
    # Channel-attention MLP is tiny; keep it f32.
    aw1 = pad2(params["ca_w1"], Cp, Crp)
    ab1 = _pad_to(params["ca_b1"], 1, Crp)
    aw2 = pad2(params["ca_w2"], Crp, Cp)
    ab2 = _pad_to(params["ca_b2"], 1, Cp)

    # Batch tile: amortize per-step overhead over several images while keeping
    # >= 2 grid steps so the "parallel" batch axis can use both v7x TensorCores.
    candidates = [d for d in (4, 2, 1) if N % d == 0 and N // d >= 2]
    Bt = candidates[0] if candidates else N

    def full_spec(a):
        nd = a.ndim
        return pl.BlockSpec(a.shape, lambda b, nd=nd: (0,) * nd)

    weights = (sw1, sb1, sw2, sb2, cw1, cb1, cw2, cb2, aw1, ab1, aw2, ab2)

    grid_spec = pltpu.PrefetchScalarGridSpec(
        num_scalar_prefetch=0,
        grid=(N // Bt,),
        in_specs=[pl.BlockSpec((Bt, H, W, Cp), lambda b: (b, 0, 0, 0))]
                 + [full_spec(w) for w in weights],
        out_specs=pl.BlockSpec((Bt, H, W, Cp), lambda b: (b, 0, 0, 0)),
        scratch_shapes=[pltpu.VMEM((Bt, H + 2, W + 2, Cp), jnp.float32)],
    )

    out_padded = pl.pallas_call(
        ssb_kernel,
        out_shape=jax.ShapeDtypeStruct((N, H, W, Cp), jnp.float32),
        grid_spec=grid_spec,
        compiler_params=pltpu.CompilerParams(
            dimension_semantics=("parallel",)),   # no cross-batch carry
    )(xp, *weights)

    return jnp.transpose(out_padded[..., :C], (0, 3, 1, 2))


# -----------------------------------------------------------------------------
# Pure-JAX reference (mirrors the PyTorch forward)
# -----------------------------------------------------------------------------
def ssb_reference(x_nchw, params, mxu_dtype=None):
    """If `mxu_dtype` is given, conv/1x1-matmul operands are cast to it (with f32
    accumulation) so the reference matches the kernel's MXU numerics."""
    hi = lax.Precision.HIGHEST
    cast = (lambda a: a) if mxu_dtype is None else (lambda a: a.astype(mxu_dtype))
    x = jnp.transpose(x_nchw, (0, 2, 3, 1)).astype(jnp.float32)

    def conv3(v, w, b):   # w: (kh, kw, Cin, Cout) == HWIO
        return lax.conv_general_dilated(
            cast(v), cast(w), (1, 1), "SAME",
            dimension_numbers=("NHWC", "HWIO", "NHWC"),
            precision=hi, preferred_element_type=jnp.float32) + b

    def mm1x1(v, w):
        return jnp.einsum("nhwc,cd->nhwd", cast(v), cast(w),
                          precision=hi, preferred_element_type=jnp.float32)

    t = jax.nn.relu(conv3(x, params["spa_w1"], params["spa_b1"]))
    y = x + RES_SCALE * conv3(t, params["spa_w2"], params["spa_b2"])

    u = jax.nn.relu(mm1x1(y, params["spc_w1"]) + params["spc_b1"])
    body = mm1x1(u, params["spc_w2"]) + params["spc_b2"]

    pooled = body.mean(axis=(1, 2))                                   # (N, C)
    h1 = jax.nn.relu(jnp.dot(pooled, params["ca_w1"], precision=hi) + params["ca_b1"])
    att = jax.nn.sigmoid(jnp.dot(h1, params["ca_w2"], precision=hi) + params["ca_b2"])
    out = y + RES_SCALE * body * att[:, None, None, :]
    return jnp.transpose(out, (0, 3, 1, 2))


def make_params(key, in_feats):
    C, Cr = in_feats, in_feats // REDUCTION
    ks = jax.random.split(key, 12)
    n = lambda k, shape, s=0.1: (s * jax.random.normal(k, shape)).astype(jnp.float32)
    return {
        # 3x3 convs stored as (kh, kw, Cin, Cout)  (= torch weight.transpose(2,3,1,0))
        "spa_w1": n(ks[0], (3, 3, C, C)), "spa_b1": n(ks[1], (1, C)),
        "spa_w2": n(ks[2], (3, 3, C, C)), "spa_b2": n(ks[3], (1, C)),
        # 1x1 convs stored as (Cin, Cout)
        "spc_w1": n(ks[4], (C, C)), "spc_b1": n(ks[5], (1, C)),
        "spc_w2": n(ks[6], (C, C)), "spc_b2": n(ks[7], (1, C)),
        # CALayer conv_du: C -> C//16 -> C
        "ca_w1": n(ks[8], (C, Cr)), "ca_b1": n(ks[9], (1, Cr)),
        "ca_w2": n(ks[10], (Cr, C)), "ca_b2": n(ks[11], (1, C)),
    }


if __name__ == "__main__":
    N, C, H, W = 2, 32, 16, 16    # in_feats=32 so CALayer reduction 32//16=2 is valid
    key = jax.random.PRNGKey(0)
    kx, kp = jax.random.split(key)
    x = jax.random.normal(kx, (N, C, H, W), dtype=jnp.float32)
    params = make_params(kp, C)

    # 1) Exact-semantics check: f32 operands at the MXU vs the pure-f32 reference.
    out_f32 = jax.block_until_ready(ssb_forward(x, params, mxu_dtype=jnp.float32))
    ref_f32 = jax.block_until_ready(ssb_reference(x, params))
    assert out_f32.shape == (N, C, H, W), out_f32.shape
    err_f32 = float(jnp.max(jnp.abs(out_f32 - ref_f32)))
    assert jnp.allclose(out_f32, ref_f32, rtol=1e-4, atol=1e-4), err_f32

    # 2) Performance default: bf16 operands at the MXU (f32 accumulation),
    #    checked against a matched-precision JAX reference.
    out_bf16 = jax.block_until_ready(ssb_forward(x, params))
    ref_bf16 = jax.block_until_ready(ssb_reference(x, params, mxu_dtype=jnp.bfloat16))
    err_bf16 = float(jnp.max(jnp.abs(out_bf16 - ref_bf16)))
    assert jnp.allclose(out_bf16, ref_bf16, rtol=2e-3, atol=2e-3), err_bf16

    print("KERNEL_OK")
</pallas_src>

<mosaic_0001>
module attributes {stable_mosaic.version = 11 : i64} {
  func.func @ssb_kernel(%arg0: i32, %arg1: memref<1x16x16x128xf32, #tpu.memory_space<vmem>>, %arg2: memref<1152x128xf32, #tpu.memory_space<vmem>>, %arg3: memref<1x128xf32, #tpu.memory_space<vmem>>, %arg4: memref<1152x128xf32, #tpu.memory_space<vmem>>, %arg5: memref<1x128xf32, #tpu.memory_space<vmem>>, %arg6: memref<128x128xf32, #tpu.memory_space<vmem>>, %arg7: memref<1x128xf32, #tpu.memory_space<vmem>>, %arg8: memref<128x128xf32, #tpu.memory_space<vmem>>, %arg9: memref<1x128xf32, #tpu.memory_space<vmem>>, %arg10: memref<128x128xf32, #tpu.memory_space<vmem>>, %arg11: memref<1x128xf32, #tpu.memory_space<vmem>>, %arg12: memref<128x128xf32, #tpu.memory_space<vmem>>, %arg13: memref<1x128xf32, #tpu.memory_space<vmem>>, %arg14: memref<1x16x16x128xf32, #tpu.memory_space<vmem>>, %arg15: memref<1x18x18x128xf32, #tpu.memory_space<vmem>>) attributes {dimension_semantics = [#tpu.dimension_semantics<parallel>], iteration_bounds = array<i64: 2>, scalar_prefetch = 0 : i64, scratch_operands = 1 : i64, tpu.core_type = #tpu.core_type<tc>, window_params = [{transform_indices = @transform_0, window_bounds = array<i64: 1, 16, 16, 128>}, {pipeline_mode = #tpu.pipeline_mode<synchronous>, transform_indices = @transform_1, window_bounds = array<i64: 1152, 128>}, {pipeline_mode = #tpu.pipeline_mode<synchronous>, transform_indices = @transform_2, window_bounds = array<i64: 1, 128>}, {pipeline_mode = #tpu.pipeline_mode<synchronous>, transform_indices = @transform_3, window_bounds = array<i64: 1152, 128>}, {pipeline_mode = #tpu.pipeline_mode<synchronous>, transform_indices = @transform_4, window_bounds = array<i64: 1, 128>}, {pipeline_mode = #tpu.pipeline_mode<synchronous>, transform_indices = @transform_5, window_bounds = array<i64: 128, 128>}, {pipeline_mode = #tpu.pipeline_mode<synchronous>, transform_indices = @transform_6, window_bounds = array<i64: 1, 128>}, {pipeline_mode = #tpu.pipeline_mode<synchronous>, transform_indices = @transform_7, window_bounds = array<i64: 128, 128>}, {pipeline_mode = #tpu.pipeline_mode<synchronous>, transform_indices = @transform_8, window_bounds = array<i64: 1, 128>}, {pipeline_mode = #tpu.pipeline_mode<synchronous>, transform_indices = @transform_9, window_bounds = array<i64: 128, 128>}, {pipeline_mode = #tpu.pipeline_mode<synchronous>, transform_indices = @transform_10, window_bounds = array<i64: 1, 128>}, {pipeline_mode = #tpu.pipeline_mode<synchronous>, transform_indices = @transform_11, window_bounds = array<i64: 128, 128>}, {pipeline_mode = #tpu.pipeline_mode<synchronous>, transform_indices = @transform_12, window_bounds = array<i64: 1, 128>}, {transform_indices = @transform_13, window_bounds = array<i64: 1, 16, 16, 128>}]} {
    %cst = arith.constant 0.000000e+00 : f32
    %0 = vector.broadcast %cst : f32 to vector<1x1x18x128xf32>
    %cst_0 = arith.constant 0.000000e+00 : f32
    %1 = vector.broadcast %cst_0 : f32 to vector<1x18x1x128xf32>
    %c0 = arith.constant 0 : index
    %c0_1 = arith.constant 0 : index
    %c0_2 = arith.constant 0 : index
    %c0_3 = arith.constant 0 : index
    %2 = vector.load %arg15[%c0, %c0_1, %c0_2, %c0_3] : memref<1x18x18x128xf32, #tpu.memory_space<vmem>>, vector<1x1x18x128xf32>
    tpu.vector_store %arg15[%c0, %c0_1, %c0_2, %c0_3], %0 {strides = array<i32>} : memref<1x18x18x128xf32, #tpu.memory_space<vmem>>, vector<1x1x18x128xf32>,
    %c0_4 = arith.constant 0 : index
    %c17 = arith.constant 17 : index
    %c0_5 = arith.constant 0 : index
    %c0_6 = arith.constant 0 : index
    %3 = vector.load %arg15[%c0_4, %c17, %c0_5, %c0_6] : memref<1x18x18x128xf32, #tpu.memory_space<vmem>>, vector<1x1x18x128xf32>
    tpu.vector_store %arg15[%c0_4, %c17, %c0_5, %c0_6], %0 {strides = array<i32>} : memref<1x18x18x128xf32, #tpu.memory_space<vmem>>, vector<1x1x18x128xf32>,
    %c0_7 = arith.constant 0 : index
    %c0_8 = arith.constant 0 : index
    %c0_9 = arith.constant 0 : index
    %c0_10 = arith.constant 0 : index
    %4 = vector.load %arg15[%c0_7, %c0_8, %c0_9, %c0_10] : memref<1x18x18x128xf32, #tpu.memory_space<vmem>>, vector<1x18x1x128xf32>
    tpu.vector_store %arg15[%c0_7, %c0_8, %c0_9, %c0_10], %1 {strides = array<i32>} : memref<1x18x18x128xf32, #tpu.memory_space<vmem>>, vector<1x18x1x128xf32>,
    %c0_11 = arith.constant 0 : index
    %c0_12 = arith.constant 0 : index
    %c17_13 = arith.constant 17 : index
    %c0_14 = arith.constant 0 : index
    %5 = vector.load %arg15[%c0_11, %c0_12, %c17_13, %c0_14] : memref<1x18x18x128xf32, #tpu.memory_space<vmem>>, vector<1x18x1x128xf32>
    tpu.vector_store %arg15[%c0_11, %c0_12, %c17_13, %c0_14], %1 {strides = array<i32>} : memref<1x18x18x128xf32, #tpu.memory_space<vmem>>, vector<1x18x1x128xf32>,
    %c0_15 = arith.constant 0 : index
    %c0_16 = arith.constant 0 : index
    %c0_17 = arith.constant 0 : index
    %c0_18 = arith.constant 0 : index
    %6 = vector.load %arg1[%c0_15, %c0_16, %c0_17, %c0_18] : memref<1x16x16x128xf32, #tpu.memory_space<vmem>>, vector<1x16x16x128xf32>
    %7 = vector.shape_cast %6 : vector<1x16x16x128xf32> to vector<256x128xf32>
    %c0_19 = arith.constant 0 : index
    %c0_20 = arith.constant 0 : index
    %8 = vector.load %arg2[%c0_19, %c0_20] : memref<1152x128xf32, #tpu.memory_space<vmem>>, vector<1152x128xf32>
    %c0_21 = arith.constant 0 : index
    %c1 = arith.constant 1 : index
    %c1_22 = arith.constant 1 : index
    %c0_23 = arith.constant 0 : index
    %9 = vector.load %arg15[%c0_21, %c1, %c1_22, %c0_23] : memref<1x18x18x128xf32, #tpu.memory_space<vmem>>, vector<1x16x16x128xf32>
    tpu.vector_store %arg15[%c0_21, %c1, %c1_22, %c0_23], %6 {strides = array<i32>} : memref<1x18x18x128xf32, #tpu.memory_space<vmem>>, vector<1x16x16x128xf32>,
    %c0_24 = arith.constant 0 : index
    %c0_25 = arith.constant 0 : index
    %c0_26 = arith.constant 0 : index
    %c0_27 = arith.constant 0 : index
    %10 = vector.load %arg15[%c0_24, %c0_25, %c0_26, %c0_27] : memref<1x18x18x128xf32, #tpu.memory_space<vmem>>, vector<1x16x16x128xf32>
    %11 = vector.shape_cast %10 : vector<1x16x16x128xf32> to vector<256x128xf32>
    %c0_28 = arith.constant 0 : index
    %c0_29 = arith.constant 0 : index
    %c1_30 = arith.constant 1 : index
    %c0_31 = arith.constant 0 : index
    %12 = vector.load %arg15[%c0_28, %c0_29, %c1_30, %c0_31] : memref<1x18x18x128xf32, #tpu.memory_space<vmem>>, vector<1x16x16x128xf32>
    %13 = vector.shape_cast %12 : vector<1x16x16x128xf32> to vector<256x128xf32>
    %c0_32 = arith.constant 0 : index
    %c0_33 = arith.constant 0 : index
    %c2 = arith.constant 2 : index
    %c0_34 = arith.constant 0 : index
    %14 = vector.load %arg15[%c0_32, %c0_33, %c2, %c0_34] : memref<1x18x18x128xf32, #tpu.memory_space<vmem>>, vector<1x16x16x128xf32>
    %15 = vector.shape_cast %14 : vector<1x16x16x128xf32> to vector<256x128xf32>
    %c0_35 = arith.constant 0 : index
    %c1_36 = arith.constant 1 : index
    %c0_37 = arith.constant 0 : index
    %c0_38 = arith.constant 0 : index
    %16 = vector.load %arg15[%c0_35, %c1_36, %c0_37, %c0_38] : memref<1x18x18x128xf32, #tpu.memory_space<vmem>>, vector<1x16x16x128xf32>
    %17 = vector.shape_cast %16 : vector<1x16x16x128xf32> to vector<256x128xf32>
    %c0_39 = arith.constant 0 : index
    %c1_40 = arith.constant 1 : index
    %c1_41 = arith.constant 1 : index
    %c0_42 = arith.constant 0 : index
    %18 = vector.load %arg15[%c0_39, %c1_40, %c1_41, %c0_42] : memref<1x18x18x128xf32, #tpu.memory_space<vmem>>, vector<1x16x16x128xf32>
    %19 = vector.shape_cast %18 : vector<1x16x16x128xf32> to vector<256x128xf32>
    %c0_43 = arith.constant 0 : index
    %c1_44 = arith.constant 1 : index
    %c2_45 = arith.constant 2 : index
    %c0_46 = arith.constant 0 : index
    %20 = vector.load %arg15[%c0_43, %c1_44, %c2_45, %c0_46] : memref<1x18x18x128xf32, #tpu.memory_space<vmem>>, vector<1x16x16x128xf32>
    %21 = vector.shape_cast %20 : vector<1x16x16x128xf32> to vector<256x128xf32>
    %c0_47 = arith.constant 0 : index
    %c2_48 = arith.constant 2 : index
    %c0_49 = arith.constant 0 : index
    %c0_50 = arith.constant 0 : index
    %22 = vector.load %arg15[%c0_47, %c2_48, %c0_49, %c0_50] : memref<1x18x18x128xf32, #tpu.memory_space<vmem>>, vector<1x16x16x128xf32>
    %23 = vector.shape_cast %22 : vector<1x16x16x128xf32> to vector<256x128xf32>
    %c0_51 = arith.constant 0 : index
    %c2_52 = arith.constant 2 : index
    %c1_53 = arith.constant 1 : index
    %c0_54 = arith.constant 0 : index
    %24 = vector.load %arg15[%c0_51, %c2_52, %c1_53, %c0_54] : memref<1x18x18x128xf32, #tpu.memory_space<vmem>>, vector<1x16x16x128xf32>
    %25 = vector.shape_cast %24 : vector<1x16x16x128xf32> to vector<256x128xf32>
    %c0_55 = arith.constant 0 : index
    %c2_56 = arith.constant 2 : index
    %c2_57 = arith.constant 2 : index
    %c0_58 = arith.constant 0 : index
    %26 = vector.load %arg15[%c0_55, %c2_56, %c2_57, %c0_58] : memref<1x18x18x128xf32, #tpu.memory_space<vmem>>, vector<1x16x16x128xf32>
    %27 = vector.shape_cast %26 : vector<1x16x16x128xf32> to vector<256x128xf32>
    %28 = tpu.concatenate %11, %13, %15, %17, %19, %21, %23, %25, %27 in 1 : vector<256x128xf32>, vector<256x128xf32>, vector<256x128xf32>, vector<256x128xf32>, vector<256x128xf32>, vector<256x128xf32>, vector<256x128xf32>, vector<256x128xf32>, vector<256x128xf32> -> vector<256x1152xf32>
    %cst_59 = arith.constant dense<0.000000e+00> : vector<256x128xf32>
    %29 = tpu.matmul %28, %8, %cst_59 {dimension_numbers = #tpu.dot_dimension_numbers<[1], [0], [0], [1], [0, 0, 1, 1], [], []>} : vector<256x1152xf32>, vector<1152x128xf32>, vector<256x128xf32> -> vector<256x128xf32>
    %c0_60 = arith.constant 0 : index
    %c0_61 = arith.constant 0 : index
    %30 = vector.load %arg3[%c0_60, %c0_61] : memref<1x128xf32, #tpu.memory_space<vmem>>, vector<1x128xf32>
    %31 = vector.broadcast %30 : vector<1x128xf32> to vector<256x128xf32>
    %32 = arith.addf %29, %31 : vector<256x128xf32>
    %cst_62 = arith.constant 0.000000e+00 : f32
    %33 = vector.broadcast %cst_62 : f32 to vector<256x128xf32>
    %34 = arith.maximumf %32, %33 : vector<256x128xf32>
    %35 = vector.shape_cast %34 : vector<256x128xf32> to vector<1x16x16x128xf32>
    %c0_63 = arith.constant 0 : index
    %c0_64 = arith.constant 0 : index
    %36 = vector.load %arg4[%c0_63, %c0_64] : memref<1152x128xf32, #tpu.memory_space<vmem>>, vector<1152x128xf32>
    %c0_65 = arith.constant 0 : index
    %c1_66 = arith.constant 1 : index
    %c1_67 = arith.constant 1 : index
    %c0_68 = arith.constant 0 : index
    %37 = vector.load %arg15[%c0_65, %c1_66, %c1_67, %c0_68] : memref<1x18x18x128xf32, #tpu.memory_space<vmem>>, vector<1x16x16x128xf32>
    tpu.vector_store %arg15[%c0_65, %c1_66, %c1_67, %c0_68], %35 {strides = array<i32>} : memref<1x18x18x128xf32, #tpu.memory_space<vmem>>, vector<1x16x16x128xf32>,
    %c0_69 = arith.constant 0 : index
    %c0_70 = arith.constant 0 : index
    %c0_71 = arith.constant 0 : index
    %c0_72 = arith.constant 0 : index
    %38 = vector.load %arg15[%c0_69, %c0_70, %c0_71, %c0_72] : memref<1x18x18x128xf32, #tpu.memory_space<vmem>>, vector<1x16x16x128xf32>
    %39 = vector.shape_cast %38 : vector<1x16x16x128xf32> to vector<256x128xf32>
    %c0_73 = arith.constant 0 : index
    %c0_74 = arith.constant 0 : index
    %c1_75 = arith.constant 1 : index
    %c0_76 = arith.constant 0 : index
    %40 = vector.load %arg15[%c0_73, %c0_74, %c1_75, %c0_76] : memref<1x18x18x128xf32, #tpu.memory_space<vmem>>, vector<1x16x16x128xf32>
    %41 = vector.shape_cast %40 : vector<1x16x16x128xf32> to vector<256x128xf32>
    %c0_77 = arith.constant 0 : index
    %c0_78 = arith.constant 0 : index
    %c2_79 = arith.constant 2 : index
    %c0_80 = arith.constant 0 : index
    %42 = vector.load %arg15[%c0_77, %c0_78, %c2_79, %c0_80] : memref<1x18x18x128xf32, #tpu.memory_space<vmem>>, vector<1x16x16x128xf32>
    %43 = vector.shape_cast %42 : vector<1x16x16x128xf32> to vector<256x128xf32>
    %c0_81 = arith.constant 0 : index
    %c1_82 = arith.constant 1 : index
    %c0_83 = arith.constant 0 : index
    %c0_84 = arith.constant 0 : index
    %44 = vector.load %arg15[%c0_81, %c1_82, %c0_83, %c0_84] : memref<1x18x18x128xf32, #tpu.memory_space<vmem>>, vector<1x16x16x128xf32>
    %45 = vector.shape_cast %44 : vector<1x16x16x128xf32> to vector<256x128xf32>
    %c0_85 = arith.constant 0 : index
    %c1_86 = arith.constant 1 : index
    %c1_87 = arith.constant 1 : index
    %c0_88 = arith.constant 0 : index
    %46 = vector.load %arg15[%c0_85, %c1_86, %c1_87, %c0_88] : memref<1x18x18x128xf32, #tpu.memory_space<vmem>>, vector<1x16x16x128xf32>
    %47 = vector.shape_cast %46 : vector<1x16x16x128xf32> to vector<256x128xf32>
    %c0_89 = arith.constant 0 : index
    %c1_90 = arith.constant 1 : index
    %c2_91 = arith.constant 2 : index
    %c0_92 = arith.constant 0 : index
    %48 = vector.load %arg15[%c0_89, %c1_90, %c2_91, %c0_92] : memref<1x18x18x128xf32, #tpu.memory_space<vmem>>, vector<1x16x16x128xf32>
    %49 = vector.shape_cast %48 : vector<1x16x16x128xf32> to vector<256x128xf32>
    %c0_93 = arith.constant 0 : index
    %c2_94 = arith.constant 2 : index
    %c0_95 = arith.constant 0 : index
    %c0_96 = arith.constant 0 : index
    %50 = vector.load %arg15[%c0_93, %c2_94, %c0_95, %c0_96] : memref<1x18x18x128xf32, #tpu.memory_space<vmem>>, vector<1x16x16x128xf32>
    %51 = vector.shape_cast %50 : vector<1x16x16x128xf32> to vector<256x128xf32>
    %c0_97 = arith.constant 0 : index
    %c2_98 = arith.constant 2 : index
    %c1_99 = arith.constant 1 : index
    %c0_100 = arith.constant 0 : index
    %52 = vector.load %arg15[%c0_97, %c2_98, %c1_99, %c0_100] : memref<1x18x18x128xf32, #tpu.memory_space<vmem>>, vector<1x16x16x128xf32>
    %53 = vector.shape_cast %52 : vector<1x16x16x128xf32> to vector<256x128xf32>
    %c0_101 = arith.constant 0 : index
    %c2_102 = arith.constant 2 : index
    %c2_103 = arith.constant 2 : index
    %c0_104 = arith.constant 0 : index
    %54 = vector.load %arg15[%c0_101, %c2_102, %c2_103, %c0_104] : memref<1x18x18x128xf32, #tpu.memory_space<vmem>>, vector<1x16x16x128xf32>
    %55 = vector.shape_cast %54 : vector<1x16x16x128xf32> to vector<256x128xf32>
    %56 = tpu.concatenate %39, %41, %43, %45, %47, %49, %51, %53, %55 in 1 : vector<256x128xf32>, vector<256x128xf32>, vector<256x128xf32>, vector<256x128xf32>, vector<256x128xf32>, vector<256x128xf32>, vector<256x128xf32>, vector<256x128xf32>, vector<256x128xf32> -> vector<256x1152xf32>
    %cst_105 = arith.constant dense<0.000000e+00> : vector<256x128xf32>
    %57 = tpu.matmul %56, %36, %cst_105 {dimension_numbers = #tpu.dot_dimension_numbers<[1], [0], [0], [1], [0, 0, 1, 1], [], []>} : vector<256x1152xf32>, vector<1152x128xf32>, vector<256x128xf32> -> vector<256x128xf32>
    %c0_106 = arith.constant 0 : index
    %c0_107 = arith.constant 0 : index
    %58 = vector.load %arg5[%c0_106, %c0_107] : memref<1x128xf32, #tpu.memory_space<vmem>>, vector<1x128xf32>
    %59 = vector.broadcast %58 : vector<1x128xf32> to vector<256x128xf32>
    %60 = arith.addf %57, %59 : vector<256x128xf32>
    %cst_108 = arith.constant 1.000000e+00 : f32
    %61 = vector.broadcast %cst_108 : f32 to vector<256x128xf32>
    %62 = arith.mulf %61, %60 : vector<256x128xf32>
    %63 = arith.addf %7, %62 : vector<256x128xf32>
    %c0_109 = arith.constant 0 : index
    %c0_110 = arith.constant 0 : index
    %64 = vector.load %arg6[%c0_109, %c0_110] : memref<128x128xf32, #tpu.memory_space<vmem>>, vector<128x128xf32>
    %c0_111 = arith.constant 0 : index
    %c0_112 = arith.constant 0 : index
    %65 = vector.load %arg8[%c0_111, %c0_112] : memref<128x128xf32, #tpu.memory_space<vmem>>, vector<128x128xf32>
    %cst_113 = arith.constant dense<0.000000e+00> : vector<256x128xf32>
    %66 = tpu.matmul %63, %64, %cst_113 {dimension_numbers = #tpu.dot_dimension_numbers<[1], [0], [0], [1], [0, 0, 1, 1], [], []>} : vector<256x128xf32>, vector<128x128xf32>, vector<256x128xf32> -> vector<256x128xf32>
    %c0_114 = arith.constant 0 : index
    %c0_115 = arith.constant 0 : index
    %67 = vector.load %arg7[%c0_114, %c0_115] : memref<1x128xf32, #tpu.memory_space<vmem>>, vector<1x128xf32>
    %68 = vector.broadcast %67 : vector<1x128xf32> to vector<256x128xf32>
    %69 = arith.addf %66, %68 : vector<256x128xf32>
    %cst_116 = arith.constant 0.000000e+00 : f32
    %70 = vector.broadcast %cst_116 : f32 to vector<256x128xf32>
    %71 = arith.maximumf %69, %70 : vector<256x128xf32>
    %cst_117 = arith.constant dense<0.000000e+00> : vector<256x128xf32>
    %72 = tpu.matmul %71, %65, %cst_117 {dimension_numbers = #tpu.dot_dimension_numbers<[1], [0], [0], [1], [0, 0, 1, 1], [], []>} : vector<256x128xf32>, vector<128x128xf32>, vector<256x128xf32> -> vector<256x128xf32>
    %c0_118 = arith.constant 0 : index
    %c0_119 = arith.constant 0 : index
    %73 = vector.load %arg9[%c0_118, %c0_119] : memref<1x128xf32, #tpu.memory_space<vmem>>, vector<1x128xf32>
    %74 = vector.broadcast %73 : vector<1x128xf32> to vector<256x128xf32>
    %75 = arith.addf %72, %74 : vector<256x128xf32>
    %76 = vector.shape_cast %75 : vector<256x128xf32> to vector<1x256x128xf32>
    %cst_120 = arith.constant dense<0.000000e+00> : vector<1x128xf32>
    %77 = vector.multi_reduction <add>, %76, %cst_120 [1] : vector<1x256x128xf32> to vector<1x128xf32>
    %cst_121 = arith.constant 2.560000e+02 : f32
    %78 = vector.broadcast %cst_121 : f32 to vector<1x128xf32>
    %79 = arith.divf %77, %78 : vector<1x128xf32>
    %c0_122 = arith.constant 0 : index
    %c0_123 = arith.constant 0 : index
    %80 = vector.load %arg10[%c0_122, %c0_123] : memref<128x128xf32, #tpu.memory_space<vmem>>, vector<128x128xf32>
    %cst_124 = arith.constant dense<0.000000e+00> : vector<1x128xf32>
    %81 = tpu.matmul %79, %80, %cst_124 {dimension_numbers = #tpu.dot_dimension_numbers<[1], [0], [0], [1], [0, 0, 1, 1], [], []>} : vector<1x128xf32>, vector<128x128xf32>, vector<1x128xf32> -> vector<1x128xf32>
    %c0_125 = arith.constant 0 : index
    %c0_126 = arith.constant 0 : index
    %82 = vector.load %arg11[%c0_125, %c0_126] : memref<1x128xf32, #tpu.memory_space<vmem>>, vector<1x128xf32>
    %83 = arith.addf %81, %82 : vector<1x128xf32>
    %cst_127 = arith.constant 0.000000e+00 : f32
    %84 = vector.broadcast %cst_127 : f32 to vector<1x128xf32>
    %85 = arith.maximumf %83, %84 : vector<1x128xf32>
    %c0_128 = arith.constant 0 : index
    %c0_129 = arith.constant 0 : index
    %86 = vector.load %arg12[%c0_128, %c0_129] : memref<128x128xf32, #tpu.memory_space<vmem>>, vector<128x128xf32>
    %cst_130 = arith.constant dense<0.000000e+00> : vector<1x128xf32>
    %87 = tpu.matmul %85, %86, %cst_130 {dimension_numbers = #tpu.dot_dimension_numbers<[1], [0], [0], [1], [0, 0, 1, 1], [], []>} : vector<1x128xf32>, vector<128x128xf32>, vector<1x128xf32> -> vector<1x128xf32>
    %c0_131 = arith.constant 0 : index
    %c0_132 = arith.constant 0 : index
    %88 = vector.load %arg13[%c0_131, %c0_132] : memref<1x128xf32, #tpu.memory_space<vmem>>, vector<1x128xf32>
    %89 = arith.addf %87, %88 : vector<1x128xf32>
    %90 = arith.negf %89 : vector<1x128xf32>
    %91 = math.exp %90 : vector<1x128xf32>
    %cst_133 = arith.constant 1.000000e+00 : f32
    %92 = vector.broadcast %cst_133 : f32 to vector<1x128xf32>
    %93 = arith.addf %92, %91 : vector<1x128xf32>
    %94 = arith.divf %92, %93 : vector<1x128xf32>
    %95 = vector.shape_cast %63 : vector<256x128xf32> to vector<1x256x128xf32>
    %cst_134 = arith.constant 1.000000e+00 : f32
    %96 = vector.broadcast %cst_134 : f32 to vector<1x256x128xf32>
    %97 = arith.mulf %96, %76 : vector<1x256x128xf32>
    %98 = vector.shape_cast %94 : vector<1x128xf32> to vector<1x1x128xf32>
    %99 = vector.broadcast %98 : vector<1x1x128xf32> to vector<1x256x128xf32>
    %100 = arith.mulf %97, %99 : vector<1x256x128xf32>
    %101 = arith.addf %95, %100 : vector<1x256x128xf32>
    %102 = vector.shape_cast %101 : vector<1x256x128xf32> to vector<1x16x16x128xf32>
    %c0_135 = arith.constant 0 : index
    %c0_136 = arith.constant 0 : index
    %c0_137 = arith.constant 0 : index
    %c0_138 = arith.constant 0 : index
    %103 = vector.load %arg14[%c0_135, %c0_136, %c0_137, %c0_138] : memref<1x16x16x128xf32, #tpu.memory_space<vmem>>, vector<1x16x16x128xf32>
    tpu.vector_store %arg14[%c0_135, %c0_136, %c0_137, %c0_138], %102 {strides = array<i32>} : memref<1x16x16x128xf32, #tpu.memory_space<vmem>>, vector<1x16x16x128xf32>,
    return
  }
  func.func @transform_0(%arg0: i32) -> (i32, i32, i32, i32) {
    %c0_i32 = arith.constant 0 : i32
    %c0_i32_0 = arith.constant 0 : i32
    %c0_i32_1 = arith.constant 0 : i32
    %c0_i32_2 = arith.constant 0 : i32
    return %arg0, %c0_i32, %c0_i32_0, %c0_i32_1 : i32, i32, i32, i32
  }
  func.func @transform_1(%arg0: i32) -> (i32, i32) {
    %c0_i32 = arith.constant 0 : i32
    %c0_i32_0 = arith.constant 0 : i32
    %c0_i32_1 = arith.constant 0 : i32
    return %c0_i32, %c0_i32_0 : i32, i32
  }
  func.func @transform_2(%arg0: i32) -> (i32, i32) {
    %c0_i32 = arith.constant 0 : i32
    %c0_i32_0 = arith.constant 0 : i32
    %c0_i32_1 = arith.constant 0 : i32
    return %c0_i32, %c0_i32_0 : i32, i32
  }
  func.func @transform_3(%arg0: i32) -> (i32, i32) {
    %c0_i32 = arith.constant 0 : i32
    %c0_i32_0 = arith.constant 0 : i32
    %c0_i32_1 = arith.constant 0 : i32
    return %c0_i32, %c0_i32_0 : i32, i32
  }
  func.func @transform_4(%arg0: i32) -> (i32, i32) {
    %c0_i32 = arith.constant 0 : i32
    %c0_i32_0 = arith.constant 0 : i32
    %c0_i32_1 = arith.constant 0 : i32
    return %c0_i32, %c0_i32_0 : i32, i32
  }
  func.func @transform_5(%arg0: i32) -> (i32, i32) {
    %c0_i32 = arith.constant 0 : i32
    %c0_i32_0 = arith.constant 0 : i32
    %c0_i32_1 = arith.constant 0 : i32
    return %c0_i32, %c0_i32_0 : i32, i32
  }
  func.func @transform_6(%arg0: i32) -> (i32, i32) {
    %c0_i32 = arith.constant 0 : i32
    %c0_i32_0 = arith.constant 0 : i32
    %c0_i32_1 = arith.constant 0 : i32
    return %c0_i32, %c0_i32_0 : i32, i32
  }
  func.func @transform_7(%arg0: i32) -> (i32, i32) {
    %c0_i32 = arith.constant 0 : i32
    %c0_i32_0 = arith.constant 0 : i32
    %c0_i32_1 = arith.constant 0 : i32
    return %c0_i32, %c0_i32_0 : i32, i32
  }
  func.func @transform_8(%arg0: i32) -> (i32, i32) {
    %c0_i32 = arith.constant 0 : i32
    %c0_i32_0 = arith.constant 0 : i32
    %c0_i32_1 = arith.constant 0 : i32
    return %c0_i32, %c0_i32_0 : i32, i32
  }
  func.func @transform_9(%arg0: i32) -> (i32, i32) {
    %c0_i32 = arith.constant 0 : i32
    %c0_i32_0 = arith.constant 0 : i32
    %c0_i32_1 = arith.constant 0 : i32
    return %c0_i32, %c0_i32_0 : i32, i32
  }
  func.func @transform_10(%arg0: i32) -> (i32, i32) {
    %c0_i32 = arith.constant 0 : i32
    %c0_i32_0 = arith.constant 0 : i32
    %c0_i32_1 = arith.constant 0 : i32
    return %c0_i32, %c0_i32_0 : i32, i32
  }
  func.func @transform_11(%arg0: i32) -> (i32, i32) {
    %c0_i32 = arith.constant 0 : i32
    %c0_i32_0 = arith.constant 0 : i32
    %c0_i32_1 = arith.constant 0 : i32
    return %c0_i32, %c0_i32_0 : i32, i32
  }
  func.func @transform_12(%arg0: i32) -> (i32, i32) {
    %c0_i32 = arith.constant 0 : i32
    %c0_i32_0 = arith.constant 0 : i32
    %c0_i32_1 = arith.constant 0 : i32
    return %c0_i32, %c0_i32_0 : i32, i32
  }
  func.func @transform_13(%arg0: i32) -> (i32, i32, i32, i32) {
    %c0_i32 = arith.constant 0 : i32
    %c0_i32_0 = arith.constant 0 : i32
    %c0_i32_1 = arith.constant 0 : i32
    %c0_i32_2 = arith.constant 0 : i32
    return %arg0, %c0_i32, %c0_i32_0, %c0_i32_1 : i32, i32, i32, i32
  }
}

</mosaic_0001>

<bundles_post_ra>
// kernel: ssb_forward.1
= control target key start
LH: loop header
LB: loop body
LE: loop exit
PB: predicated region body
PF: predicated region fallthrough
CT: control target
= control target key end

     0   :  { %s6449_s25 = smov 0   ;;  %s9335_s0 = inlined_call_operand.vmem [shape: f32[2,16,16,128], index: 0, kind: input, shape index: {}]   ;;  %s9336_s1 = inlined_call_operand.vmem [shape: f32[1152,128], index: 1, kind: input, shape index: {}]   ;;  %s9337_s2 = inlined_call_operand.vmem [shape: f32[1,128], index: 2, kind: input, shape index: {}]   ;;  %s9338_s3 = inlined_call_operand.vmem [shape: f32[1152,128], index: 3, kind: input, shape index: {}]   ;;  %s9339_s4 = inlined_call_operand.vmem [shape: f32[1,128], index: 4, kind: input, shape index: {}]   ;;  %s9340_s5 = inlined_call_operand.vmem [shape: f32[128,128], index: 5, kind: input, shape index: {}]   ;;  %s9341_s6 = inlined_call_operand.vmem [shape: f32[1,128], index: 6, kind: input, shape index: {}]   ;;  %s9342_s7 = inlined_call_operand.vmem [shape: f32[128,128], index: 7, kind: input, shape index: {}]   ;;  %s9343_s8 = inlined_call_operand.vmem [shape: f32[1,128], index: 8, kind: input, shape index: {}]   ;;  %s9344_s9 = inlined_call_operand.vmem [shape: f32[128,128], index: 9, kind: input, shape index: {}]   ;;  %s9345_s10 = inlined_call_operand.vmem [shape: f32[1,128], index: 10, kind: input, shape index: {}]   ;;  %s9346_s11 = inlined_call_operand.vmem [shape: f32[128,128], index: 11, kind: input, shape index: {}]   ;;  %s9347_s12 = inlined_call_operand.vmem [shape: f32[1,128], index: 12, kind: input, shape index: {}]   ;;  %s9348_s13 = inlined_call_operand.vmem [shape: f32[2,16,16,128], index: 13, kind: output, shape index: {}]  }
   0x1 LB: > { %s4677_s26 = sadd.s32 4294967295, %s6374_s25   ;;  %p4681_p0 = scmp.ge.s32.totalorder %s6374_s25, 1  ;;  %s6374_s25 = sphi %s6449_s25, %s23_s25  }
   0x2   : > { %p387_p1 = scmp.lt.s32.totalorder %s6374_s25, 3 }
   0x4   : > { %p388_p2 = pnand %p4681_p0, %p387_p1 }
   0x6   : > { %391 = sbr.rel (%p388_p2) target bundleno = 2345 (0x929), region = 72 }
   0xd   : > { %v516_v0 = vld [vmem:[%s9336_s1] sm:$0xff]  ;;  %v517_v1 = vld [vmem:[%s9336_s1 + $0x8] sm:$0xff]  ;;  %v518_v2 = vld [vmem:[%s9336_s1 + $0x10] sm:$0xff]  ;;  %p6468_p3 = scmp.lt.s32.totalorder %s4677_s26, 1  ;;  %v9360_v3 = vmov 0.0|0.0   ;;  %v6377_v6 = vmov 0.0  }
   0xe   : > { %5311 = vmatprep.subr.bf16.mxu0 %v9360_v3  ;;  %v5312_v4 = vpack.c.bf16 %v517_v1, %v516_v0  ;;  %v519_v5 = vld [vmem:[%s9336_s1 + $0x18] sm:$0xff]  ;;  %441 = vst [vmem:[#allocation2] sm:$0xff] %v6377_v6  ;;  %442 = vst [vmem:[#allocation2 + $0x8] sm:$0xff] %v6377_v6  ;;  %v520_v8 = vld [vmem:[%s9336_s1 + $0x20] sm:$0xff]  ;;  %vm6378_vm0 = vmmov 0  }
   0xf   : > { %443 = vst [vmem:[#allocation2 + $0x10] sm:$0x3] %v6377_v6  ;;  %445 = vst [vmem:[#allocation2 + $0x198] sm:$0xff] %v6377_v6  ;;  %s9548_s26 = smov (!%p6468_p3, %s4677_s26), 1  ;;  %v5315_v7 = vpack.c.bf16 %v519_v5, %v518_v2  ;;  %v521_v9 = vld [vmem:[%s9336_s1 + $0x28] sm:$0xff]  ;;  %v522_v11 = vld [vmem:[%s9336_s1 + $0x30] sm:$0xff] }
  0x10   : > { %446 = vst [vmem:[#allocation2 + $0x1a0] sm:$0xff] %v6377_v6  ;;  %447 = vst [vmem:[#allocation2 + $0x1a8] sm:$0x3] %v6377_v6  ;;  %5313 = vmatpush1.bf16.msra.mxu0 %v5312_v4  ;;  %s4693_s23 = sshll.u32 %s9548_s26, 8  ;;  %v5318_v10 = vpack.c.bf16 %v521_v9, %v520_v8  ;;  %v523_v12 = vld [vmem:[%s9336_s1 + $0x38] sm:$0xff]  ;;  %v524_v15 = vld [vmem:[%s9336_s1 + $0x40] sm:$0xff] }
  0x11   : > { %449 = vst [vmem:[#allocation2 + $0x18] sm:$0x1] %v6377_v6  ;;  %450 = vst [vmem:[#allocation2 + $0x30] sm:$0x1] %v6377_v6  ;;  %5314 = vmatprep.subr.bf16.mxu0 %v9360_v3  ;;  %s6544_s15 = scalar_lea.vmem %s9335_s0, %s4693_s23  ;;  %v5321_v14 = vpack.c.bf16 %v523_v12, %v522_v11  ;;  %v525_v16 = vld [vmem:[%s9336_s1 + $0x48] sm:$0xff]  ;;  %v526_v22 = vld [vmem:[%s9336_s1 + $0x50] sm:$0xff] }
  0x12   : > { %451 = vst [vmem:[#allocation2 + $0x48] sm:$0x1] %v6377_v6  ;;  %452 = vst [vmem:[#allocation2 + $0x60] sm:$0x1] %v6377_v6  ;;  %v6554_v17 = vld [vmem:[%s6544_s15] sm:$0xff]  ;;  %v6558_v18 = vld [vmem:[%s6544_s15 + $0x8] sm:$0xff]  ;;  %v5324_v21 = vpack.c.bf16 %v525_v16, %v524_v15 }
  0x13   : > { %453 = vst [vmem:[#allocation2 + $0x78] sm:$0x1] %v6377_v6  ;;  %454 = vst [vmem:[#allocation2 + $0x90] sm:$0x1] %v6377_v6  ;;  %v6561_v19 = vld [vmem:[%s6544_s15 + $0x10] sm:$0xff]  ;;  %v6566_v20 = vld [vmem:[%s6544_s15 + $0x18] sm:$0xff] }
  0x14   : > { %455 = vst [vmem:[#allocation2 + $0xa8] sm:$0x1] %v6377_v6  ;;  %456 = vst [vmem:[#allocation2 + $0xc0] sm:$0x1] %v6377_v6  ;;  %5316 = vmatpush1.bf16.msra.mxu0 %v5315_v7  ;;  %v6573_v23 = vld [vmem:[%s6544_s15 + $0x20] sm:$0xff]  ;;  %v527_v24 = vld [vmem:[%s9336_s1 + $0x58] sm:$0xff] }
  0x15   : > { %457 = vst [vmem:[#allocation2 + $0xd8] sm:$0x1] %v6377_v6  ;;  %458 = vst [vmem:[#allocation2 + $0xf0] sm:$0x1] %v6377_v6  ;;  %5317 = vmatprep.subr.bf16.mxu0 %v9360_v3  ;;  %v725_v13 = vld [vmem:[#allocation2 + $0x1] sm:$0xff]  ;;  %v6584_v26 = vld [vmem:[%s6544_s15 + $0x30] sm:$0xff]  ;;  %v5327_v30 = vpack.c.bf16 %v527_v24, %v526_v22 }
  0x16   : > { %459 = vst [vmem:[#allocation2 + $0x108] sm:$0x1] %v6377_v6  ;;  %460 = vst [vmem:[#allocation2 + $0x120] sm:$0x1] %v6377_v6  ;;  %1053 = vmatprep.mubr.f32.mxu0 %v725_v13  ;;  %v6581_v25 = vld [vmem:[%s6544_s15 + $0x28] sm:$0xff]  ;;  %v6589_v27 = vld [vmem:[%s6544_s15 + $0x38] sm:$0xff] }
  0x17   : > { %461 = vst [vmem:[#allocation2 + $0x138] sm:$0x1] %v6377_v6  ;;  %462 = vst [vmem:[#allocation2 + $0x150] sm:$0x1] %v6377_v6  ;;  %v6592_v28 = vld [vmem:[%s6544_s15 + $0x40] sm:$0xff]  ;;  %v6597_v29 = vld [vmem:[%s6544_s15 + $0x48] sm:$0xff] }
  0x18   : > { %463 = vst [vmem:[#allocation2 + $0x168] sm:$0x1] %v6377_v6  ;;  %464 = vst [vmem:[#allocation2 + $0x180] sm:$0x1] %v6377_v6  ;;  %5319 = vmatpush1.bf16.msra.mxu0 %v5318_v10  ;;  %v528_v31 = vld [vmem:[%s9336_s1 + $0x60] sm:$0xff]  ;;  %v6604_v32 = vld [vmem:[%s6544_s15 + $0x50] sm:$0xff] }
  0x19   : > { %467 = vst [vmem:[#allocation2 + $0x29] sm:$0x1] %v6377_v6  ;;  %468 = vst [vmem:[#allocation2 + $0x41] sm:$0x1] %v6377_v6  ;;  %5320 = vmatprep.subr.bf16.mxu0 %v9360_v3  ;;  %v529_v33 = vld [vmem:[%s9336_s1 + $0x68] sm:$0xff]  ;;  %v6612_v34 = vld [vmem:[%s6544_s15 + $0x58] sm:$0xff] }
  0x1a   : > { %469 = vst [vmem:[#allocation2 + $0x59] sm:$0x1] %v6377_v6  ;;  %470 = vst [vmem:[#allocation2 + $0x71] sm:$0x1] %v6377_v6  ;;  %v6615_v35 = vld [vmem:[%s6544_s15 + $0x60] sm:$0xff]  ;;  %v6620_v36 = vld [vmem:[%s6544_s15 + $0x68] sm:$0xff]  ;;  %v5330_v37 = vpack.c.bf16 %v529_v33, %v528_v31 }
  0x1b   : > { %471 = vst [vmem:[#allocation2 + $0x89] sm:$0x1] %v6377_v6  ;;  %472 = vst [vmem:[#allocation2 + $0xa1] sm:$0x1] %v6377_v6  ;;  %v6624_v38 = vld [vmem:[%s6544_s15 + $0x70] sm:$0xff]  ;;  %v531_v40 = vld [vmem:[%s9336_s1 + $0x78] sm:$0xff] }
  0x1c   : > { %473 = vst [vmem:[#allocation2 + $0xb9] sm:$0x1] %v6377_v6  ;;  %474 = vst [vmem:[#allocation2 + $0xd1] sm:$0x1] %v6377_v6  ;;  %5322 = vmatpush1.bf16.msra.mxu0 %v5321_v14  ;;  %v530_v39 = vld [vmem:[%s9336_s1 + $0x70] sm:$0xff]  ;;  %v6635_v41 = vld [vmem:[%s6544_s15 + $0x78] sm:$0xff] }
  0x1d   : > { %475 = vst [vmem:[#allocation2 + $0xe9] sm:$0x1] %v6377_v6  ;;  %476 = vst [vmem:[#allocation2 + $0x101] sm:$0x1] %v6377_v6  ;;  %5323 = vmatprep.subr.bf16.mxu0 %v9360_v3  ;;  %v6639_v42 = vld [vmem:[%s6544_s15 + $0x80] sm:$0xff]  ;;  %v5333_v43 = vpack.c.bf16 %v531_v40, %v530_v39  ;;  %v6643_v44 = vld [vmem:[%s6544_s15 + $0x88] sm:$0xff] }
  0x1e   : > { %477 = vst [vmem:[#allocation2 + $0x119] sm:$0x1] %v6377_v6  ;;  %478 = vst [vmem:[#allocation2 + $0x131] sm:$0x1] %v6377_v6  ;;  %v532_v45 = vld [vmem:[%s9336_s1 + $0x80] sm:$0xff]  ;;  %v533_v46 = vld [vmem:[%s9336_s1 + $0x88] sm:$0xff] }
  0x1f   : > { %479 = vst [vmem:[#allocation2 + $0x149] sm:$0x1] %v6377_v6  ;;  %480 = vst [vmem:[#allocation2 + $0x161] sm:$0x1] %v6377_v6  ;;  %v6654_v47 = vld [vmem:[%s6544_s15 + $0x90] sm:$0xff]  ;;  %v6658_v48 = vld [vmem:[%s6544_s15 + $0x98] sm:$0xff]  ;;  %v5336_v50 = vpack.c.bf16 %v533_v46, %v532_v45 }
  0x20   : > { %481 = vst [vmem:[#allocation2 + $0x179] sm:$0x1] %v6377_v6  ;;  %482 = vst [vmem:[#allocation2 + $0x191] sm:$0x1] %v6377_v6  ;;  %5325 = vmatpush1.bf16.msra.mxu0 %v5324_v21  ;;  %v6662_v49 = vld [vmem:[%s6544_s15 + $0xa0] sm:$0xff]  ;;  %v534_v51 = vld [vmem:[%s9336_s1 + $0x90] sm:$0xff] }
  0x21   : > { %448 = vst [vmem:[#allocation2] sm:$0x1] %v6377_v6  ;;  %465 = vst [vmem:[#allocation2 + $0x198] sm:$0x1] %v6377_v6  ;;  %5326 = vmatprep.subr.bf16.mxu0 %v9360_v3  ;;  %v6669_v52 = vld [vmem:[%s6544_s15 + $0xa8] sm:$0xff]  ;;  %v535_v53 = vld [vmem:[%s9336_s1 + $0x98] sm:$0xff] }
  0x22   : > { %466 = vst [vmem:[#allocation2 + $0x11] sm:$0x1] %v6377_v6  ;;  %483 = vst [vmem:[#allocation2 + $0x1a9] sm:$0x1] %v6377_v6  ;;  %v6677_v54 = vld [vmem:[%s6544_s15 + $0xb0] sm:$0xff]  ;;  %v6680_v55 = vld [vmem:[%s6544_s15 + $0xb8] sm:$0xff]  ;;  %v5339_v57 = vpack.c.bf16 %v535_v53, %v534_v51 }
  0x23   : > { %661 = vst [vmem:[#allocation2 + $0x19] sm:$0xff] %v6554_v17  ;;  %662 = vst [vmem:[#allocation2 + $0x21] sm:$0xff] %v6558_v18  ;;  %v6685_v56 = vld [vmem:[%s6544_s15 + $0xc0] sm:$0xff]  ;;  %v537_v59 = vld [vmem:[%s9336_s1 + $0xa8] sm:$0xff] }
  0x24   : > { %663 = vst [vmem:[#allocation2 + $0x31] sm:$0xff] %v6561_v19  ;;  %664 = vst [vmem:[#allocation2 + $0x39] sm:$0xff] %v6566_v20  ;;  %5328 = vmatpush1.bf16.msra.mxu0 %v5327_v30  ;;  %v536_v58 = vld [vmem:[%s9336_s1 + $0xa0] sm:$0xff]  ;;  %v6696_v60 = vld [vmem:[%s6544_s15 + $0xc8] sm:$0xff] }
  0x25   : > { %665 = vst [vmem:[#allocation2 + $0x49] sm:$0xff] %v6573_v23  ;;  %666 = vst [vmem:[#allocation2 + $0x51] sm:$0xff] %v6581_v25  ;;  %5329 = vmatprep.subr.bf16.mxu0 %v9360_v3  ;;  %v5342_v61 = vpack.c.bf16 %v537_v59, %v536_v58  ;;  %v538_v62 = vld [vmem:[%s9336_s1 + $0xb0] sm:$0xff]  ;;  %v539_v63 = vld [vmem:[%s9336_s1 + $0xb8] sm:$0xff] }
  0x26   : > { %667 = vst [vmem:[#allocation2 + $0x61] sm:$0xff] %v6584_v26  ;;  %668 = vst [vmem:[#allocation2 + $0x69] sm:$0xff] %v6589_v27  ;;  %v6707_v0 = vld [vmem:[%s6544_s15 + $0xd0] sm:$0xff]  ;;  %v5345_v1 = vpack.c.bf16 %v539_v63, %v538_v62  ;;  %v540_v2 = vld [vmem:[%s9336_s1 + $0xc0] sm:$0xff] }
  0x27   : > { %669 = vst [vmem:[#allocation2 + $0x79] sm:$0xff] %v6592_v28  ;;  %670 = vst [vmem:[#allocation2 + $0x81] sm:$0xff] %v6597_v29  ;;  %v541_v4 = vld [vmem:[%s9336_s1 + $0xc8] sm:$0xff]  ;;  %v6718_v5 = vld [vmem:[%s6544_s15 + $0xd8] sm:$0xff] }
  0x28   : > { %671 = vst [vmem:[#allocation2 + $0x91] sm:$0xff] %v6604_v32  ;;  %672 = vst [vmem:[#allocation2 + $0x99] sm:$0xff] %v6612_v34  ;;  %5331 = vmatpush1.bf16.msra.mxu0 %v5330_v37  ;;  %v5348_v7 = vpack.c.bf16 %v541_v4, %v540_v2  ;;  %v542_v8 = vld [vmem:[%s9336_s1 + $0xd0] sm:$0xff]  ;;  %v543_v9 = vld [vmem:[%s9336_s1 + $0xd8] sm:$0xff] }
  0x29   : > { %673 = vst [vmem:[#allocation2 + $0xa9] sm:$0xff] %v6615_v35  ;;  %674 = vst [vmem:[#allocation2 + $0xb1] sm:$0xff] %v6620_v36  ;;  %5332 = vmatprep.subr.bf16.mxu0 %v9360_v3  ;;  %v6729_v10 = vld [vmem:[%s6544_s15 + $0xe0] sm:$0xff]  ;;  %v5351_v11 = vpack.c.bf16 %v543_v9, %v542_v8  ;;  %v545_v13 = vld [vmem:[%s9336_s1 + $0xe8] sm:$0xff] }
  0x2a   : > { %675 = vst [vmem:[#allocation2 + $0xc1] sm:$0xff] %v6624_v38  ;;  %676 = vst [vmem:[#allocation2 + $0xc9] sm:$0xff] %v6635_v41  ;;  %v544_v12 = vld [vmem:[%s9336_s1 + $0xe0] sm:$0xff]  ;;  %v6740_v14 = vld [vmem:[%s6544_s15 + $0xe8] sm:$0xff] }
  0x2b   : > { %677 = vst [vmem:[#allocation2 + $0xd9] sm:$0xff] %v6639_v42  ;;  %678 = vst [vmem:[#allocation2 + $0xe1] sm:$0xff] %v6643_v44  ;;  %v5354_v15 = vpack.c.bf16 %v545_v13, %v544_v12  ;;  %v546_v16 = vld [vmem:[%s9336_s1 + $0xf0] sm:$0xff]  ;;  %v547_v21 = vld [vmem:[%s9336_s1 + $0xf8] sm:$0xff] }
  0x2c   : > { %679 = vst [vmem:[#allocation2 + $0xf1] sm:$0xff] %v6654_v47  ;;  %680 = vst [vmem:[#allocation2 + $0xf9] sm:$0xff] %v6658_v48  ;;  %5334 = vmatpush1.bf16.msra.mxu0 %v5333_v43  ;;  %v5357_v22 = vpack.c.bf16 %v547_v21, %v546_v16  ;;  %v548_v24 = vld [vmem:[%s9336_s1 + $0x100] sm:$0xff]  ;;  %v549_v30 = vld [vmem:[%s9336_s1 + $0x108] sm:$0xff] }
  0x2d   : > { %681 = vst [vmem:[#allocation2 + $0x109] sm:$0xff] %v6662_v49  ;;  %5335 = vmatprep.subr.bf16.mxu0 %v9360_v3  ;;  %682 = vst [vmem:[#allocation2 + $0x111] sm:$0xff] %v6669_v52  ;;  %v693_v31 = vld [vmem:[#allocation2] sm:$0xff]  ;;  %v5360_v33 = vpack.c.bf16 %v549_v30, %v548_v24  ;;  %v726_v37 = vld [vmem:[#allocation2 + $0x9] sm:$0xff] }
  0x2e   : > { %683 = vst [vmem:[#allocation2 + $0x121] sm:$0xff] %v6677_v54  ;;  %684 = vst [vmem:[#allocation2 + $0x129] sm:$0xff] %v6680_v55  ;;  %v550_v39 = vld [vmem:[%s9336_s1 + $0x110] sm:$0xff]  ;;  %v551_v40 = vld [vmem:[%s9336_s1 + $0x118] sm:$0xff] }
  0x2f   : > { %685 = vst [vmem:[#allocation2 + $0x139] sm:$0xff] %v6685_v56  ;;  %686 = vst [vmem:[#allocation2 + $0x141] sm:$0xff] %v6696_v60  ;;  %v5363_v43 = vpack.c.bf16 %v551_v40, %v550_v39  ;;  %v552_v45 = vld [vmem:[%s9336_s1 + $0x120] sm:$0xff]  ;;  %v553_v46 = vld [vmem:[%s9336_s1 + $0x128] sm:$0xff] }
  0x30   : > { %5337 = vmatpush1.bf16.msra.mxu0 %v5336_v50  ;;  %687 = vst [vmem:[#allocation2 + $0x151] sm:$0xff] %v6707_v0  ;;  %688 = vst [vmem:[#allocation2 + $0x159] sm:$0xff] %v6718_v5  ;;  %v6773_v50 = vld [vmem:[#allocation2 + $0x18] sm:$0xff]  ;;  %v5366_v51 = vpack.c.bf16 %v553_v46, %v552_v45  ;;  %v554_v53 = vld [vmem:[%s9336_s1 + $0x130] sm:$0xff] }
  0x31   : > { %5338 = vmatprep.subr.bf16.mxu0 %v9360_v3  ;;  %689 = vst [vmem:[#allocation2 + $0x169] sm:$0xff] %v6729_v10  ;;  %690 = vst [vmem:[#allocation2 + $0x171] sm:$0xff] %v6740_v14  ;;  %v556_v58 = vld [vmem:[%s9336_s1 + $0x140] sm:$0xff]  ;;  %v557_v59 = vld [vmem:[%s9336_s1 + $0x148] sm:$0xff] }
  0x32   : > { %v6797_v62 = vld [vmem:[#allocation2 + $0x32] sm:$0xff]  ;;  %v560_v4 = vld [vmem:[%s9336_s1 + $0x160] sm:$0xff]  ;;  %v6820_v8 = vld [vmem:[#allocation2 + $0x48] sm:$0xff] }
  0x33   : > { %v558_v63 = vld [vmem:[%s9336_s1 + $0x150] sm:$0xff]  ;;  %4953 = vmatprep.mubr.f32.mxu1 %v6797_v62  ;;  %v564_v13 = vld [vmem:[%s9336_s1 + $0x180] sm:$0xff]  ;;  %v6853_v24 = vld [vmem:[#allocation2 + $0x68] sm:$0xff] }
  0x34   : > { %5340 = vmatpush1.bf16.msra.mxu0 %v5339_v57  ;;  %v555_v57 = vld [vmem:[%s9336_s1 + $0x138] sm:$0xff]  ;;  %v562_v9 = vld [vmem:[%s9336_s1 + $0x170] sm:$0xff]  ;;  %v6842_v16 = vld [vmem:[#allocation2 + $0x60] sm:$0xff] }
  0x35   : > { %5341 = vmatprep.subr.bf16.mxu0 %v9360_v3  ;;  %v6831_v12 = vld [vmem:[#allocation2 + $0x50] sm:$0xff]  ;;  %v568_v30 = vld [vmem:[%s9336_s1 + $0x1a0] sm:$0xff]  ;;  %v571_v39 = vld [vmem:[%s9336_s1 + $0x1b8] sm:$0xff] }
  0x36   : > { %v566_v21 = vld [vmem:[%s9336_s1 + $0x190] sm:$0xff]  ;;  %v6875_v40 = vld [vmem:[#allocation2 + $0x80] sm:$0xff]  ;;  %v573_v45 = vld [vmem:[%s9336_s1 + $0x1c8] sm:$0xff] }
  0x37   : > { %v6886_v46 = vld [vmem:[#allocation2 + $0x90] sm:$0xff] }
  0x38   : > { %5343 = vmatpush1.bf16.msra.mxu0 %v5342_v61  ;;  %v6795_v61 = vld [vmem:[#allocation2 + $0x30] sm:$0xff] }
  0x39   : > { %5344 = vmatprep.subr.bf16.mxu0 %v9360_v3 }
  0x3c   : > { %5346 = vmatpush1.bf16.msra.mxu0 %v5345_v1  ;;  %v559_v1 = vld [vmem:[%s9336_s1 + $0x158] sm:$0xff] }
  0x3d   : > { %5347 = vmatprep.subr.bf16.mxu0 %v9360_v3  ;;  %v5375_v2 = vpack.c.bf16 %v559_v1, %v558_v63  ;;  %v579_v63 = vld [vmem:[%s9336_s1 + $0x1f8] sm:$0xff]  ;;  %v6919_v1 = vld [vmem:[#allocation2 + $0xb0] sm:$0xff] }
  0x40   : > { %5349 = vmatpush1.bf16.msra.mxu0 %v5348_v7  ;;  %v561_v7 = vld [vmem:[%s9336_s1 + $0x168] sm:$0xff] }
  0x41   : > { %5350 = vmatprep.subr.bf16.mxu0 %v9360_v3 }
  0x44   : > { %5352 = vmatpush1.bf16.msra.mxu0 %v5351_v11  ;;  %v563_v11 = vld [vmem:[%s9336_s1 + $0x178] sm:$0xff] }
  0x45   : > { %5353 = vmatprep.subr.bf16.mxu0 %v9360_v3 }
  0x48   : > { %5355 = vmatpush1.bf16.msra.mxu0 %v5354_v15  ;;  %v565_v15 = vld [vmem:[%s9336_s1 + $0x188] sm:$0xff] }
  0x49   : > { %5356 = vmatprep.subr.bf16.mxu0 %v9360_v3 }
  0x4c   : > { %5358 = vmatpush1.bf16.msra.mxu0 %v5357_v22  ;;  %v567_v22 = vld [vmem:[%s9336_s1 + $0x198] sm:$0xff] }
  0x4d   : > { %5359 = vmatprep.subr.bf16.mxu0 %v9360_v3 }
  0x4f   : > { %1054 = vmatmul.mubr.f32.vlgmr.msra.gmra.mrb[0].mxu0 %v693_v31  ;;  %v569_v31 = vld [vmem:[%s9336_s1 + $0x1a8] sm:$0xff] }
  0x50   : > { %5361 = vmatpush1.bf16.msra.mxu0 %v5360_v33  ;;  %1058 = vmatprep.mubr.f32.mxu0 %v726_v37  ;;  %v6864_v33 = vld [vmem:[#allocation2 + $0x78] sm:$0xff]  ;;  %v570_v37 = vld [vmem:[%s9336_s1 + $0x1b0] sm:$0xff] }
  0x51   : > { %5362 = vmatprep.subr.bf16.mxu0 %v9360_v3 }
  0x53   : > { %1059 = vmatmul.mubr.f32.gmra.mrb[2].mxu0 %v6377_v6  ;;  %v6784_v6 = vld [vmem:[#allocation2 + $0x20] sm:$0xff] }
  0x54   : > { %1063 = vmatprep.mubr.f32.mxu0 %v6554_v17  ;;  %5364 = vmatpush1.bf16.msra.mxu0 %v5363_v43  ;;  %v5369_v17 = vpack.c.bf16 %v555_v57, %v554_v53  ;;  %v572_v43 = vld [vmem:[%s9336_s1 + $0x1c0] sm:$0xff]  ;;  %v575_v53 = vld [vmem:[%s9336_s1 + $0x1d8] sm:$0xff] }
  0x55   : > { %5365 = vmatprep.subr.bf16.mxu0 %v9360_v3  ;;  %v6897_v57 = vld [vmem:[#allocation2 + $0x98] sm:$0xff] }
  0x57   : > { %1064 = vmatmul.mubr.f32.gmra.mrb[4].mxu0 %v6773_v50 }
  0x58   : > { %1068 = vmatprep.mubr.f32.mxu0 %v6558_v18  ;;  %5367 = vmatpush1.bf16.msra.mxu0 %v5366_v51  ;;  %v5372_v18 = vpack.c.bf16 %v557_v59, %v556_v58  ;;  %v574_v51 = vld [vmem:[%s9336_s1 + $0x1d0] sm:$0xff]  ;;  %v577_v58 = vld [vmem:[%s9336_s1 + $0x1e8] sm:$0xff] }
  0x59   : > { %5368 = vmatprep.subr.bf16.mxu0 %v9360_v3  ;;  %v6908_v59 = vld [vmem:[#allocation2 + $0xa8] sm:$0xff] }
  0x5b   : > { %1069 = vmatmul.mubr.f32.gmra.mrb[6].mxu0 %v6784_v6 }
  0x5c   : > { %1073 = vmatprep.mubr.f32.mxu0 %v6561_v19  ;;  %5370 = vmatpush1.bf16.msra.mxu0 %v5369_v17  ;;  %v6809_v19 = vld [vmem:[#allocation2 + $0x38] sm:$0xff]  ;;  %v576_v17 = vld [vmem:[%s9336_s1 + $0x1e0] sm:$0xff] }
  0x5d   : > { %5371 = vmatprep.subr.bf16.mxu0 %v9360_v3 }
  0x5f   : > { %1074 = vmatmul.mubr.f32.gmra.mrb[8].mxu0 %v6795_v61 }
  0x60   : > { %1078 = vmatprep.mubr.f32.mxu0 %v6566_v20  ;;  %5373 = vmatpush1.bf16.msra.mxu0 %v5372_v18  ;;  %v5378_v20 = vpack.c.bf16 %v561_v7, %v560_v4  ;;  %v578_v18 = vld [vmem:[%s9336_s1 + $0x1f0] sm:$0xff]  ;;  %v6933_v4 = vld [vmem:[#allocation2 + $0xd8] sm:$0xff] }
  0x61   : > { %5374 = vmatprep.subr.bf16.mxu0 %v9360_v3  ;;  %v6941_v7 = vld [vmem:[#allocation2 + $0xf0] sm:$0xff] }
  0x63   : > { %1079 = vmatmul.mubr.f32.gmra.mrb[10].mxu0 %v6809_v19 }
  0x64   : > { %1083 = vmatprep.mubr.f32.mxu0 %v6573_v23  ;;  %5376 = vmatpush1.bf16.msra.mxu0 %v5375_v2  ;;  %v5381_v23 = vpack.c.bf16 %v563_v11, %v562_v9  ;;  %v6924_v2 = vld [vmem:[#allocation2 + $0xc0] sm:$0xff]  ;;  %v581_v9 = vld [vmem:[%s9336_s1 + $0x208] sm:$0xff] }
  0x65   : > { %5377 = vmatprep.subr.bf16.mxu0 %v9360_v3 }
  0x67   : > { %1084 = vmatmul.mubr.f32.gmra.mrb[12].mxu0 %v6820_v8 }
  0x68   : > { %1088 = vmatprep.mubr.f32.mxu0 %v6581_v25  ;;  %5379 = vmatpush1.bf16.msra.mxu0 %v5378_v20  ;;  %v5384_v25 = vpack.c.bf16 %v565_v15, %v564_v13  ;;  %v6984_v20 = vld [vmem:[%s6544_s15 + $0xf8] sm:$0xff]  ;;  %v758_v13 = vld [vmem:[#allocation2 + $0xa] sm:$0xff] }
  0x69   : > { %5380 = vmatprep.subr.bf16.mxu0 %v9360_v3  ;;  %692 = vst [vmem:[#allocation2 + $0x189] sm:$0xff] %v6984_v20 }
  0x6b   : > { %1089 = vmatmul.mubr.f32.gmra.mrb[14].mxu0 %v6831_v12 }
  0x6c   : > { %1093 = vmatprep.mubr.f32.mxu0 %v6584_v26  ;;  %5382 = vmatpush1.bf16.msra.mxu0 %v5381_v23  ;;  %v5387_v26 = vpack.c.bf16 %v567_v22, %v566_v21  ;;  %v583_v23 = vld [vmem:[%s9336_s1 + $0x218] sm:$0xff] }
  0x6d   : > { %5383 = vmatprep.subr.bf16.mxu0 %v9360_v3  ;;  %v7018_v21 = vld [vmem:[#allocation2 + $0x1a] sm:$0xff] }
  0x6f   : > { %1094 = vmatmul.mubr.f32.gmra.mrb[16].mxu0 %v6842_v16 }
  0x70   : > { %1098 = vmatprep.mubr.f32.mxu0 %v6589_v27  ;;  %5385 = vmatpush1.bf16.msra.mxu0 %v5384_v25  ;;  %v5390_v27 = vpack.c.bf16 %v569_v31, %v568_v30  ;;  %v585_v25 = vld [vmem:[%s9336_s1 + $0x228] sm:$0xff]  ;;  %v588_v31 = vld [vmem:[%s9336_s1 + $0x240] sm:$0xff] }
  0x71   : > { %5386 = vmatprep.subr.bf16.mxu0 %v9360_v3  ;;  %v7029_v30 = vld [vmem:[#allocation2 + $0x22] sm:$0xff] }
  0x73   : > { %1099 = vmatmul.mubr.f32.gmra.mrb[18].mxu0 %v6853_v24 }
  0x74   : > { %1103 = vmatprep.mubr.f32.mxu0 %v6592_v28  ;;  %5388 = vmatpush1.bf16.msra.mxu0 %v5387_v26  ;;  %v5393_v28 = vpack.c.bf16 %v571_v39, %v570_v37  ;;  %v587_v26 = vld [vmem:[%s9336_s1 + $0x238] sm:$0xff]  ;;  %v590_v37 = vld [vmem:[%s9336_s1 + $0x250] sm:$0xff] }
  0x75   : > { %5389 = vmatprep.subr.bf16.mxu0 %v9360_v3  ;;  %v591_v39 = vld [vmem:[%s9336_s1 + $0x258] sm:$0xff] }
  0x77   : > { %1104 = vmatmul.mubr.f32.gmra.mrb[20].mxu0 %v6864_v33 }
  0x78   : > { %1108 = vmatprep.mubr.f32.mxu0 %v6597_v29  ;;  %5391 = vmatpush1.bf16.msra.mxu0 %v5390_v27  ;;  %v5396_v29 = vpack.c.bf16 %v573_v45, %v572_v43  ;;  %v589_v27 = vld [vmem:[%s9336_s1 + $0x248] sm:$0xff]  ;;  %v592_v43 = vld [vmem:[%s9336_s1 + $0x260] sm:$0xff] }
  0x79   : > { %5392 = vmatprep.subr.bf16.mxu0 %v9360_v3  ;;  %v593_v45 = vld [vmem:[%s9336_s1 + $0x268] sm:$0xff] }
  0x7b   : > { %1109 = vmatmul.mubr.f32.gmra.mrb[22].mxu0 %v6875_v40 }
  0x7c   : > { %1113 = vmatprep.mubr.f32.mxu0 %v6604_v32  ;;  %5394 = vmatpush1.bf16.msra.mxu0 %v5393_v28  ;;  %v5399_v32 = vpack.c.bf16 %v575_v53, %v574_v51  ;;  %v7049_v28 = vld [vmem:[#allocation2 + $0x3a] sm:$0xff]  ;;  %v594_v51 = vld [vmem:[%s9336_s1 + $0x270] sm:$0xff] }
  0x7d   : > { %5395 = vmatprep.subr.bf16.mxu0 %v9360_v3  ;;  %v595_v53 = vld [vmem:[%s9336_s1 + $0x278] sm:$0xff] }
  0x7f   : > { %1114 = vmatmul.mubr.f32.gmra.mrb[24].mxu0 %v6886_v46 }
  0x80   : > { %1118 = vmatprep.mubr.f32.mxu0 %v6612_v34  ;;  %5397 = vmatpush1.bf16.msra.mxu0 %v5396_v29  ;;  %v5402_v34 = vpack.c.bf16 %v577_v58, %v576_v17  ;;  %v7060_v29 = vld [vmem:[#allocation2 + $0x4a] sm:$0xff]  ;;  %v596_v17 = vld [vmem:[%s9336_s1 + $0x280] sm:$0xff] }
  0x81   : > { %5398 = vmatprep.subr.bf16.mxu0 %v9360_v3  ;;  %v597_v58 = vld [vmem:[%s9336_s1 + $0x288] sm:$0xff] }
  0x83   : > { %1119 = vmatmul.mubr.f32.gmra.mrb[26].mxu0 %v6897_v57 }
  0x84   : > { %1123 = vmatprep.mubr.f32.mxu0 %v6615_v35  ;;  %5400 = vmatpush1.bf16.msra.mxu0 %v5399_v32  ;;  %v5405_v35 = vpack.c.bf16 %v579_v63, %v578_v18  ;;  %v7071_v32 = vld [vmem:[#allocation2 + $0x52] sm:$0xff] }
  0x85   : > { %5401 = vmatprep.subr.bf16.mxu0 %v9360_v3  ;;  %v598_v18 = vld [vmem:[%s9336_s1 + $0x290] sm:$0xff]  ;;  %v599_v63 = vld [vmem:[%s9336_s1 + $0x298] sm:$0xff] }
  0x87   : > { %1124 = vmatmul.mubr.f32.gmra.mrb[28].mxu0 %v6908_v59 }
  0x88   : > { %1128 = vmatprep.mubr.f32.mxu0 %v6620_v36  ;;  %5403 = vmatpush1.bf16.msra.mxu0 %v5402_v34  ;;  %v6929_v36 = vld [vmem:[#allocation2 + $0xc8] sm:$0xff] }
  0x89   : > { %5404 = vmatprep.subr.bf16.mxu0 %v9360_v3  ;;  %v7082_v34 = vld [vmem:[#allocation2 + $0x62] sm:$0xff] }
  0x8b   : > { %1129 = vmatmul.mubr.f32.gmra.mrb[30].mxu0 %v6919_v1 }
  0x8c   : > { %1133 = vmatprep.mubr.f32.mxu0 %v6624_v38  ;;  %5406 = vmatpush1.bf16.msra.mxu0 %v5405_v35  ;;  %v6937_v38 = vld [vmem:[#allocation2 + $0xe0] sm:$0xff]  ;;  %v7093_v35 = vld [vmem:[#allocation2 + $0x6a] sm:$0xff] }
  0x8d   : > { %5407 = vmatprep.subr.bf16.mxu0 %v9360_v3 }
  0x8f   : > { %1134 = vmatmul.mubr.f32.gmra.mrb[32].mxu0 %v6924_v2 }
  0x90   : > { %1138 = vmatprep.mubr.f32.mxu0 %v6635_v41  ;;  %v6945_v41 = vld [vmem:[#allocation2 + $0xf8] sm:$0xff] }
  0x93   : > { %1139 = vmatmul.mubr.f32.gmra.mrb[34].mxu0 %v6929_v36 }
  0x94   : > { %1143 = vmatprep.mubr.f32.mxu0 %v6639_v42  ;;  %v6949_v42 = vld [vmem:[#allocation2 + $0x108] sm:$0xff] }
  0x97   : > { %1144 = vmatmul.mubr.f32.gmra.mrb[36].mxu0 %v6933_v4 }
  0x98   : > { %1148 = vmatprep.mubr.f32.mxu0 %v6643_v44  ;;  %v6953_v44 = vld [vmem:[#allocation2 + $0x110] sm:$0xff] }
  0x9b   : > { %1149 = vmatmul.mubr.f32.gmra.mrb[38].mxu0 %v6937_v38 }
  0x9c   : > { %1153 = vmatprep.mubr.f32.mxu0 %v6654_v47  ;;  %v6957_v47 = vld [vmem:[#allocation2 + $0x120] sm:$0xff] }
  0x9f   : > { %1154 = vmatmul.mubr.f32.gmra.mrb[40].mxu0 %v6941_v7 }
  0xa0   : > { %1158 = vmatprep.mubr.f32.mxu0 %v6658_v48  ;;  %v6961_v48 = vld [vmem:[#allocation2 + $0x128] sm:$0xff] }
  0xa3   : > { %1159 = vmatmul.mubr.f32.gmra.mrb[42].mxu0 %v6945_v41 }
  0xa4   : > { %1163 = vmatprep.mubr.f32.mxu0 %v6662_v49  ;;  %v6965_v49 = vld [vmem:[#allocation2 + $0x138] sm:$0xff] }
  0xa7   : > { %1164 = vmatmul.mubr.f32.gmra.mrb[44].mxu0 %v6949_v42 }
  0xa8   : > { %1168 = vmatprep.mubr.f32.mxu0 %v6669_v52  ;;  %v6969_v52 = vld [vmem:[#allocation2 + $0x140] sm:$0xff] }
  0xab   : > { %1169 = vmatmul.mubr.f32.gmra.mrb[46].mxu0 %v6953_v44 }
  0xac   : > { %1173 = vmatprep.mubr.f32.mxu0 %v6677_v54  ;;  %v6973_v54 = vld [vmem:[#allocation2 + $0x150] sm:$0xff] }
  0xaf   : > { %1174 = vmatmul.mubr.f32.gmra.mrb[48].mxu0 %v6957_v47 }
  0xb0   : > { %1178 = vmatprep.mubr.f32.mxu0 %v6680_v55  ;;  %v6976_v55 = vld [vmem:[%s6544_s15 + $0xf0] sm:$0xff]  ;;  %s9262_s15 = scalar_lea.vmem %s9348_s13, %s4693_s23 }
  0xb1   : > { %691 = vst [vmem:[#allocation2 + $0x181] sm:$0xff] %v6976_v55 }
  0xb3   : > { %1179 = vmatmul.mubr.f32.gmra.mrb[50].mxu0 %v6961_v48 }
  0xb4   : > { %1183 = vmatprep.mubr.f32.mxu0 %v6685_v56  ;;  %v6981_v56 = vld [vmem:[#allocation2 + $0x158] sm:$0xff] }
  0xb7   : > { %1184 = vmatmul.mubr.f32.gmra.mrb[52].mxu0 %v6965_v49 }
  0xb8   : > { %1188 = vmatprep.mubr.f32.mxu0 %v6696_v60  ;;  %v6989_v60 = vld [vmem:[#allocation2 + $0x168] sm:$0xff] }
  0xbb   : > { %1189 = vmatmul.mubr.f32.gmra.mrb[54].mxu0 %v6969_v52 }
  0xbc   : > { %1193 = vmatprep.mubr.f32.mxu0 %v6707_v0  ;;  %v6993_v0 = vld [vmem:[#allocation2 + $0x170] sm:$0xff] }
  0xbf   : > { %1194 = vmatmul.mubr.f32.gmra.mrb[56].mxu0 %v6973_v54 }
  0xc0   : > { %1198 = vmatprep.mubr.f32.mxu0 %v6718_v5  ;;  %v580_v5 = vld [vmem:[%s9336_s1 + $0x200] sm:$0xff] }
  0xc1   : > { %v5408_v11 = vpack.c.bf16 %v581_v9, %v580_v5  ;;  %v600_v5 = vld [vmem:[%s9336_s1 + $0x2a0] sm:$0xff]  ;;  %v601_v9 = vld [vmem:[%s9336_s1 + $0x2a8] sm:$0xff] }
  0xc3   : > { %1199 = vmatmul.mubr.f32.gmra.mrb[58].mxu0 %v6981_v56 }
  0xc4   : > { %1203 = vmatprep.mubr.f32.mxu0 %v6729_v10  ;;  %v757_v10 = vld [vmem:[#allocation2 + $0x2] sm:$0xff] }
  0xc7   : > { %1204 = vmatmul.mubr.f32.gmra.mrb[60].mxu0 %v6989_v60 }
  0xc8   : > { %1208 = vmatprep.mubr.f32.mxu0 %v6740_v14  ;;  %v582_v14 = vld [vmem:[%s9336_s1 + $0x210] sm:$0xff] }
  0xc9   : > { %v5411_v15 = vpack.c.bf16 %v583_v23, %v582_v14  ;;  %v603_v14 = vld [vmem:[%s9336_s1 + $0x2b8] sm:$0xff]  ;;  %v7115_v23 = vld [vmem:[#allocation2 + $0x82] sm:$0xff] }
  0xcb   : > { %1209 = vmatmul.mubr.f32.gmra.mrb[62].mxu0 %v6993_v0 }
  0xcc   : > { %1278 = vmatprep.mubr.f32.mxu0 %v6773_v50  ;;  %v584_v50 = vld [vmem:[%s9336_s1 + $0x220] sm:$0xff] }
  0xcd   : > { %v5414_v22 = vpack.c.bf16 %v585_v25, %v584_v50  ;;  %v7126_v50 = vld [vmem:[#allocation2 + $0x92] sm:$0xff] }
  0xce   : > { %v606_v25 = vld [vmem:[%s9336_s1 + $0x2d0] sm:$0xff] }
  0xcf   : > { %1279 = vmatmul.mubr.f32.vlgmr.msra.gmra.mrb[0].mxu0 %v757_v10  ;;  %v7104_v10 = vld [vmem:[#allocation2 + $0x7a] sm:$0xff] }
  0xd0   : > { %5409 = vmatpush1.bf16.msra.mxu0 %v5408_v11  ;;  %1283 = vmatprep.mubr.f32.mxu0 %v6784_v6  ;;  %v586_v6 = vld [vmem:[%s9336_s1 + $0x230] sm:$0xff] }
  0xd1   : > { %5410 = vmatprep.subr.bf16.mxu0 %v9360_v3  ;;  %v602_v11 = vld [vmem:[%s9336_s1 + $0x2b0] sm:$0xff] }
  0xd3   : > { %1284 = vmatmul.mubr.f32.gmra.mrb[2].mxu0 %v758_v13  ;;  %v604_v13 = vld [vmem:[%s9336_s1 + $0x2c0] sm:$0xff] }
  0xd4   : > { %1288 = vmatprep.mubr.f32.mxu0 %v6795_v61  ;;  %5412 = vmatpush1.bf16.msra.mxu0 %v5411_v15  ;;  %v5417_v61 = vpack.c.bf16 %v587_v26, %v586_v6  ;;  %v605_v15 = vld [vmem:[%s9336_s1 + $0x2c8] sm:$0xff]  ;;  %v7137_v6 = vld [vmem:[#allocation2 + $0x9a] sm:$0xff] }
  0xd5   : > { %5413 = vmatprep.subr.bf16.mxu0 %v9360_v3  ;;  %v608_v26 = vld [vmem:[%s9336_s1 + $0x2e0] sm:$0xff] }
  0xd7   : > { %1289 = vmatmul.mubr.f32.gmra.mrb[4].mxu0 %v7018_v21 }
  0xd8   : > { %1293 = vmatprep.mubr.f32.mxu0 %v6809_v19  ;;  %5415 = vmatpush1.bf16.msra.mxu0 %v5414_v22  ;;  %v5420_v19 = vpack.c.bf16 %v589_v27, %v588_v31  ;;  %v607_v22 = vld [vmem:[%s9336_s1 + $0x2d8] sm:$0xff]  ;;  %v7148_v31 = vld [vmem:[#allocation2 + $0xaa] sm:$0xff] }
  0xd9   : > { %5416 = vmatprep.subr.bf16.mxu0 %v9360_v3  ;;  %v610_v27 = vld [vmem:[%s9336_s1 + $0x2f0] sm:$0xff] }
  0xdb   : > { %1294 = vmatmul.mubr.f32.gmra.mrb[6].mxu0 %v7029_v30 }
  0xdc   : > { %1298 = vmatprep.mubr.f32.mxu0 %v6820_v8  ;;  %5418 = vmatpush1.bf16.msra.mxu0 %v5417_v61  ;;  %v5423_v8 = vpack.c.bf16 %v591_v39, %v590_v37  ;;  %v609_v61 = vld [vmem:[%s9336_s1 + $0x2e8] sm:$0xff]  ;;  %v7159_v37 = vld [vmem:[#allocation2 + $0xb2] sm:$0xff] }
  0xdd   : > { %5419 = vmatprep.subr.bf16.mxu0 %v9360_v3  ;;  %v7164_v39 = vld [vmem:[#allocation2 + $0xc2] sm:$0xff] }
  0xdf   : > { %1299 = vmatmul.mubr.f32.gmra.mrb[8].mxu0 %v6797_v62 }
  0xe0   : > { %1303 = vmatprep.mubr.f32.mxu0 %v6831_v12  ;;  %5421 = vmatpush1.bf16.msra.mxu0 %v5420_v19  ;;  %v5426_v12 = vpack.c.bf16 %v593_v45, %v592_v43  ;;  %v611_v19 = vld [vmem:[%s9336_s1 + $0x2f8] sm:$0xff] }
  0xe1   : > { %5422 = vmatprep.subr.bf16.mxu0 %v9360_v3  ;;  %v7181_v43 = vld [vmem:[#allocation2 + $0xf2] sm:$0xff] }
  0xe3   : > { %1304 = vmatmul.mubr.f32.gmra.mrb[10].mxu0 %v7049_v28 }
  0xe4   : > { %1308 = vmatprep.mubr.f32.mxu0 %v6842_v16  ;;  %5424 = vmatpush1.bf16.msra.mxu0 %v5423_v8  ;;  %v5429_v16 = vpack.c.bf16 %v595_v53, %v594_v51  ;;  %v7173_v8 = vld [vmem:[#allocation2 + $0xda] sm:$0xff] }
  0xe5   : > { %5425 = vmatprep.subr.bf16.mxu0 %v9360_v3  ;;  %v7217_v53 = vld [vmem:[#allocation2 + $0x13a] sm:$0xff] }
  0xe7   : > { %1309 = vmatmul.mubr.f32.gmra.mrb[12].mxu0 %v7060_v29 }
  0xe8   : > { %1313 = vmatprep.mubr.f32.mxu0 %v6853_v24  ;;  %5427 = vmatpush1.bf16.msra.mxu0 %v5426_v12  ;;  %v5432_v24 = vpack.c.bf16 %v597_v58, %v596_v17  ;;  %v647_v12 = vld [vmem:[%s9336_s1 + $0x418] sm:$0xff]  ;;  %v7227_v58 = vld [vmem:[#allocation2 + $0x142] sm:$0xff] }
  0xe9   : > { %5428 = vmatprep.subr.bf16.mxu0 %v9360_v3 }
  0xeb   : > { %1314 = vmatmul.mubr.f32.gmra.mrb[14].mxu0 %v7071_v32 }
  0xec   : > { %1318 = vmatprep.mubr.f32.mxu0 %v6864_v33  ;;  %5430 = vmatpush1.bf16.msra.mxu0 %v5429_v16  ;;  %v5435_v33 = vpack.c.bf16 %v599_v63, %v598_v18  ;;  %v649_v16 = vld [vmem:[%s9336_s1 + $0x428] sm:$0xff]  ;;  %v7237_v63 = vld [vmem:[#allocation2 + $0x152] sm:$0xff] }
  0xed   : > { %5431 = vmatprep.subr.bf16.mxu0 %v9360_v3 }
  0xef   : > { %1319 = vmatmul.mubr.f32.gmra.mrb[16].mxu0 %v7082_v34 }
  0xf0   : > { %1323 = vmatprep.mubr.f32.mxu0 %v6875_v40  ;;  %5433 = vmatpush1.bf16.msra.mxu0 %v5432_v24  ;;  %v5438_v40 = vpack.c.bf16 %v601_v9, %v600_v5  ;;  %v651_v24 = vld [vmem:[%s9336_s1 + $0x438] sm:$0xff] }
  0xf1   : > { %5434 = vmatprep.subr.bf16.mxu0 %v9360_v3  ;;  %v7247_v9 = vld [vmem:[#allocation2 + $0x15a] sm:$0xff] }
  0xf3   : > { %1324 = vmatmul.mubr.f32.gmra.mrb[18].mxu0 %v7093_v35 }
  0xf4   : > { %1328 = vmatprep.mubr.f32.mxu0 %v6886_v46  ;;  %5436 = vmatpush1.bf16.msra.mxu0 %v5435_v33  ;;  %v5441_v46 = vpack.c.bf16 %v603_v14, %v602_v11  ;;  %v653_v33 = vld [vmem:[%s9336_s1 + $0x448] sm:$0xff]  ;;  %v7255_v11 = vld [vmem:[#allocation2 + $0x180] sm:$0xff] }
  0xf5   : > { %5437 = vmatprep.subr.bf16.mxu0 %v9360_v3 }
  0xf7   : > { %1329 = vmatmul.mubr.f32.gmra.mrb[20].mxu0 %v7104_v10 }
  0xf8   : > { %1333 = vmatprep.mubr.f32.mxu0 %v6897_v57  ;;  %5439 = vmatpush1.bf16.msra.mxu0 %v5438_v40  ;;  %v5444_v57 = vpack.c.bf16 %v605_v15, %v604_v13  ;;  %v655_v40 = vld [vmem:[%s9336_s1 + $0x458] sm:$0xff]  ;;  %v657_v13 = vld [vmem:[%s9336_s1 + $0x468] sm:$0xff] }
  0xf9   : > { %5440 = vmatprep.subr.bf16.mxu0 %v9360_v3  ;;  %v7267_v15 = vld [vmem:[#allocation2 + $0x188] sm:$0xff] }
  0xfb   : > { %1334 = vmatmul.mubr.f32.gmra.mrb[22].mxu0 %v7115_v23 }
  0xfc   : > { %1338 = vmatprep.mubr.f32.mxu0 %v6908_v59  ;;  %5442 = vmatpush1.bf16.msra.mxu0 %v5441_v46  ;;  %v5447_v59 = vpack.c.bf16 %v607_v22, %v606_v25  ;;  %v656_v46 = vld [vmem:[%s9336_s1 + $0x460] sm:$0xff]  ;;  %v7271_v25 = vld [vmem:[#allocation2 + $0x172] sm:$0xff] }
  0xfd   : > { %5443 = vmatprep.subr.bf16.mxu0 %v9360_v3  ;;  %v658_v22 = vld [vmem:[%s9336_s1 + $0x470] sm:$0xff] }
  0xff   : > { %1339 = vmatmul.mubr.f32.gmra.mrb[24].mxu0 %v7126_v50 }
 0x100   : > { %1343 = vmatprep.mubr.f32.mxu0 %v6919_v1  ;;  %5445 = vmatpush1.bf16.msra.mxu0 %v5444_v57  ;;  %v5450_v1 = vpack.c.bf16 %v609_v61, %v608_v26  ;;  %v5527_v57 = vpack.c.bf16 %v657_v13, %v656_v46  ;;  %v612_v26 = vld [vmem:[%s9336_s1 + $0x300] sm:$0xff]  ;;  %v613_v61 = vld [vmem:[%s9336_s1 + $0x308] sm:$0xff] }
 0x101   : > { %5446 = vmatprep.subr.bf16.mxu0 %v9360_v3  ;;  %v7372_v46 = vld [vmem:[#allocation2 + $0x61] sm:$0xff] }
 0x102   : > { %9422 = vst [vmem:[#allocation9_spill] sm:$0xff] %v7372_v46  ;;  %v628_v13 = vld [vmem:[%s9336_s1 + $0x380] sm:$0xff] }
 0x103   : > { %1344 = vmatmul.mubr.f32.gmra.mrb[26].mxu0 %v7137_v6 }
 0x104   : > { %1348 = vmatprep.mubr.f32.mxu0 %v6924_v2  ;;  %5448 = vmatpush1.bf16.msra.mxu0 %v5447_v59  ;;  %v5453_v2 = vpack.c.bf16 %v611_v19, %v610_v27  ;;  %v659_v59 = vld [vmem:[%s9336_s1 + $0x478] sm:$0xff]  ;;  %v5456_v27 = vpack.c.bf16 %v613_v61, %v612_v26  ;;  %v614_v19 = vld [vmem:[%s9336_s1 + $0x310] sm:$0xff] }
 0x105   : > { %5449 = vmatprep.subr.bf16.mxu0 %v9360_v3  ;;  %v631_v26 = vld [vmem:[%s9336_s1 + $0x398] sm:$0xff] }
 0x106   : > { %v7398_v61 = vld [vmem:[#allocation2 + $0x79] sm:$0xff] }
 0x107   : > { %1349 = vmatmul.mubr.f32.gmra.mrb[28].mxu0 %v7148_v31  ;;  %9424 = vst [vmem:[#allocation11_spill] sm:$0xff] %v7398_v61 }
 0x108   : > { %1353 = vmatprep.mubr.f32.mxu0 %v6929_v36  ;;  %5451 = vmatpush1.bf16.msra.mxu0 %v5450_v1  ;;  %v7169_v36 = vld [vmem:[#allocation2 + $0xca] sm:$0xff]  ;;  %v5531_v1 = vpack.c.bf16 %v659_v59, %v658_v22 }
 0x109   : > { %5452 = vmatprep.subr.bf16.mxu0 %v9360_v3  ;;  %v7385_v22 = vld [vmem:[#allocation2 + $0x69] sm:$0xff] }
 0x10a   : > { %9423 = vst [vmem:[#allocation10_spill] sm:$0xff] %v7385_v22  ;;  %v630_v59 = vld [vmem:[%s9336_s1 + $0x390] sm:$0xff] }
 0x10b   : > { %1354 = vmatmul.mubr.f32.gmra.mrb[30].mxu0 %v7159_v37 }
 0x10c   : > { %1358 = vmatprep.mubr.f32.mxu0 %v6933_v4  ;;  %5454 = vmatpush1.bf16.msra.mxu0 %v5453_v2  ;;  %v7177_v4 = vld [vmem:[#allocation2 + $0xe2] sm:$0xff]  ;;  %v615_v2 = vld [vmem:[%s9336_s1 + $0x318] sm:$0xff] }
 0x10d   : > { %5455 = vmatprep.subr.bf16.mxu0 %v9360_v3 }
 0x10f   : > { %1359 = vmatmul.mubr.f32.gmra.mrb[32].mxu0 %v7164_v39 }
 0x110   : > { %1363 = vmatprep.mubr.f32.mxu0 %v6937_v38  ;;  %v7185_v38 = vld [vmem:[#allocation2 + $0xfa] sm:$0xff] }
 0x113   : > { %1364 = vmatmul.mubr.f32.gmra.mrb[34].mxu0 %v7169_v36 }
 0x114   : > { %1368 = vmatprep.mubr.f32.mxu0 %v6941_v7  ;;  %v7189_v7 = vld [vmem:[#allocation2 + $0x10a] sm:$0xff] }
 0x117   : > { %1369 = vmatmul.mubr.f32.gmra.mrb[36].mxu0 %v7173_v8 }
 0x118   : > { %1373 = vmatprep.mubr.f32.mxu0 %v6945_v41  ;;  %v7193_v41 = vld [vmem:[#allocation2 + $0x112] sm:$0xff] }
 0x11b   : > { %1374 = vmatmul.mubr.f32.gmra.mrb[38].mxu0 %v7177_v4 }
 0x11c   : > { %1378 = vmatprep.mubr.f32.mxu0 %v6949_v42  ;;  %v7197_v42 = vld [vmem:[#allocation2 + $0x122] sm:$0xff] }
 0x11f   : > { %1379 = vmatmul.mubr.f32.gmra.mrb[40].mxu0 %v7181_v43 }
 0x120   : > { %1383 = vmatprep.mubr.f32.mxu0 %v6953_v44  ;;  %v644_v44 = vld [vmem:[%s9336_s1 + $0x400] sm:$0xff] }
 0x123   : > { %1384 = vmatmul.mubr.f32.gmra.mrb[42].mxu0 %v7185_v38 }
 0x124   : > { %1388 = vmatprep.mubr.f32.mxu0 %v6957_v47  ;;  %v645_v47 = vld [vmem:[%s9336_s1 + $0x408] sm:$0xff] }
 0x125   : > { %v5503_v45 = vpack.c.bf16 %v645_v47, %v644_v44  ;;  %v7294_v44 = vld [vmem:[#allocation2 + $0x19] sm:$0xff] }
 0x126   : > { %9416 = vst [vmem:[#allocation3_spill] sm:$0xff] %v7294_v44  ;;  %v616_v47 = vld [vmem:[%s9336_s1 + $0x320] sm:$0xff] }
 0x127   : > { %1389 = vmatmul.mubr.f32.gmra.mrb[44].mxu0 %v7189_v7  ;;  %5504 = vmatprep.subr.bf16.mxu1 %v5503_v45 }
 0x128   : > { %1393 = vmatprep.mubr.f32.mxu0 %v6961_v48  ;;  %v7207_v48 = vld [vmem:[#allocation2 + $0x12a] sm:$0xff]  ;;  %5506 = vmatpush3.bf16.msra.mxu1 %v5503_v45 }
 0x129   : > { %v617_v45 = vld [vmem:[%s9336_s1 + $0x328] sm:$0xff] }
 0x12b   : > { %1394 = vmatmul.mubr.f32.gmra.mrb[46].mxu0 %v7193_v41 }
 0x12c   : > { %1398 = vmatprep.mubr.f32.mxu0 %v6965_v49  ;;  %v646_v49 = vld [vmem:[%s9336_s1 + $0x410] sm:$0xff] }
 0x12d   : > { %v5507_v51 = vpack.c.bf16 %v647_v12, %v646_v49  ;;  %v7307_v49 = vld [vmem:[#allocation2 + $0x21] sm:$0xff]  ;;  %v618_v12 = vld [vmem:[%s9336_s1 + $0x330] sm:$0xff] }
 0x12e   : > { %9417 = vst [vmem:[#allocation4_spill] sm:$0xff] %v7307_v49 }
 0x12f   : > { %1399 = vmatmul.mubr.f32.gmra.mrb[48].mxu0 %v7197_v42  ;;  %5508 = vmatprep.subr.bf16.mxu1 %v5507_v51 }
 0x130   : > { %1403 = vmatprep.mubr.f32.mxu0 %v6969_v52  ;;  %5510 = vmatpush3.bf16.msra.mxu1 %v5507_v51  ;;  %v648_v52 = vld [vmem:[%s9336_s1 + $0x420] sm:$0xff]  ;;  %v619_v51 = vld [vmem:[%s9336_s1 + $0x338] sm:$0xff] }
 0x131   : > { %v5511_v17 = vpack.c.bf16 %v649_v16, %v648_v52  ;;  %v7320_v52 = vld [vmem:[#allocation2 + $0x31] sm:$0xff]  ;;  %v620_v16 = vld [vmem:[%s9336_s1 + $0x340] sm:$0xff] }
 0x132   : > { %9418 = vst [vmem:[#allocation5_spill] sm:$0xff] %v7320_v52 }
 0x133   : > { %1404 = vmatmul.mubr.f32.gmra.mrb[50].mxu0 %v7207_v48  ;;  %5512 = vmatprep.subr.bf16.mxu1 %v5511_v17 }
 0x134   : > { %1408 = vmatprep.mubr.f32.mxu0 %v6973_v54  ;;  %5514 = vmatpush3.bf16.msra.mxu1 %v5511_v17  ;;  %v650_v54 = vld [vmem:[%s9336_s1 + $0x430] sm:$0xff]  ;;  %v621_v17 = vld [vmem:[%s9336_s1 + $0x348] sm:$0xff] }
 0x135   : > { %v5515_v18 = vpack.c.bf16 %v651_v24, %v650_v54  ;;  %v7333_v54 = vld [vmem:[#allocation2 + $0x39] sm:$0xff]  ;;  %v622_v24 = vld [vmem:[%s9336_s1 + $0x350] sm:$0xff] }
 0x136   : > { %9419 = vst [vmem:[#allocation6_spill] sm:$0xff] %v7333_v54 }
 0x137   : > { %1409 = vmatmul.mubr.f32.gmra.mrb[52].mxu0 %v7217_v53  ;;  %5516 = vmatprep.subr.bf16.mxu1 %v5515_v18 }
 0x138   : > { %1413 = vmatprep.mubr.f32.mxu0 %v6981_v56  ;;  %5518 = vmatpush3.bf16.msra.mxu1 %v5515_v18  ;;  %v652_v56 = vld [vmem:[%s9336_s1 + $0x440] sm:$0xff]  ;;  %v623_v18 = vld [vmem:[%s9336_s1 + $0x358] sm:$0xff] }
 0x139   : > { %v5519_v5 = vpack.c.bf16 %v653_v33, %v652_v56  ;;  %v7346_v56 = vld [vmem:[#allocation2 + $0x49] sm:$0xff]  ;;  %v624_v33 = vld [vmem:[%s9336_s1 + $0x360] sm:$0xff] }
 0x13a   : > { %9420 = vst [vmem:[#allocation7_spill] sm:$0xff] %v7346_v56 }
 0x13b   : > { %1414 = vmatmul.mubr.f32.gmra.mrb[54].mxu0 %v7227_v58  ;;  %5520 = vmatprep.subr.bf16.mxu1 %v5519_v5 }
 0x13c   : > { %1418 = vmatprep.mubr.f32.mxu0 %v6989_v60  ;;  %5522 = vmatpush3.bf16.msra.mxu1 %v5519_v5  ;;  %v654_v60 = vld [vmem:[%s9336_s1 + $0x450] sm:$0xff]  ;;  %v625_v5 = vld [vmem:[%s9336_s1 + $0x368] sm:$0xff] }
 0x13d   : > { %v5523_v14 = vpack.c.bf16 %v655_v40, %v654_v60  ;;  %v7359_v60 = vld [vmem:[#allocation2 + $0x51] sm:$0xff] }
 0x13e   : > { %9421 = vst [vmem:[#allocation8_spill] sm:$0xff] %v7359_v60  ;;  %v626_v40 = vld [vmem:[%s9336_s1 + $0x370] sm:$0xff] }
 0x13f   : > { %1419 = vmatmul.mubr.f32.gmra.mrb[56].mxu0 %v7237_v63  ;;  %5524 = vmatprep.subr.bf16.mxu1 %v5523_v14 }
 0x140   : > { %1423 = vmatprep.mubr.f32.mxu0 %v6993_v0  ;;  %v7259_v0 = vld [vmem:[#allocation2 + $0x16a] sm:$0xff]  ;;  %5526 = vmatpush3.bf16.msra.mxu1 %v5523_v14  ;;  %v627_v14 = vld [vmem:[%s9336_s1 + $0x378] sm:$0xff] }
 0x141   : > { %5528 = vmatprep.subr.bf16.mxu1 %v5527_v57 }
 0x143   : > { %1424 = vmatmul.mubr.f32.gmra.mrb[58].mxu0 %v7247_v9 }
 0x144   : > { %1428 = vmatprep.mubr.f32.mxu0 %v7255_v11  ;;  %5530 = vmatpush3.bf16.msra.mxu1 %v5527_v57  ;;  %v629_v57 = vld [vmem:[%s9336_s1 + $0x388] sm:$0xff] }
 0x145   : > { %5532 = vmatprep.subr.bf16.mxu1 %v5531_v1 }
 0x147   : > { %1429 = vmatmul.mubr.f32.gmra.mrb[60].mxu0 %v7259_v0 }
 0x148   : > { %1433 = vmatprep.mubr.f32.mxu0 %v7267_v15  ;;  %5534 = vmatpush3.bf16.msra.mxu1 %v5531_v1  ;;  %v632_v1 = vld [vmem:[%s9336_s1 + $0x3a0] sm:$0xff] }
 0x149   : > { %5535 = vmatprep.subr.bf16.mxu1 %v9360_v3 }
 0x14b   : > { %1434 = vmatmul.mubr.f32.gmra.mrb[62].mxu0 %v7271_v25  ;;  %4954 = vmatmul.mubr.f32.vlgmr.msra.gmra.mrb[0].mxu1 %v7049_v28 }
 0x14c   : > { %1503 = vmatprep.mubr.f32.mxu0 %v7018_v21  ;;  %v5459_v21 = vpack.c.bf16 %v615_v2, %v614_v19  ;;  %4956 = vmatprep.mubr.f32.mxu1 %v7060_v29  ;;  %v7411_v19 = vld [vmem:[#allocation2 + $0x81] sm:$0xff]  ;;  %v634_v2 = vld [vmem:[%s9336_s1 + $0x3b0] sm:$0xff] }
 0x14d   : > { %9425 = vst [vmem:[#allocation12_spill] sm:$0xff] %v7411_v19 }
 0x14f   : > { %1504 = vmatmul.mubr.f32.vlgmr.msra.gmra.mrb[0].mxu0 %v7294_v44  ;;  %4957 = vmatmul.mubr.f32.gmra.mrb[2].mxu1 %v7071_v32 }
 0x150   : > { %5457 = vmatpush1.bf16.msra.mxu0 %v5456_v27  ;;  %1508 = vmatprep.mubr.f32.mxu0 %v7029_v30  ;;  %v5462_v30 = vpack.c.bf16 %v617_v45, %v616_v47  ;;  %v633_v27 = vld [vmem:[%s9336_s1 + $0x3a8] sm:$0xff]  ;;  %v7424_v47 = vld [vmem:[#allocation2 + $0x91] sm:$0xff]  ;;  %v636_v45 = vld [vmem:[%s9336_s1 + $0x3c0] sm:$0xff] }
 0x151   : > { %5458 = vmatprep.subr.bf16.mxu0 %v9360_v3  ;;  %4959 = vmatprep.mubr.f32.mxu1 %v7082_v34  ;;  %9426 = vst [vmem:[#allocation13_spill] sm:$0xff] %v7424_v47 }
 0x153   : > { %1509 = vmatmul.mubr.f32.gmra.mrb[2].mxu0 %v7307_v49  ;;  %4960 = vmatmul.mubr.f32.gmra.mrb[4].mxu1 %v7093_v35 }
 0x154   : > { %1513 = vmatprep.mubr.f32.mxu0 %v6797_v62  ;;  %5460 = vmatpush1.bf16.msra.mxu0 %v5459_v21  ;;  %v5465_v62 = vpack.c.bf16 %v619_v51, %v618_v12  ;;  %v635_v21 = vld [vmem:[%s9336_s1 + $0x3b8] sm:$0xff]  ;;  %v638_v51 = vld [vmem:[%s9336_s1 + $0x3d0] sm:$0xff] }
 0x155   : > { %5461 = vmatprep.subr.bf16.mxu0 %v9360_v3  ;;  %4962 = vmatprep.mubr.f32.mxu1 %v7104_v10  ;;  %v7437_v12 = vld [vmem:[#allocation2 + $0x99] sm:$0xff] }
 0x156   : > { %9427 = vst [vmem:[#allocation14_spill] sm:$0xff] %v7437_v12 }
 0x157   : > { %1514 = vmatmul.mubr.f32.gmra.mrb[4].mxu0 %v7320_v52  ;;  %4963 = vmatmul.mubr.f32.gmra.mrb[6].mxu1 %v7115_v23 }
 0x158   : > { %1518 = vmatprep.mubr.f32.mxu0 %v7049_v28  ;;  %5463 = vmatpush1.bf16.msra.mxu0 %v5462_v30  ;;  %v5468_v28 = vpack.c.bf16 %v621_v17, %v620_v16  ;;  %v637_v30 = vld [vmem:[%s9336_s1 + $0x3c8] sm:$0xff]  ;;  %v640_v17 = vld [vmem:[%s9336_s1 + $0x3e0] sm:$0xff] }
 0x159   : > { %5464 = vmatprep.subr.bf16.mxu0 %v9360_v3  ;;  %4965 = vmatprep.mubr.f32.mxu1 %v7126_v50  ;;  %v7450_v16 = vld [vmem:[#allocation2 + $0xa9] sm:$0xff] }
 0x15a   : > { %9428 = vst [vmem:[#allocation15_spill] sm:$0xff] %v7450_v16 }
 0x15b   : > { %1519 = vmatmul.mubr.f32.gmra.mrb[6].mxu0 %v7333_v54  ;;  %4966 = vmatmul.mubr.f32.gmra.mrb[8].mxu1 %v7137_v6 }
 0x15c   : > { %1523 = vmatprep.mubr.f32.mxu0 %v7060_v29  ;;  %5466 = vmatpush1.bf16.msra.mxu0 %v5465_v62  ;;  %v5471_v29 = vpack.c.bf16 %v623_v18, %v622_v24  ;;  %v639_v62 = vld [vmem:[%s9336_s1 + $0x3d8] sm:$0xff]  ;;  %v883_v18 = vld [vmem:[#allocation2 + $0x182] sm:$0xff] }
 0x15d   : > { %5467 = vmatprep.subr.bf16.mxu0 %v9360_v3  ;;  %4968 = vmatprep.mubr.f32.mxu1 %v7148_v31  ;;  %v7463_v24 = vld [vmem:[#allocation2 + $0xb1] sm:$0xff] }
 0x15e   : > { %9429 = vst [vmem:[#allocation16_spill] sm:$0xff] %v7463_v24 }
 0x15f   : > { %1524 = vmatmul.mubr.f32.gmra.mrb[8].mxu0 %v7346_v56  ;;  %4969 = vmatmul.mubr.f32.gmra.mrb[10].mxu1 %v7159_v37 }
 0x160   : > { %1528 = vmatprep.mubr.f32.mxu0 %v7071_v32  ;;  %5469 = vmatpush1.bf16.msra.mxu0 %v5468_v28  ;;  %v5474_v32 = vpack.c.bf16 %v625_v5, %v624_v33  ;;  %v641_v28 = vld [vmem:[%s9336_s1 + $0x3e8] sm:$0xff]  ;;  %v643_v33 = vld [vmem:[%s9336_s1 + $0x3f8] sm:$0xff] }
 0x161   : > { %5470 = vmatprep.subr.bf16.mxu0 %v9360_v3  ;;  %4971 = vmatprep.mubr.f32.mxu1 %v7164_v39  ;;  %v884_v5 = vld [vmem:[#allocation2 + $0x18a] sm:$0xff] }
 0x163   : > { %1529 = vmatmul.mubr.f32.gmra.mrb[10].mxu0 %v7359_v60  ;;  %4972 = vmatmul.mubr.f32.gmra.mrb[12].mxu1 %v7169_v36 }
 0x164   : > { %1533 = vmatprep.mubr.f32.mxu0 %v7082_v34  ;;  %5472 = vmatpush1.bf16.msra.mxu0 %v5471_v29  ;;  %v5477_v34 = vpack.c.bf16 %v627_v14, %v626_v40  ;;  %v642_v29 = vld [vmem:[%s9336_s1 + $0x3f0] sm:$0xff]  ;;  %v7484_v14 = vld [vmem:[#allocation2 + $0xd9] sm:$0xff] }
 0x165   : > { %5473 = vmatprep.subr.bf16.mxu0 %v9360_v3  ;;  %4974 = vmatprep.mubr.f32.mxu1 %v7173_v8  ;;  %v7480_v40 = vld [vmem:[#allocation2 + $0xc9] sm:$0xff]  ;;  %9432 = vst [vmem:[#allocation19_spill] sm:$0xff] %v7484_v14 }
 0x166   : > { %9431 = vst [vmem:[#allocation18_spill] sm:$0xff] %v7480_v40 }
 0x167   : > { %1534 = vmatmul.mubr.f32.gmra.mrb[12].mxu0 %v7372_v46  ;;  %4975 = vmatmul.mubr.f32.gmra.mrb[14].mxu1 %v7177_v4 }
 0x168   : > { %1538 = vmatprep.mubr.f32.mxu0 %v7093_v35  ;;  %5475 = vmatpush1.bf16.msra.mxu0 %v5474_v32  ;;  %v5480_v35 = vpack.c.bf16 %v629_v57, %v628_v13  ;;  %v7475_v32 = vld [vmem:[#allocation2 + $0xc1] sm:$0xff]  ;;  %v7500_v13 = vld [vmem:[#allocation2 + $0x109] sm:$0xff]  ;;  %v918_v57 = vld [vmem:[#allocation2 + $0x31] sm:$0xff] }
 0x169   : > { %5476 = vmatprep.subr.bf16.mxu0 %v9360_v3  ;;  %4977 = vmatprep.mubr.f32.mxu1 %v7181_v43  ;;  %9430 = vst [vmem:[#allocation17_spill] sm:$0xff] %v7475_v32  ;;  %9436 = vst [vmem:[#allocation23_spill] sm:$0xff] %v7500_v13 }
 0x16b   : > { %1539 = vmatmul.mubr.f32.gmra.mrb[14].mxu0 %v7385_v22  ;;  %4978 = vmatmul.mubr.f32.gmra.mrb[16].mxu1 %v7185_v38 }
 0x16c   : > { %1543 = vmatprep.mubr.f32.mxu0 %v7104_v10  ;;  %5478 = vmatpush1.bf16.msra.mxu0 %v5477_v34  ;;  %v5483_v10 = vpack.c.bf16 %v631_v26, %v630_v59  ;;  %v7488_v34 = vld [vmem:[#allocation2 + $0xe1] sm:$0xff]  ;;  %v2149_v26 = vld [vmem:[%s9338_s3 + $0x18] sm:$0xff] }
 0x16d   : > { %5479 = vmatprep.subr.bf16.mxu0 %v9360_v3  ;;  %4980 = vmatprep.mubr.f32.mxu1 %v7189_v7  ;;  %9433 = vst [vmem:[#allocation20_spill] sm:$0xff] %v7488_v34 }
 0x16f   : > { %1544 = vmatmul.mubr.f32.gmra.mrb[16].mxu0 %v7398_v61  ;;  %4981 = vmatmul.mubr.f32.gmra.mrb[18].mxu1 %v7193_v41 }
 0x170   : > { %1548 = vmatprep.mubr.f32.mxu0 %v7115_v23  ;;  %5481 = vmatpush1.bf16.msra.mxu0 %v5480_v35  ;;  %v5486_v23 = vpack.c.bf16 %v633_v27, %v632_v1  ;;  %v2148_v35 = vld [vmem:[%s9338_s3 + $0x10] sm:$0xff]  ;;  %v2150_v1 = vld [vmem:[%s9338_s3 + $0x20] sm:$0xff]  ;;  %v2151_v27 = vld [vmem:[%s9338_s3 + $0x28] sm:$0xff] }
 0x171   : > { %5482 = vmatprep.subr.bf16.mxu0 %v9360_v3  ;;  %4983 = vmatprep.mubr.f32.mxu1 %v7197_v42 }
 0x173   : > { %1549 = vmatmul.mubr.f32.gmra.mrb[18].mxu0 %v7411_v19  ;;  %4984 = vmatmul.mubr.f32.gmra.mrb[20].mxu1 %v7207_v48 }
 0x174   : > { %1553 = vmatprep.mubr.f32.mxu0 %v7126_v50  ;;  %5484 = vmatpush1.bf16.msra.mxu0 %v5483_v10  ;;  %v5489_v50 = vpack.c.bf16 %v635_v21, %v634_v2  ;;  %v5539_v10 = vpack.c.bf16 %v2149_v26, %v2148_v35  ;;  %v920_v2 = vld [vmem:[#allocation2 + $0x49] sm:$0xff]  ;;  %v5542_v21 = vpack.c.bf16 %v2151_v27, %v2150_v1  ;;  %v925_v1 = vld [vmem:[#allocation2 + $0x81] sm:$0xff] }
 0x175   : > { %5485 = vmatprep.subr.bf16.mxu0 %v9360_v3  ;;  %4986 = vmatprep.mubr.f32.mxu1 %v7217_v53  ;;  %v891_v35 = vld [vmem:[#allocation2 + $0x68] sm:$0xff]  ;;  %v2160_v26 = vld [vmem:[%s9338_s3 + $0x70] sm:$0xff] }
 0x177   : > { %1554 = vmatmul.mubr.f32.gmra.mrb[20].mxu0 %v7424_v47  ;;  %4987 = vmatmul.mubr.f32.gmra.mrb[22].mxu1 %v7227_v58 }
 0x178   : > { %1558 = vmatprep.mubr.f32.mxu0 %v7137_v6  ;;  %5487 = vmatpush1.bf16.msra.mxu0 %v5486_v23  ;;  %v5492_v6 = vpack.c.bf16 %v637_v30, %v636_v45  ;;  %v887_v23 = vld [vmem:[#allocation2 + $0x38] sm:$0xff]  ;;  %v2274_v30 = vld [vmem:[%s9338_s3 + $0x400] sm:$0xff] }
 0x179   : > { %5488 = vmatprep.subr.bf16.mxu0 %v9360_v3  ;;  %4989 = vmatprep.mubr.f32.mxu1 %v7237_v63  ;;  %v2153_v45 = vld [vmem:[%s9338_s3 + $0x38] sm:$0xff] }
 0x17b   : > { %1559 = vmatmul.mubr.f32.gmra.mrb[22].mxu0 %v7437_v12  ;;  %4990 = vmatmul.mubr.f32.gmra.mrb[24].mxu1 %v7247_v9 }
 0x17c   : > { %1563 = vmatprep.mubr.f32.mxu0 %v7148_v31  ;;  %5490 = vmatpush1.bf16.msra.mxu0 %v5489_v50  ;;  %v5495_v31 = vpack.c.bf16 %v639_v62, %v638_v51  ;;  %v2152_v50 = vld [vmem:[%s9338_s3 + $0x30] sm:$0xff]  ;;  %v2275_v51 = vld [vmem:[%s9338_s3 + $0x408] sm:$0xff] }
 0x17d   : > { %5491 = vmatprep.subr.bf16.mxu0 %v9360_v3  ;;  %4992 = vmatprep.mubr.f32.mxu1 %v7259_v0  ;;  %v921_v62 = vld [vmem:[#allocation2 + $0x51] sm:$0xff] }
 0x17f   : > { %1564 = vmatmul.mubr.f32.gmra.mrb[24].mxu0 %v7450_v16  ;;  %4993 = vmatmul.mubr.f32.gmra.mrb[26].mxu1 %v7271_v25 }
 0x180   : > { %1568 = vmatprep.mubr.f32.mxu0 %v7159_v37  ;;  %5493 = vmatpush1.bf16.msra.mxu0 %v5492_v6  ;;  %v5498_v37 = vpack.c.bf16 %v641_v28, %v640_v17  ;;  %v888_v6 = vld [vmem:[#allocation2 + $0x48] sm:$0xff]  ;;  %v5545_v17 = vpack.c.bf16 %v2153_v45, %v2152_v50  ;;  %v2154_v28 = vld [vmem:[%s9338_s3 + $0x40] sm:$0xff]  ;;  %v926_v50 = vld [vmem:[#allocation2 + $0x91] sm:$0xff] }
 0x181   : > { %5494 = vmatprep.subr.bf16.mxu0 %v9360_v3  ;;  %4995 = vmatprep.mubr.f32.mxu1 %v883_v18 }
 0x183   : > { %1569 = vmatmul.mubr.f32.gmra.mrb[26].mxu0 %v7463_v24  ;;  %4996 = vmatmul.mubr.f32.gmra.mrb[28].mxu1 %v884_v5 }
 0x184   : > { %1573 = vmatprep.mubr.f32.mxu0 %v7164_v39  ;;  %5496 = vmatpush1.bf16.msra.mxu0 %v5495_v31  ;;  %v5501_v39 = vpack.c.bf16 %v643_v33, %v642_v29  ;;  %v5727_v31 = vpack.c.bf16 %v2275_v51, %v2274_v30  ;;  %v922_v29 = vld [vmem:[#allocation2 + $0x61] sm:$0xff]  ;;  %v2164_v30 = vld [vmem:[%s9338_s3 + $0x90] sm:$0xff] }
 0x185   : > { %5497 = vmatprep.subr.bf16.mxu0 %v9360_v3  ;;  %v894_v51 = vld [vmem:[#allocation2 + $0x90] sm:$0xff] }
 0x187   : > { %1574 = vmatmul.mubr.f32.gmra.mrb[28].mxu0 %v7475_v32 }
 0x188   : > { %1578 = vmatprep.mubr.f32.mxu0 %v7169_v36  ;;  %5499 = vmatpush1.bf16.msra.mxu0 %v5498_v37  ;;  %v7492_v36 = vld [vmem:[#allocation2 + $0xf1] sm:$0xff]  ;;  %v2155_v37 = vld [vmem:[%s9338_s3 + $0x48] sm:$0xff] }
 0x189   : > { %5500 = vmatprep.subr.bf16.mxu0 %v9360_v3  ;;  %9434 = vst [vmem:[#allocation21_spill] sm:$0xff] %v7492_v36  ;;  %v5548_v33 = vpack.c.bf16 %v2155_v37, %v2154_v28  ;;  %v2167_v28 = vld [vmem:[%s9338_s3 + $0xa8] sm:$0xff]  ;;  %v895_v37 = vld [vmem:[#allocation2 + $0x98] sm:$0xff] }
 0x18b   : > { %1579 = vmatmul.mubr.f32.gmra.mrb[30].mxu0 %v7480_v40 }
 0x18c   : > { %1583 = vmatprep.mubr.f32.mxu0 %v7173_v8  ;;  %5502 = vmatpush1.bf16.msra.mxu0 %v5501_v39  ;;  %v7496_v8 = vld [vmem:[#allocation2 + $0xf9] sm:$0xff] }
 0x18d   : > { %9435 = vst [vmem:[#allocation22_spill] sm:$0xff] %v7496_v8  ;;  %5728 = vmatprep.subr.bf16.mxu0 %v5727_v31  ;;  %v2157_v39 = vld [vmem:[%s9338_s3 + $0x58] sm:$0xff] }
 0x18f   : > { %1584 = vmatmul.mubr.f32.gmra.mrb[32].mxu0 %v7484_v14 }
 0x190   : > { %1588 = vmatprep.mubr.f32.mxu0 %v7177_v4  ;;  %v7504_v4 = vld [vmem:[#allocation2 + $0x111] sm:$0xff] }
 0x191   : > { %9437 = vst [vmem:[#allocation24_spill] sm:$0xff] %v7504_v4 }
 0x193   : > { %1589 = vmatmul.mubr.f32.gmra.mrb[34].mxu0 %v7488_v34 }
 0x194   : > { %1593 = vmatprep.mubr.f32.mxu0 %v7181_v43  ;;  %v7508_v43 = vld [vmem:[#allocation2 + $0x121] sm:$0xff] }
 0x195   : > { %9438 = vst [vmem:[#allocation25_spill] sm:$0xff] %v7508_v43 }
 0x197   : > { %1594 = vmatmul.mubr.f32.gmra.mrb[36].mxu0 %v7492_v36 }
 0x198   : > { %1598 = vmatprep.mubr.f32.mxu0 %v7185_v38  ;;  %v7512_v38 = vld [vmem:[#allocation2 + $0x129] sm:$0xff] }
 0x199   : > { %9439 = vst [vmem:[#allocation26_spill] sm:$0xff] %v7512_v38 }
 0x19b   : > { %1599 = vmatmul.mubr.f32.gmra.mrb[38].mxu0 %v7496_v8  ;;  %v9448_v8 = vmov 0.0|0.0  }
 0x19c   : > { %1603 = vmatprep.mubr.f32.mxu0 %v7189_v7  ;;  %v7516_v7 = vld [vmem:[#allocation2 + $0x139] sm:$0xff] }
 0x19d   : > { %9440 = vst [vmem:[#allocation27_spill] sm:$0xff] %v7516_v7 }
 0x19f   : > { %1604 = vmatmul.mubr.f32.gmra.mrb[40].mxu0 %v7500_v13 }
 0x1a0   : > { %1608 = vmatprep.mubr.f32.mxu0 %v7193_v41  ;;  %v7520_v41 = vld [vmem:[#allocation2 + $0x141] sm:$0xff] }
 0x1a1   : > { %9441 = vst [vmem:[#allocation28_spill] sm:$0xff] %v7520_v41 }
 0x1a3   : > { %1609 = vmatmul.mubr.f32.gmra.mrb[42].mxu0 %v7504_v4 }
 0x1a4   : > { %1613 = vmatprep.mubr.f32.mxu0 %v7197_v42  ;;  %v7524_v42 = vld [vmem:[#allocation2 + $0x151] sm:$0xff] }
 0x1a5   : > { %9442 = vst [vmem:[#allocation29_spill] sm:$0xff] %v7524_v42 }
 0x1a7   : > { %1614 = vmatmul.mubr.f32.gmra.mrb[44].mxu0 %v7508_v43 }
 0x1a8   : > { %1618 = vmatprep.mubr.f32.mxu0 %v7207_v48  ;;  %v7528_v48 = vld [vmem:[#allocation2 + $0x159] sm:$0xff] }
 0x1a9   : > { %9443 = vst [vmem:[#allocation30_spill] sm:$0xff] %v7528_v48 }
 0x1ab   : > { %1619 = vmatmul.mubr.f32.gmra.mrb[46].mxu0 %v7512_v38  ;;  %v2208_v38 = vld [vmem:[%s9338_s3 + $0x1f0] sm:$0xff] }
 0x1ac   : > { %1623 = vmatprep.mubr.f32.mxu0 %v7217_v53  ;;  %v7532_v53 = vld [vmem:[#allocation2 + $0x169] sm:$0xff] }
 0x1ad   : > { %9444 = vst [vmem:[#allocation31_spill] sm:$0xff] %v7532_v53 }
 0x1af   : > { %1624 = vmatmul.mubr.f32.gmra.mrb[48].mxu0 %v7516_v7 }
 0x1b0   : > { %1628 = vmatprep.mubr.f32.mxu0 %v7227_v58  ;;  %v7536_v58 = vld [vmem:[#allocation2 + $0x171] sm:$0xff] }
 0x1b1   : > { %9445 = vst [vmem:[#allocation32_spill] sm:$0xff] %v7536_v58 }
 0x1b3   : > { %1629 = vmatmul.mubr.f32.gmra.mrb[50].mxu0 %v7520_v41 }
 0x1b4   : > { %1633 = vmatprep.mubr.f32.mxu0 %v7237_v63  ;;  %v980_v63 = vld [vmem:[#allocation2 + $0x19a] sm:$0xff] }
 0x1b5   : > { %4998 = vmatprep.mubr.f32.mxu1 %v980_v63  ;;  %v890_v63 = vld [vmem:[#allocation2 + $0x60] sm:$0xff] }
 0x1b7   : > { %1634 = vmatmul.mubr.f32.gmra.mrb[52].mxu0 %v7524_v42  ;;  %v2207_v42 = vld [vmem:[%s9338_s3 + $0x1e8] sm:$0xff] }
 0x1b8   : > { %1638 = vmatprep.mubr.f32.mxu0 %v7247_v9  ;;  %v981_v9 = vld [vmem:[#allocation2 + $0x1a2] sm:$0xff] }
 0x1b9   : > { %4999 = vmatmul.mubr.f32.gmra.mrb[30].mxu1 %v981_v9  ;;  %v923_v9 = vld [vmem:[#allocation2 + $0x69] sm:$0xff] }
 0x1bb   : > { %1639 = vmatmul.mubr.f32.gmra.mrb[54].mxu0 %v7528_v48 }
 0x1bc   : > { %1643 = vmatprep.mubr.f32.mxu0 %v7259_v0  ;;  %v2146_v0 = vld [vmem:[%s9338_s3] sm:$0xff] }
 0x1bf   : > { %1644 = vmatmul.mubr.f32.gmra.mrb[56].mxu0 %v7532_v53  ;;  %v2205_v53 = vld [vmem:[%s9338_s3 + $0x1d8] sm:$0xff] }
 0x1c0   : > { %1648 = vmatprep.mubr.f32.mxu0 %v7271_v25  ;;  %v2147_v25 = vld [vmem:[%s9338_s3 + $0x8] sm:$0xff] }
 0x1c1   : > { %v5536_v59 = vpack.c.bf16 %v2147_v25, %v2146_v0  ;;  %v2158_v0 = vld [vmem:[%s9338_s3 + $0x60] sm:$0xff]  ;;  %v2159_v25 = vld [vmem:[%s9338_s3 + $0x68] sm:$0xff] }
 0x1c3   : > { %1649 = vmatmul.mubr.f32.gmra.mrb[58].mxu0 %v7536_v58  ;;  %5537 = vmatpush1.bf16.msra.mxu1 %v5536_v59  ;;  %v5554_v59 = vpack.c.bf16 %v2159_v25, %v2158_v0  ;;  %v2171_v0 = vld [vmem:[%s9338_s3 + $0xc8] sm:$0xff]  ;;  %v897_v25 = vld [vmem:[#allocation2 + $0xb0] sm:$0xff] }
 0x1c4   : > { %1653 = vmatprep.mubr.f32.mxu0 %v883_v18  ;;  %5538 = vmatprep.subr.bf16.mxu1 %v9360_v3  ;;  %v889_v18 = vld [vmem:[#allocation2 + $0x50] sm:$0xff] }
 0x1c7   : > { %1654 = vmatmul.mubr.f32.gmra.mrb[60].mxu0 %v6976_v55  ;;  %v886_v55 = vld [vmem:[#allocation2 + $0x30] sm:$0xff]  ;;  %5540 = vmatpush1.bf16.msra.mxu1 %v5539_v10  ;;  %v892_v10 = vld [vmem:[#allocation2 + $0x78] sm:$0xff] }
 0x1c8   : > { %1658 = vmatprep.mubr.f32.mxu0 %v884_v5  ;;  %5541 = vmatprep.subr.bf16.mxu1 %v9360_v3  ;;  %v2156_v5 = vld [vmem:[%s9338_s3 + $0x50] sm:$0xff] }
 0x1cb   : > { %1659 = vmatmul.mubr.f32.gmra.mrb[62].mxu0 %v6984_v20  ;;  %v919_v20 = vld [vmem:[#allocation2 + $0x39] sm:$0xff]  ;;  %5543 = vmatpush1.bf16.msra.mxu1 %v5542_v21 }
 0x1cc   : > { %1728 = vmatprep.mubr.f32.mxu0 %v918_v57  ;;  %5544 = vmatprep.subr.bf16.mxu1 %v9360_v3  ;;  %v5551_v57 = vpack.c.bf16 %v2157_v39, %v2156_v5  ;;  %v893_v21 = vld [vmem:[#allocation2 + $0x80] sm:$0xff]  ;;  %v2169_v5 = vld [vmem:[%s9338_s3 + $0xb8] sm:$0xff]  ;;  %v896_v39 = vld [vmem:[#allocation2 + $0xa8] sm:$0xff] }
 0x1cf   : > { %1729 = vmatmul.mubr.f32.vlgmr.msra.gmra.mrb[0].mxu0 %v886_v55  ;;  %5546 = vmatpush1.bf16.msra.mxu1 %v5545_v17  ;;  %v924_v55 = vld [vmem:[#allocation2 + $0x79] sm:$0xff] }
 0x1d0   : > { %1733 = vmatprep.mubr.f32.mxu0 %v919_v20  ;;  %5730 = vmatpush3.bf16.msra.mxu0 %v5727_v31  ;;  %v2161_v20 = vld [vmem:[%s9338_s3 + $0x78] sm:$0xff]  ;;  %v2166_v17 = vld [vmem:[%s9338_s3 + $0xa0] sm:$0xff] }
 0x1d1   : > { %5547 = vmatprep.subr.bf16.mxu1 %v9360_v3  ;;  %v5557_v27 = vpack.c.bf16 %v2161_v20, %v2160_v26  ;;  %v2173_v26 = vld [vmem:[%s9338_s3 + $0xd8] sm:$0xff]  ;;  %v898_v20 = vld [vmem:[#allocation2 + $0xc0] sm:$0xff] }
 0x1d3   : > { %1734 = vmatmul.mubr.f32.gmra.mrb[2].mxu0 %v887_v23  ;;  %5549 = vmatpush1.bf16.msra.mxu1 %v5548_v33  ;;  %v2162_v23 = vld [vmem:[%s9338_s3 + $0x80] sm:$0xff]  ;;  %v2168_v33 = vld [vmem:[%s9338_s3 + $0xb0] sm:$0xff] }
 0x1d4   : > { %1738 = vmatprep.mubr.f32.mxu0 %v920_v2  ;;  %5550 = vmatprep.subr.bf16.mxu1 %v9360_v3  ;;  %v2163_v2 = vld [vmem:[%s9338_s3 + $0x88] sm:$0xff] }
 0x1d5   : > { %v5560_v45 = vpack.c.bf16 %v2163_v2, %v2162_v23  ;;  %v932_v23 = vld [vmem:[#allocation2 + $0xd9] sm:$0xff] }
 0x1d6   : > { %v900_v2 = vld [vmem:[#allocation2 + $0xd8] sm:$0xff] }
 0x1d7   : > { %1739 = vmatmul.mubr.f32.gmra.mrb[4].mxu0 %v888_v6  ;;  %5552 = vmatpush1.bf16.msra.mxu1 %v5551_v57  ;;  %v2165_v6 = vld [vmem:[%s9338_s3 + $0x98] sm:$0xff]  ;;  %v2170_v57 = vld [vmem:[%s9338_s3 + $0xc0] sm:$0xff] }
 0x1d8   : > { %1743 = vmatprep.mubr.f32.mxu0 %v921_v62  ;;  %5553 = vmatprep.subr.bf16.mxu1 %v9360_v3  ;;  %v927_v62 = vld [vmem:[#allocation2 + $0x99] sm:$0xff]  ;;  %v5563_v31 = vpack.c.bf16 %v2165_v6, %v2164_v30  ;;  %v902_v30 = vld [vmem:[#allocation2 + $0xf0] sm:$0xff] }
 0x1d9   : > { %v935_v6 = vld [vmem:[#allocation2 + $0xf9] sm:$0xff] }
 0x1db   : > { %1744 = vmatmul.mubr.f32.gmra.mrb[6].mxu0 %v889_v18  ;;  %5555 = vmatpush1.bf16.msra.mxu1 %v5554_v59  ;;  %v928_v18 = vld [vmem:[#allocation2 + $0xa9] sm:$0xff] }
 0x1dc   : > { %1748 = vmatprep.mubr.f32.mxu0 %v922_v29  ;;  %5556 = vmatprep.subr.bf16.mxu1 %v9360_v3  ;;  %v5566_v29 = vpack.c.bf16 %v2167_v28, %v2166_v17  ;;  %v2172_v59 = vld [vmem:[%s9338_s3 + $0xd0] sm:$0xff] }
 0x1dd   : > { %v937_v17 = vld [vmem:[#allocation2 + $0x111] sm:$0xff] }
 0x1de   : > { %v905_v28 = vld [vmem:[#allocation2 + $0x110] sm:$0xff] }
 0x1df   : > { %1749 = vmatmul.mubr.f32.gmra.mrb[8].mxu0 %v890_v63  ;;  %5558 = vmatpush1.bf16.msra.mxu1 %v5557_v27  ;;  %v929_v63 = vld [vmem:[#allocation2 + $0xb1] sm:$0xff]  ;;  %v899_v27 = vld [vmem:[#allocation2 + $0xc8] sm:$0xff] }
 0x1e0   : > { %1753 = vmatprep.mubr.f32.mxu0 %v923_v9  ;;  %5559 = vmatprep.subr.bf16.mxu1 %v9360_v3  ;;  %v5569_v9 = vpack.c.bf16 %v2169_v5, %v2168_v33  ;;  %v906_v5 = vld [vmem:[#allocation2 + $0x120] sm:$0xff] }
 0x1e3   : > { %1754 = vmatmul.mubr.f32.gmra.mrb[10].mxu0 %v891_v35  ;;  %5561 = vmatpush1.bf16.msra.mxu1 %v5560_v45  ;;  %v930_v35 = vld [vmem:[#allocation2 + $0xc1] sm:$0xff]  ;;  %v934_v45 = vld [vmem:[#allocation2 + $0xf1] sm:$0xff] }
 0x1e4   : > { %1758 = vmatprep.mubr.f32.mxu0 %v924_v55  ;;  %5562 = vmatprep.subr.bf16.mxu1 %v9360_v3  ;;  %v5572_v55 = vpack.c.bf16 %v2171_v0, %v2170_v57  ;;  %v2276_v57 = vld [vmem:[%s9338_s3 + $0x410] sm:$0xff]  ;;  %v2277_v0 = vld [vmem:[%s9338_s3 + $0x418] sm:$0xff] }
 0x1e7   : > { %1759 = vmatmul.mubr.f32.gmra.mrb[12].mxu0 %v892_v10  ;;  %5564 = vmatpush1.bf16.msra.mxu1 %v5563_v31  ;;  %v931_v10 = vld [vmem:[#allocation2 + $0xc9] sm:$0xff] }
 0x1e8   : > { %1763 = vmatprep.mubr.f32.mxu0 %v925_v1  ;;  %5565 = vmatprep.subr.bf16.mxu1 %v9360_v3  ;;  %v5575_v1 = vpack.c.bf16 %v2173_v26, %v2172_v59  ;;  %v904_v31 = vld [vmem:[#allocation2 + $0x108] sm:$0xff]  ;;  %v940_v59 = vld [vmem:[#allocation2 + $0x139] sm:$0xff] }
 0x1eb   : > { %1764 = vmatmul.mubr.f32.gmra.mrb[14].mxu0 %v893_v21  ;;  %5567 = vmatpush1.bf16.msra.mxu1 %v5566_v29  ;;  %v933_v21 = vld [vmem:[#allocation2 + $0xe1] sm:$0xff] }
 0x1ec   : > { %1768 = vmatprep.mubr.f32.mxu0 %v926_v50  ;;  %5568 = vmatprep.subr.bf16.mxu1 %v9360_v3  ;;  %v901_v50 = vld [vmem:[#allocation2 + $0xe0] sm:$0xff]  ;;  %v2175_v29 = vld [vmem:[%s9338_s3 + $0xe8] sm:$0xff] }
 0x1ef   : > { %1769 = vmatmul.mubr.f32.gmra.mrb[16].mxu0 %v894_v51  ;;  %5570 = vmatpush1.bf16.msra.mxu1 %v5569_v9  ;;  %v903_v51 = vld [vmem:[#allocation2 + $0xf8] sm:$0xff] }
 0x1f0   : > { %1773 = vmatprep.mubr.f32.mxu0 %v927_v62  ;;  %5571 = vmatprep.subr.bf16.mxu1 %v9360_v3  ;;  %v936_v62 = vld [vmem:[#allocation2 + $0x109] sm:$0xff]  ;;  %v2177_v9 = vld [vmem:[%s9338_s3 + $0xf8] sm:$0xff] }
 0x1f3   : > { %1774 = vmatmul.mubr.f32.gmra.mrb[18].mxu0 %v895_v37  ;;  %5573 = vmatpush1.bf16.msra.mxu1 %v5572_v55  ;;  %v938_v37 = vld [vmem:[#allocation2 + $0x121] sm:$0xff]  ;;  %v5731_v55 = vpack.c.bf16 %v2277_v0, %v2276_v57  ;;  %v2284_v0 = vld [vmem:[%s9338_s3 + $0x450] sm:$0xff] }
 0x1f4   : > { %1778 = vmatprep.mubr.f32.mxu0 %v928_v18  ;;  %5574 = vmatprep.subr.bf16.mxu1 %v9360_v3  ;;  %v2174_v18 = vld [vmem:[%s9338_s3 + $0xe0] sm:$0xff] }
 0x1f5   : > { %v5578_v33 = vpack.c.bf16 %v2175_v29, %v2174_v18  ;;  %5732 = vmatprep.subr.bf16.mxu0 %v5731_v55  ;;  %v2282_v18 = vld [vmem:[%s9338_s3 + $0x440] sm:$0xff]  ;;  %v2283_v29 = vld [vmem:[%s9338_s3 + $0x448] sm:$0xff] }
 0x1f6   : > { %5734 = vmatpush3.bf16.msra.mxu0 %v5731_v55 }
 0x1f7   : > { %1779 = vmatmul.mubr.f32.gmra.mrb[20].mxu0 %v896_v39  ;;  %5576 = vmatpush1.bf16.msra.mxu1 %v5575_v1  ;;  %v939_v39 = vld [vmem:[#allocation2 + $0x129] sm:$0xff]  ;;  %v2278_v1 = vld [vmem:[%s9338_s3 + $0x420] sm:$0xff] }
 0x1f8   : > { %1783 = vmatprep.mubr.f32.mxu0 %v929_v63  ;;  %5577 = vmatprep.subr.bf16.mxu1 %v9360_v3  ;;  %v2176_v63 = vld [vmem:[%s9338_s3 + $0xf0] sm:$0xff] }
 0x1fb   : > { %1784 = vmatmul.mubr.f32.gmra.mrb[22].mxu0 %v897_v25  ;;  %5579 = vmatpush1.bf16.msra.mxu1 %v5578_v33  ;;  %v5581_v25 = vpack.c.bf16 %v2177_v9, %v2176_v63  ;;  %v910_v33 = vld [vmem:[#allocation2 + $0x150] sm:$0xff]  ;;  %v2178_v63 = vld [vmem:[%s9338_s3 + $0x100] sm:$0xff]  ;;  %v2179_v9 = vld [vmem:[%s9338_s3 + $0x108] sm:$0xff] }
 0x1fc   : > { %1788 = vmatprep.mubr.f32.mxu0 %v930_v35  ;;  %5580 = vmatprep.subr.bf16.mxu1 %v9360_v3  ;;  %v907_v35 = vld [vmem:[#allocation2 + $0x128] sm:$0xff]  ;;  %v5584_v57 = vpack.c.bf16 %v2179_v9, %v2178_v63 }
 0x1fd   : > { %v2183_v63 = vld [vmem:[%s9338_s3 + $0x128] sm:$0xff] }
 0x1ff   : > { %1789 = vmatmul.mubr.f32.gmra.mrb[24].mxu0 %v898_v20  ;;  %5582 = vmatpush1.bf16.msra.mxu1 %v5581_v25  ;;  %v2354_v20 = vld [vmem:[#allocation2 + $0x1] sm:$0xff]  ;;  %v2285_v25 = vld [vmem:[%s9338_s3 + $0x458] sm:$0xff] }
 0x200   : > { %1793 = vmatprep.mubr.f32.mxu0 %v931_v10  ;;  %5583 = vmatprep.subr.bf16.mxu1 %v9360_v3  ;;  %v5747_v55 = vpack.c.bf16 %v2285_v25, %v2284_v0  ;;  %v948_v0 = vld [vmem:[#allocation2 + $0x199] sm:$0xff] }
 0x201   : > { %2681 = vmatprep.mubr.f32.mxu1 %v2354_v20 }
 0x203   : > { %1794 = vmatmul.mubr.f32.gmra.mrb[26].mxu0 %v899_v27  ;;  %v2279_v27 = vld [vmem:[%s9338_s3 + $0x428] sm:$0xff] }
 0x204   : > { %1798 = vmatprep.mubr.f32.mxu0 %v932_v23  ;;  %v2322_v23 = vld [vmem:[#allocation2] sm:$0xff] }
 0x205   : > { %2682 = vmatmul.mubr.f32.vlgmr.msra.gmra.mrb[32].mxu1 %v2322_v23  ;;  %v2287_v23 = vld [vmem:[%s9338_s3 + $0x468] sm:$0xff] }
 0x206   : > { %5585 = vmatpush1.bf16.msra.mxu1 %v5584_v57  ;;  %v7744_v57 = vld [vmem:[#allocation2 + $0x189] sm:$0xff] }
 0x207   : > { %1799 = vmatmul.mubr.f32.gmra.mrb[28].mxu0 %v900_v2  ;;  %v908_v2 = vld [vmem:[#allocation2 + $0x138] sm:$0xff]  ;;  %5586 = vmatprep.subr.bf16.mxu1 %v9360_v3  ;;  %9447 = vst [vmem:[#allocation34_spill] sm:$0xff] %v7744_v57 }
 0x208   : > { %1803 = vmatprep.mubr.f32.mxu0 %v933_v21  ;;  %v5735_v21 = vpack.c.bf16 %v2279_v27, %v2278_v1  ;;  %v2286_v27 = vld [vmem:[%s9338_s3 + $0x460] sm:$0xff] }
 0x20a   : > { %5736 = vmatprep.subr.bf16.mxu0 %v5735_v21 }
 0x20b   : > { %1804 = vmatmul.mubr.f32.gmra.mrb[30].mxu0 %v901_v50  ;;  %v941_v50 = vld [vmem:[#allocation2 + $0x141] sm:$0xff] }
 0x20c   : > { %1808 = vmatprep.mubr.f32.mxu0 %v934_v45  ;;  %v2355_v45 = vld [vmem:[#allocation2 + $0x9] sm:$0xff]  ;;  %5738 = vmatpush3.bf16.msra.mxu0 %v5735_v21  ;;  %v5751_v21 = vpack.c.bf16 %v2287_v23, %v2286_v27  ;;  %v2185_v27 = vld [vmem:[%s9338_s3 + $0x138] sm:$0xff] }
 0x20d   : > { %2686 = vmatprep.mubr.f32.mxu1 %v2355_v45  ;;  %v2180_v45 = vld [vmem:[%s9338_s3 + $0x110] sm:$0xff] }
 0x20f   : > { %1809 = vmatmul.mubr.f32.gmra.mrb[32].mxu0 %v902_v30  ;;  %v2280_v30 = vld [vmem:[%s9338_s3 + $0x430] sm:$0xff] }
 0x210   : > { %1813 = vmatprep.mubr.f32.mxu0 %v935_v6  ;;  %v2281_v6 = vld [vmem:[%s9338_s3 + $0x438] sm:$0xff] }
 0x213   : > { %1814 = vmatmul.mubr.f32.gmra.mrb[34].mxu0 %v903_v51  ;;  %v909_v51 = vld [vmem:[#allocation2 + $0x140] sm:$0xff] }
 0x214   : > { %1818 = vmatprep.mubr.f32.mxu0 %v936_v62  ;;  %v5739_v62 = vpack.c.bf16 %v2281_v6, %v2280_v30  ;;  %v2181_v30 = vld [vmem:[%s9338_s3 + $0x118] sm:$0xff] }
 0x215   : > { %v5587_v6 = vpack.c.bf16 %v2181_v30, %v2180_v45 }
 0x216   : > { %5740 = vmatprep.subr.bf16.mxu0 %v5739_v62 }
 0x217   : > { %1819 = vmatmul.mubr.f32.gmra.mrb[36].mxu0 %v904_v31  ;;  %v942_v31 = vld [vmem:[#allocation2 + $0x151] sm:$0xff]  ;;  %5588 = vmatpush1.bf16.msra.mxu1 %v5587_v6 }
 0x218   : > { %1823 = vmatprep.mubr.f32.mxu0 %v937_v17  ;;  %v7681_v17 = vld [vmem:[#allocation2 + $0x8] sm:$0xff]  ;;  %5742 = vmatpush3.bf16.msra.mxu0 %v5739_v62  ;;  %v2289_v62 = vld [vmem:[%s9338_s3 + $0x478] sm:$0xff] }
 0x219   : > { %2687 = vmatmul.mubr.f32.gmra.mrb[34].mxu1 %v7681_v17  ;;  %5589 = vmatprep.subr.bf16.mxu1 %v9360_v3 }
 0x21b   : > { %1824 = vmatmul.mubr.f32.gmra.mrb[38].mxu0 %v905_v28 }
 0x21c   : > { %1828 = vmatprep.mubr.f32.mxu0 %v938_v37 }
 0x21e   : > { %v7664_v26 = vpop.f32.mrb[0].mxu1 }
 0x21f   : > { %1829 = vmatmul.mubr.f32.gmra.mrb[40].mxu0 %v906_v5  ;;  %v7667_v10 = vpop.f32.mrb[1].mxu1  ;;  %v5743_v5 = vpack.c.bf16 %v2283_v29, %v2282_v18 }
 0x220   : > { %1833 = vmatprep.mubr.f32.mxu0 %v939_v39  ;;  %v943_v39 = vld [vmem:[#allocation2 + $0x159] sm:$0xff] }
 0x221   : > { %5744 = vmatprep.subr.bf16.mxu0 %v5743_v5 }
 0x222   : > { %v7684_v28 = vpop.f32.mrb[2].mxu1  ;;  %5746 = vmatpush3.bf16.msra.mxu0 %v5743_v5  ;;  %v7734_v5 = vld [vmem:[#allocation2 + $0x181] sm:$0xff] }
 0x223   : > { %1834 = vmatmul.mubr.f32.gmra.mrb[42].mxu0 %v907_v35  ;;  %v7686_v37 = vpop.f32.mrb[3].mxu1  ;;  %v911_v35 = vld [vmem:[#allocation2 + $0x158] sm:$0xff]  ;;  %5748 = vmatprep.subr.bf16.mxu0 %v5747_v55  ;;  %9446 = vst [vmem:[#allocation33_spill] sm:$0xff] %v7734_v5 }
 0x224   : > { %1838 = vmatprep.mubr.f32.mxu0 %v940_v59  ;;  %v944_v59 = vld [vmem:[#allocation2 + $0x169] sm:$0xff] }
 0x226   : > { %v7707_v20 = vpop.f32.mrb[4].mxu1  ;;  %5750 = vmatpush3.bf16.msra.mxu0 %v5747_v55  ;;  %v916_v55 = vld [vmem:[#allocation2 + $0x198] sm:$0xff] }
 0x227   : > { %1839 = vmatmul.mubr.f32.gmra.mrb[44].mxu0 %v908_v2  ;;  %v7709_v1 = vpop.f32.mrb[5].mxu1  ;;  %v912_v2 = vld [vmem:[#allocation2 + $0x168] sm:$0xff]  ;;  %5752 = vmatprep.subr.bf16.mxu0 %v5751_v21 }
 0x228   : > { %1843 = vmatprep.mubr.f32.mxu0 %v941_v50  ;;  %v945_v50 = vld [vmem:[#allocation2 + $0x171] sm:$0xff] }
 0x22a   : > { %5754 = vmatpush3.bf16.msra.mxu0 %v5751_v21  ;;  %v7730_v29 = vpop.f32.mrb[6].mxu1  ;;  %v2186_v21 = vld [vmem:[%s9338_s3 + $0x140] sm:$0xff] }
 0x22b   : > { %1844 = vmatmul.mubr.f32.gmra.mrb[46].mxu0 %v909_v51  ;;  %v2288_v51 = vld [vmem:[%s9338_s3 + $0x470] sm:$0xff] }
 0x22c   : > { %1848 = vmatprep.mubr.f32.mxu0 %v942_v31  ;;  %v913_v31 = vld [vmem:[#allocation2 + $0x170] sm:$0xff]  ;;  %v5755_v18 = vpack.c.bf16 %v2289_v62, %v2288_v51  ;;  %v2189_v51 = vld [vmem:[%s9338_s3 + $0x158] sm:$0xff] }
 0x22e   : > { %5756 = vmatprep.subr.bf16.mxu0 %v5755_v18 }
 0x22f   : > { %1849 = vmatmul.mubr.f32.gmra.mrb[48].mxu0 %v910_v33  ;;  %v7732_v33 = vpop.f32.mrb[7].mxu1 }
 0x230   : > { %1853 = vmatprep.mubr.f32.mxu0 %v943_v39  ;;  %v2182_v39 = vld [vmem:[%s9338_s3 + $0x120] sm:$0xff]  ;;  %5758 = vmatpush3.bf16.msra.mxu0 %v5755_v18  ;;  %v7748_v25 = vpop.f32.mrb[8].mxu1 }
 0x231   : > { %v5590_v9 = vpack.c.bf16 %v2183_v63, %v2182_v39  ;;  %v2190_v39 = vld [vmem:[%s9338_s3 + $0x160] sm:$0xff]  ;;  %v2191_v63 = vld [vmem:[%s9338_s3 + $0x168] sm:$0xff] }
 0x233   : > { %1854 = vmatmul.mubr.f32.gmra.mrb[50].mxu0 %v911_v35  ;;  %5591 = vmatpush1.bf16.msra.mxu1 %v5590_v9  ;;  %v7751_v35 = vpop.f32.mrb[9].mxu1  ;;  %v5602_v9 = vpack.c.bf16 %v2191_v63, %v2190_v39  ;;  %v2196_v39 = vld [vmem:[%s9338_s3 + $0x190] sm:$0xff]  ;;  %v2197_v63 = vld [vmem:[%s9338_s3 + $0x198] sm:$0xff] }
 0x234   : > { %1858 = vmatprep.mubr.f32.mxu0 %v944_v59  ;;  %5592 = vmatprep.subr.bf16.mxu1 %v9360_v3  ;;  %v949_v59 = vld [vmem:[#allocation2 + $0x1a1] sm:$0xff] }
 0x237   : > { %1859 = vmatmul.mubr.f32.gmra.mrb[52].mxu0 %v912_v2 }
 0x238   : > { %1863 = vmatprep.mubr.f32.mxu0 %v945_v50  ;;  %v2187_v50 = vld [vmem:[%s9338_s3 + $0x148] sm:$0xff] }
 0x239   : > { %v5596_v45 = vpack.c.bf16 %v2187_v50, %v2186_v21  ;;  %v2194_v50 = vld [vmem:[%s9338_s3 + $0x180] sm:$0xff] }
 0x23b   : > { %1864 = vmatmul.mubr.f32.gmra.mrb[54].mxu0 %v913_v31 }
 0x23c   : > { %1868 = vmatprep.mubr.f32.mxu0 %v7734_v5  ;;  %v2203_v5 = vld [vmem:[%s9338_s3 + $0x1c8] sm:$0xff] }
 0x23f   : > { %1869 = vmatmul.mubr.f32.gmra.mrb[56].mxu0 %v7255_v11  ;;  %v2184_v11 = vld [vmem:[%s9338_s3 + $0x130] sm:$0xff] }
 0x240   : > { %1873 = vmatprep.mubr.f32.mxu0 %v7744_v57  ;;  %v5593_v23 = vpack.c.bf16 %v2185_v27, %v2184_v11  ;;  %v2193_v11 = vld [vmem:[%s9338_s3 + $0x178] sm:$0xff] }
 0x242   : > { %5594 = vmatpush1.bf16.msra.mxu1 %v5593_v23 }
 0x243   : > { %1874 = vmatmul.mubr.f32.gmra.mrb[58].mxu0 %v7267_v15  ;;  %5595 = vmatprep.subr.bf16.mxu1 %v9360_v3  ;;  %v7760_v15 = vpop.f32.mrb[10].mxu1 }
 0x244   : > { %1878 = vmatprep.mubr.f32.mxu0 %v948_v0  ;;  %v7763_v2 = vpop.f32.mrb[11].mxu1 }
 0x245   : > { %v7772_v30 = vpop.f32.mrb[12].mxu1 }
 0x246   : > { %5597 = vmatpush1.bf16.msra.mxu1 %v5596_v45  ;;  %v7774_v6 = vpop.f32.mrb[13].mxu1  ;;  %v2195_v45 = vld [vmem:[%s9338_s3 + $0x188] sm:$0xff] }
 0x247   : > { %1879 = vmatmul.mubr.f32.gmra.mrb[60].mxu0 %v916_v55  ;;  %5598 = vmatprep.subr.bf16.mxu1 %v9360_v3  ;;  %v7783_v31 = vpop.f32.mrb[14].mxu1 }
 0x248   : > { %1883 = vmatprep.mubr.f32.mxu0 %v949_v59  ;;  %v7785_v18 = vpop.f32.mrb[15].mxu1  ;;  %v2192_v59 = vld [vmem:[%s9338_s3 + $0x170] sm:$0xff] }
 0x249   : > { %v7794_v0 = vpop.f32.mrb[16].mxu1  ;;  %v5605_v27 = vpack.c.bf16 %v2193_v11, %v2192_v59 }
 0x24a   : > { %v7796_v55 = vpop.f32.mrb[17].mxu1 }
 0x24b   : > { %1884 = vmatmul.mubr.f32.gmra.mrb[62].mxu0 %v7681_v17  ;;  %v2188_v17 = vld [vmem:[%s9338_s3 + $0x150] sm:$0xff]  ;;  %v7805_v23 = vpop.f32.mrb[18].mxu1 }
 0x24c   : > { %v5599_v62 = vpack.c.bf16 %v2189_v51, %v2188_v17  ;;  %v7807_v21 = vpop.f32.mrb[19].mxu1  ;;  %v5608_v17 = vpack.c.bf16 %v2195_v45, %v2194_v50  ;;  %v2199_v50 = vld [vmem:[%s9338_s3 + $0x1a8] sm:$0xff] }
 0x24d   : > { %v7816_v51 = vpop.f32.mrb[20].mxu1 }
 0x24e   : > { %5600 = vmatpush1.bf16.msra.mxu1 %v5599_v62  ;;  %v7818_v62 = vpop.f32.mrb[21].mxu1 }
 0x24f   : > { %5601 = vmatprep.subr.bf16.mxu1 %v9360_v3  ;;  %v7827_v59 = vpop.f32.mrb[22].mxu1 }
 0x250   : > { %v7829_v11 = vpop.f32.mrb[23].mxu1 }
 0x252   : > { %5603 = vmatpush1.bf16.msra.mxu1 %v5602_v9  ;;  %v5611_v9 = vpack.c.bf16 %v2197_v63, %v2196_v39  ;;  %v2200_v63 = vld [vmem:[%s9338_s3 + $0x1b0] sm:$0xff] }
 0x253   : > { %5604 = vmatprep.subr.bf16.mxu1 %v9360_v3 }
 0x256   : > { %5606 = vmatpush1.bf16.msra.mxu1 %v5605_v27  ;;  %v2198_v27 = vld [vmem:[%s9338_s3 + $0x1a0] sm:$0xff] }
 0x257   : > { %5607 = vmatprep.subr.bf16.mxu1 %v9360_v3  ;;  %v5614_v45 = vpack.c.bf16 %v2199_v50, %v2198_v27 }
 0x25a   : > { %5609 = vmatpush1.bf16.msra.mxu1 %v5608_v17  ;;  %v7838_v17 = vpop.f32.mrb[24].mxu1 }
 0x25b   : > { %5610 = vmatprep.subr.bf16.mxu1 %v9360_v3  ;;  %v7840_v39 = vpop.f32.mrb[25].mxu1 }
 0x25c   : > { %v7849_v27 = vpop.f32.mrb[26].mxu1 }
 0x25d   : > { %v7851_v50 = vpop.f32.mrb[27].mxu1 }
 0x25e   : > { %5612 = vmatpush1.bf16.msra.mxu1 %v5611_v9  ;;  %v2201_v9 = vld [vmem:[%s9338_s3 + $0x1b8] sm:$0xff] }
 0x25f   : > { %5613 = vmatprep.subr.bf16.mxu1 %v9360_v3  ;;  %v5617_v57 = vpack.c.bf16 %v2201_v9, %v2200_v63  ;;  %v7860_v63 = vpop.f32.mrb[28].mxu1  ;;  %v2204_v9 = vld [vmem:[%s9338_s3 + $0x1d0] sm:$0xff] }
 0x260   : > { %v5623_v48 = vpack.c.bf16 %v2205_v53, %v2204_v9  ;;  %v7884_v53 = vld [vmem:[%s9337_s2] ss:$0 sm:$0xff] }
 0x262   : > { %5615 = vmatpush1.bf16.msra.mxu1 %v5614_v45  ;;  %v2202_v45 = vld [vmem:[%s9338_s3 + $0x1c0] sm:$0xff] }
 0x263   : > { %5616 = vmatprep.subr.bf16.mxu1 %v9360_v3  ;;  %v5620_v58 = vpack.c.bf16 %v2203_v5, %v2202_v45  ;;  %v2206_v45 = vld [vmem:[%s9338_s3 + $0x1e0] sm:$0xff] }
 0x264   : > { %v5626_v41 = vpack.c.bf16 %v2207_v42, %v2206_v45  ;;  %v2209_v42 = vld [vmem:[%s9338_s3 + $0x1f8] sm:$0xff] }
 0x265   : > { %v5629_v45 = vpack.c.bf16 %v2209_v42, %v2208_v38 }
 0x266   : > { %5618 = vmatpush1.bf16.msra.mxu1 %v5617_v57  ;;  %v7862_v57 = vpop.f32.mrb[29].mxu1 }
 0x267   : > { %5619 = vmatprep.subr.bf16.mxu1 %v9360_v3 }
 0x26a   : > { %5621 = vmatpush1.bf16.msra.mxu1 %v5620_v58 }
 0x26b   : > { %5622 = vmatprep.subr.bf16.mxu1 %v9360_v3 }
 0x26e   : > { %5624 = vmatpush1.bf16.msra.mxu1 %v5623_v48 }
 0x26f   : > { %5625 = vmatprep.subr.bf16.mxu1 %v9360_v3 }
 0x272   : > { %5627 = vmatpush1.bf16.msra.mxu1 %v5626_v41 }
 0x273   : > { %5628 = vmatprep.subr.bf16.mxu1 %v9360_v3 }
 0x276   : > { %5630 = vmatpush1.bf16.msra.mxu1 %v5629_v45 }
 0x277   : > { %5631 = vmatprep.subr.bf16.mxu1 %v9448_v8 }
 0x28c   : > { %v7871_v5 = vpop.f32.mrb[30].mxu1 }
 0x28d   : > { %v7873_v58 = vpop.f32.mrb[31].mxu1 }
 0x2a2   : > { %v1730_v48 = vpop.f32.mrb[0].mxu0 }
 0x2a3   : > { %v5871_v9 = vadd.f32 %v7884_v53, %v1730_v48  ;;  %v1732_v7 = vpop.f32.mrb[1].mxu0 }
 0x2a5   : > { %v1956_v43 = vadd.f32 %v5871_v9, %v7667_v10 }
 0x2a6   : > { %v1735_v4 = vpop.f32.mrb[2].mxu0 }
 0x2a7   : > { %v2114_v41 = vmax.f32 %v1956_v43, 0.0  ;;  %v5872_v3 = vadd.f32 %v7884_v53, %v1735_v4  ;;  %v1737_v13 = vpop.f32.mrb[3].mxu0 }
 0x2a9   : > { %2290 = vst [vmem:[#allocation2 + $0x19] sm:$0xff] %v2114_v41  ;;  %v1961_v7 = vadd.f32 %v5872_v3, %v7664_v26  ;;  %2691 = vmatprep.mubr.f32.mxu1 %v2114_v41 }
 0x2aa   : > { %v1740_v48 = vpop.f32.mrb[4].mxu0 }
 0x2ab   : > { %v2115_v36 = vmax.f32 %v1961_v7, 0.0  ;;  %v5873_v34 = vadd.f32 %v7884_v53, %v1740_v48  ;;  %v1742_v14 = vpop.f32.mrb[5].mxu0 }
 0x2ad   : > { %2291 = vst [vmem:[#allocation2 + $0x21] sm:$0xff] %v2115_v36  ;;  %v1966_v38 = vadd.f32 %v5873_v34, %v7686_v37 }
 0x2ae   : > { %v1745_v10 = vpop.f32.mrb[6].mxu0 }
 0x2af   : > { %v2116_v9 = vmax.f32 %v1966_v38, 0.0  ;;  %v5874_v43 = vadd.f32 %v7884_v53, %v1745_v10  ;;  %v1747_v4 = vpop.f32.mrb[7].mxu0 }
 0x2b0   : > { %v7901_v13 = vld [vmem:[#allocation2 + $0x18] sm:$0xff] }
 0x2b1   : > { %2292 = vst [vmem:[#allocation2 + $0x31] sm:$0xff] %v2116_v9  ;;  %v1971_v42 = vadd.f32 %v5874_v43, %v7684_v28  ;;  %2692 = vmatmul.mubr.f32.gmra.mrb[36].mxu1 %v7901_v13 }
 0x2b2   : > { %v1750_v3 = vpop.f32.mrb[8].mxu0  ;;  %2696 = vmatprep.mubr.f32.mxu1 %v2115_v36 }
 0x2b3   : > { %v2117_v26 = vmax.f32 %v1971_v42, 0.0  ;;  %v5875_v14 = vadd.f32 %v7884_v53, %v1750_v3  ;;  %v1752_v45 = vpop.f32.mrb[9].mxu0 }
 0x2b4   : > { %v7906_v41 = vld [vmem:[#allocation2 + $0x20] sm:$0xff] }
 0x2b5   : > { %2293 = vst [vmem:[#allocation2 + $0x39] sm:$0xff] %v2117_v26  ;;  %v1976_v34 = vadd.f32 %v5875_v14, %v7709_v1  ;;  %2697 = vmatmul.mubr.f32.gmra.mrb[38].mxu1 %v7906_v41 }
 0x2b6   : > { %v1755_v37 = vpop.f32.mrb[10].mxu0  ;;  %2701 = vmatprep.mubr.f32.mxu1 %v2116_v9 }
 0x2b7   : > { %v2118_v7 = vmax.f32 %v1976_v34, 0.0  ;;  %v5876_v28 = vadd.f32 %v7884_v53, %v1755_v37  ;;  %v1757_v48 = vpop.f32.mrb[11].mxu0 }
 0x2b8   : > { %v7911_v38 = vld [vmem:[#allocation2 + $0x30] sm:$0xff] }
 0x2b9   : > { %2294 = vst [vmem:[#allocation2 + $0x49] sm:$0xff] %v2118_v7  ;;  %v1981_v36 = vadd.f32 %v5876_v28, %v7707_v20  ;;  %2702 = vmatmul.mubr.f32.gmra.mrb[40].mxu1 %v7911_v38 }
 0x2ba   : > { %v1760_v10 = vpop.f32.mrb[12].mxu0  ;;  %2706 = vmatprep.mubr.f32.mxu1 %v2117_v26 }
 0x2bb   : > { %v2119_v43 = vmax.f32 %v1981_v36, 0.0  ;;  %v5877_v1 = vadd.f32 %v7884_v53, %v1760_v10  ;;  %v1762_v4 = vpop.f32.mrb[13].mxu0 }
 0x2bc   : > { %v7916_v42 = vld [vmem:[#allocation2 + $0x32] sm:$0xff]  ;;  %v7920_v3 = vld [vmem:[#allocation2 + $0x3a] sm:$0xff] }
 0x2bd   : > { %v7918_v9 = vld [vmem:[#allocation2 + $0x38] sm:$0xff]  ;;  %2295 = vst [vmem:[#allocation2 + $0x51] sm:$0xff] %v2119_v43  ;;  %v1986_v14 = vadd.f32 %v5877_v1, %v7732_v33  ;;  %5033 = vmatprep.mubr.f32.mxu0 %v7916_v42 }
 0x2be   : > { %2707 = vmatmul.mubr.f32.gmra.mrb[42].mxu1 %v7918_v9  ;;  %v1765_v20 = vpop.f32.mrb[14].mxu0  ;;  %5034 = vmatmul.mubr.f32.vlgmr.msra.gmra.mrb[64].mxu0 %v7920_v3 }
 0x2bf   : > { %2711 = vmatprep.mubr.f32.mxu1 %v2118_v7  ;;  %v2120_v26 = vmax.f32 %v1986_v14, 0.0  ;;  %v5878_v45 = vadd.f32 %v7884_v53, %v1765_v20  ;;  %v1767_v34 = vpop.f32.mrb[15].mxu0 }
 0x2c0   : > { %v7927_v37 = vld [vmem:[#allocation2 + $0x48] sm:$0xff] }
 0x2c1   : > { %2296 = vst [vmem:[#allocation2 + $0x61] sm:$0xff] %v2120_v26  ;;  %v1991_v28 = vadd.f32 %v5878_v45, %v7730_v29 }
 0x2c2   : > { %2712 = vmatmul.mubr.f32.gmra.mrb[44].mxu1 %v7927_v37  ;;  %v1770_v33 = vpop.f32.mrb[16].mxu0 }
 0x2c3   : > { %2716 = vmatprep.mubr.f32.mxu1 %v2119_v43  ;;  %v2121_v48 = vmax.f32 %v1991_v28, 0.0  ;;  %v5879_v36 = vadd.f32 %v7884_v53, %v1770_v33  ;;  %v1772_v10 = vpop.f32.mrb[17].mxu0 }
 0x2c4   : > { %v7932_v1 = vld [vmem:[#allocation2 + $0x4a] sm:$0xff]  ;;  %v7936_v4 = vld [vmem:[#allocation2 + $0x52] sm:$0xff] }
 0x2c5   : > { %v7934_v7 = vld [vmem:[#allocation2 + $0x50] sm:$0xff]  ;;  %2297 = vst [vmem:[#allocation2 + $0x69] sm:$0xff] %v2121_v48  ;;  %v1996_v14 = vadd.f32 %v5879_v36, %v7751_v35  ;;  %5036 = vmatprep.mubr.f32.mxu0 %v7932_v1 }
 0x2c6   : > { %2717 = vmatmul.mubr.f32.gmra.mrb[46].mxu1 %v7934_v7  ;;  %v1775_v29 = vpop.f32.mrb[18].mxu0  ;;  %5037 = vmatmul.mubr.f32.gmra.mrb[66].mxu0 %v7936_v4 }
 0x2c7   : > { %2721 = vmatprep.mubr.f32.mxu1 %v2120_v26  ;;  %v2122_v43 = vmax.f32 %v1996_v14, 0.0  ;;  %v5880_v20 = vadd.f32 %v7884_v53, %v1775_v29  ;;  %v1777_v45 = vpop.f32.mrb[19].mxu0 }
 0x2c8   : > { %v7943_v34 = vld [vmem:[#allocation2 + $0x60] sm:$0xff] }
 0x2c9   : > { %2298 = vst [vmem:[#allocation2 + $0x79] sm:$0xff] %v2122_v43  ;;  %v2001_v28 = vadd.f32 %v5880_v20, %v7748_v25 }
 0x2ca   : > { %2722 = vmatmul.mubr.f32.gmra.mrb[48].mxu1 %v7943_v34  ;;  %v1780_v35 = vpop.f32.mrb[20].mxu0 }
 0x2cb   : > { %2726 = vmatprep.mubr.f32.mxu1 %v2121_v48  ;;  %v2123_v33 = vmax.f32 %v2001_v28, 0.0  ;;  %v5881_v36 = vadd.f32 %v7884_v53, %v1780_v35  ;;  %v1782_v10 = vpop.f32.mrb[21].mxu0 }
 0x2cc   : > { %v7948_v40 = vld [vmem:[#allocation2 + $0x62] sm:$0xff]  ;;  %v7952_v14 = vld [vmem:[#allocation2 + $0x6a] sm:$0xff] }
 0x2cd   : > { %v7950_v26 = vld [vmem:[#allocation2 + $0x68] sm:$0xff]  ;;  %2299 = vst [vmem:[#allocation2 + $0x81] sm:$0xff] %v2123_v33  ;;  %v2006_v29 = vadd.f32 %v5881_v36, %v7763_v2  ;;  %5039 = vmatprep.mubr.f32.mxu0 %v7948_v40 }
 0x2ce   : > { %2727 = vmatmul.mubr.f32.gmra.mrb[50].mxu1 %v7950_v26  ;;  %v1785_v25 = vpop.f32.mrb[22].mxu0  ;;  %5040 = vmatmul.mubr.f32.gmra.mrb[68].mxu0 %v7952_v14 }
 0x2cf   : > { %2731 = vmatprep.mubr.f32.mxu1 %v2122_v43  ;;  %v2124_v48 = vmax.f32 %v2006_v29, 0.0  ;;  %v5882_v20 = vadd.f32 %v7884_v53, %v1785_v25  ;;  %v1787_v45 = vpop.f32.mrb[23].mxu0 }
 0x2d0   : > { %v7959_v28 = vld [vmem:[#allocation2 + $0x78] sm:$0xff] }
 0x2d1   : > { %2300 = vst [vmem:[#allocation2 + $0x91] sm:$0xff] %v2124_v48  ;;  %v2011_v35 = vadd.f32 %v5882_v20, %v7760_v15 }
 0x2d2   : > { %2732 = vmatmul.mubr.f32.gmra.mrb[52].mxu1 %v7959_v28  ;;  %v1790_v2 = vpop.f32.mrb[24].mxu0 }
 0x2d3   : > { %2736 = vmatprep.mubr.f32.mxu1 %v2123_v33  ;;  %v2125_v36 = vmax.f32 %v2011_v35, 0.0  ;;  %v5883_v10 = vadd.f32 %v7884_v53, %v1790_v2  ;;  %v1792_v32 = vpop.f32.mrb[25].mxu0 }
 0x2d4   : > { %v7964_v24 = vld [vmem:[#allocation2 + $0x7a] sm:$0xff]  ;;  %v7968_v29 = vld [vmem:[#allocation2 + $0x82] sm:$0xff] }
 0x2d5   : > { %v7966_v43 = vld [vmem:[#allocation2 + $0x80] sm:$0xff]  ;;  %2301 = vst [vmem:[#allocation2 + $0x99] sm:$0xff] %v2125_v36  ;;  %v2016_v25 = vadd.f32 %v5883_v10, %v7774_v6  ;;  %5042 = vmatprep.mubr.f32.mxu0 %v7964_v24 }
 0x2d6   : > { %2737 = vmatmul.mubr.f32.gmra.mrb[54].mxu1 %v7966_v43  ;;  %v1795_v15 = vpop.f32.mrb[26].mxu0  ;;  %5043 = vmatmul.mubr.f32.gmra.mrb[70].mxu0 %v7968_v29 }
 0x2d7   : > { %2741 = vmatprep.mubr.f32.mxu1 %v2124_v48  ;;  %v2126_v33 = vmax.f32 %v2016_v25, 0.0  ;;  %v5884_v32 = vadd.f32 %v7884_v53, %v1795_v15  ;;  %v1797_v20 = vpop.f32.mrb[27].mxu0 }
 0x2d8   : > { %v7975_v45 = vld [vmem:[#allocation2 + $0x90] sm:$0xff] }
 0x2d9   : > { %2302 = vst [vmem:[#allocation2 + $0xa9] sm:$0xff] %v2126_v33  ;;  %v2021_v35 = vadd.f32 %v5884_v32, %v7772_v30 }
 0x2da   : > { %2742 = vmatmul.mubr.f32.gmra.mrb[56].mxu1 %v7975_v45  ;;  %v1800_v6 = vpop.f32.mrb[28].mxu0 }
 0x2db   : > { %2746 = vmatprep.mubr.f32.mxu1 %v2125_v36  ;;  %v2127_v2 = vmax.f32 %v2021_v35, 0.0  ;;  %v5885_v10 = vadd.f32 %v7884_v53, %v1800_v6  ;;  %v1802_v16 = vpop.f32.mrb[29].mxu0 }
 0x2dc   : > { %v7980_v12 = vld [vmem:[#allocation2 + $0x92] sm:$0xff]  ;;  %v7984_v25 = vld [vmem:[#allocation2 + $0x9a] sm:$0xff] }
 0x2dd   : > { %v7982_v48 = vld [vmem:[#allocation2 + $0x98] sm:$0xff]  ;;  %2303 = vst [vmem:[#allocation2 + $0xb1] sm:$0xff] %v2127_v2  ;;  %v2026_v15 = vadd.f32 %v5885_v10, %v7785_v18  ;;  %5045 = vmatprep.mubr.f32.mxu0 %v7980_v12 }
 0x2de   : > { %2747 = vmatmul.mubr.f32.gmra.mrb[58].mxu1 %v7982_v48  ;;  %v1805_v30 = vpop.f32.mrb[30].mxu0  ;;  %5046 = vmatmul.mubr.f32.gmra.mrb[72].mxu0 %v7984_v25 }
 0x2df   : > { %2751 = vmatprep.mubr.f32.mxu1 %v2126_v33  ;;  %v2128_v36 = vmax.f32 %v2026_v15, 0.0  ;;  %v5886_v16 = vadd.f32 %v7884_v53, %v1805_v30  ;;  %v1807_v32 = vpop.f32.mrb[31].mxu0 }
 0x2e0   : > { %v7991_v20 = vld [vmem:[#allocation2 + $0xa8] sm:$0xff] }
 0x2e1   : > { %2304 = vst [vmem:[#allocation2 + $0xc1] sm:$0xff] %v2128_v36  ;;  %v2031_v35 = vadd.f32 %v5886_v16, %v7783_v31 }
 0x2e2   : > { %2752 = vmatmul.mubr.f32.gmra.mrb[60].mxu1 %v7991_v20  ;;  %v1810_v18 = vpop.f32.mrb[32].mxu0 }
 0x2e3   : > { %2756 = vmatprep.mubr.f32.mxu1 %v2127_v2  ;;  %v2129_v6 = vmax.f32 %v2031_v35, 0.0  ;;  %v5887_v10 = vadd.f32 %v7884_v53, %v1810_v18  ;;  %v1812_v47 = vpop.f32.mrb[33].mxu0 }
 0x2e4   : > { %v7996_v19 = vld [vmem:[#allocation2 + $0xaa] sm:$0xff]  ;;  %v8000_v15 = vld [vmem:[#allocation2 + $0xb2] sm:$0xff] }
 0x2e5   : > { %v7998_v33 = vld [vmem:[#allocation2 + $0xb0] sm:$0xff]  ;;  %2305 = vst [vmem:[#allocation2 + $0xc9] sm:$0xff] %v2129_v6  ;;  %v2036_v30 = vadd.f32 %v5887_v10, %v7796_v55  ;;  %5048 = vmatprep.mubr.f32.mxu0 %v7996_v19 }
 0x2e6   : > { %2757 = vmatmul.mubr.f32.gmra.mrb[62].mxu1 %v7998_v33  ;;  %v1815_v31 = vpop.f32.mrb[34].mxu0  ;;  %5049 = vmatmul.mubr.f32.gmra.mrb[74].mxu0 %v8000_v15 }
 0x2e7   : > { %2761 = vmatprep.mubr.f32.mxu1 %v2128_v36  ;;  %v2130_v2 = vmax.f32 %v2036_v30, 0.0  ;;  %v5888_v47 = vadd.f32 %v7884_v53, %v1815_v31  ;;  %v1817_v16 = vpop.f32.mrb[35].mxu0 }
 0x2e8   : > { %v8007_v32 = vld [vmem:[#allocation2 + $0xc0] sm:$0xff] }
 0x2e9   : > { %2306 = vst [vmem:[#allocation2 + $0xd9] sm:$0xff] %v2130_v2  ;;  %v2041_v35 = vadd.f32 %v5888_v47, %v7794_v0 }
 0x2ea   : > { %2762 = vmatmul.mubr.f32.gmra.mrb[64].mxu1 %v8007_v32  ;;  %v1820_v55 = vpop.f32.mrb[36].mxu0 }
 0x2eb   : > { %2766 = vmatprep.mubr.f32.mxu1 %v2129_v6  ;;  %v2131_v18 = vmax.f32 %v2041_v35, 0.0  ;;  %v5889_v10 = vadd.f32 %v7884_v53, %v1820_v55  ;;  %v1822_v61 = vpop.f32.mrb[37].mxu0 }
 0x2ec   : > { %v8012_v22 = vld [vmem:[#allocation2 + $0xc2] sm:$0xff]  ;;  %v8016_v30 = vld [vmem:[#allocation2 + $0xca] sm:$0xff] }
 0x2ed   : > { %v8014_v36 = vld [vmem:[#allocation2 + $0xc8] sm:$0xff]  ;;  %2307 = vst [vmem:[#allocation2 + $0xe1] sm:$0xff] %v2131_v18  ;;  %v2046_v31 = vadd.f32 %v5889_v10, %v7807_v21  ;;  %5051 = vmatprep.mubr.f32.mxu0 %v8012_v22 }
 0x2ee   : > { %2767 = vmatmul.mubr.f32.gmra.mrb[66].mxu1 %v8014_v36  ;;  %v1825_v0 = vpop.f32.mrb[38].mxu0  ;;  %5052 = vmatmul.mubr.f32.gmra.mrb[76].mxu0 %v8016_v30 }
 0x2ef   : > { %2771 = vmatprep.mubr.f32.mxu1 %v2130_v2  ;;  %v2132_v6 = vmax.f32 %v2046_v31, 0.0  ;;  %v5890_v61 = vadd.f32 %v7884_v53, %v1825_v0  ;;  %v1827_v47 = vpop.f32.mrb[39].mxu0 }
 0x2f0   : > { %v8023_v16 = vld [vmem:[#allocation2 + $0xd8] sm:$0xff] }
 0x2f1   : > { %2308 = vst [vmem:[#allocation2 + $0xf1] sm:$0xff] %v2132_v6  ;;  %v2051_v35 = vadd.f32 %v5890_v61, %v7805_v23 }
 0x2f2   : > { %2772 = vmatmul.mubr.f32.gmra.mrb[68].mxu1 %v8023_v16  ;;  %v1830_v21 = vpop.f32.mrb[40].mxu0 }
 0x2f3   : > { %2776 = vmatprep.mubr.f32.mxu1 %v2131_v18  ;;  %v2133_v55 = vmax.f32 %v2051_v35, 0.0  ;;  %v5891_v10 = vadd.f32 %v7884_v53, %v1830_v21  ;;  %v1832_v46 = vpop.f32.mrb[41].mxu0 }
 0x2f4   : > { %v8028_v60 = vld [vmem:[#allocation2 + $0xda] sm:$0xff]  ;;  %v8032_v31 = vld [vmem:[#allocation2 + $0xe2] sm:$0xff] }
 0x2f5   : > { %v8030_v2 = vld [vmem:[#allocation2 + $0xe0] sm:$0xff]  ;;  %2309 = vst [vmem:[#allocation2 + $0xf9] sm:$0xff] %v2133_v55  ;;  %v2056_v0 = vadd.f32 %v5891_v10, %v7818_v62  ;;  %5054 = vmatprep.mubr.f32.mxu0 %v8028_v60 }
 0x2f6   : > { %2777 = vmatmul.mubr.f32.gmra.mrb[70].mxu1 %v8030_v2  ;;  %v1835_v23 = vpop.f32.mrb[42].mxu0  ;;  %5055 = vmatmul.mubr.f32.gmra.mrb[78].mxu0 %v8032_v31 }
 0x2f7   : > { %2781 = vmatprep.mubr.f32.mxu1 %v2132_v6  ;;  %v2134_v18 = vmax.f32 %v2056_v0, 0.0  ;;  %v5892_v46 = vadd.f32 %v7884_v53, %v1835_v23  ;;  %v1837_v61 = vpop.f32.mrb[43].mxu0 }
 0x2f8   : > { %v8039_v47 = vld [vmem:[#allocation2 + $0xf0] sm:$0xff] }
 0x2f9   : > { %2310 = vst [vmem:[#allocation2 + $0x109] sm:$0xff] %v2134_v18  ;;  %v2061_v35 = vadd.f32 %v5892_v46, %v7816_v51 }
 0x2fa   : > { %2782 = vmatmul.mubr.f32.gmra.mrb[72].mxu1 %v8039_v47  ;;  %v1840_v62 = vpop.f32.mrb[44].mxu0 }
 0x2fb   : > { %2786 = vmatprep.mubr.f32.mxu1 %v2133_v55  ;;  %v2135_v21 = vmax.f32 %v2061_v35, 0.0  ;;  %v5893_v10 = vadd.f32 %v7884_v53, %v1840_v62  ;;  %v1842_v56 = vpop.f32.mrb[45].mxu0 }
 0x2fc   : > { %v8044_v54 = vld [vmem:[#allocation2 + $0xf2] sm:$0xff]  ;;  %v8048_v0 = vld [vmem:[#allocation2 + $0xfa] sm:$0xff] }
 0x2fd   : > { %v8046_v6 = vld [vmem:[#allocation2 + $0xf8] sm:$0xff]  ;;  %2311 = vst [vmem:[#allocation2 + $0x111] sm:$0xff] %v2135_v21  ;;  %v2066_v23 = vadd.f32 %v5893_v10, %v7829_v11  ;;  %5057 = vmatprep.mubr.f32.mxu0 %v8044_v54 }
 0x2fe   : > { %2787 = vmatmul.mubr.f32.gmra.mrb[74].mxu1 %v8046_v6  ;;  %v1845_v51 = vpop.f32.mrb[46].mxu0  ;;  %5058 = vmatmul.mubr.f32.gmra.mrb[80].mxu0 %v8048_v0 }
 0x2ff   : > { %2791 = vmatprep.mubr.f32.mxu1 %v2134_v18  ;;  %v2136_v55 = vmax.f32 %v2066_v23, 0.0  ;;  %v5894_v56 = vadd.f32 %v7884_v53, %v1845_v51  ;;  %v1847_v46 = vpop.f32.mrb[47].mxu0 }
 0x300   : > { %v8055_v61 = vld [vmem:[#allocation2 + $0x108] sm:$0xff] }
 0x301   : > { %2312 = vst [vmem:[#allocation2 + $0x121] sm:$0xff] %v2136_v55  ;;  %v2071_v35 = vadd.f32 %v5894_v56, %v7827_v59 }
 0x302   : > { %2792 = vmatmul.mubr.f32.gmra.mrb[76].mxu1 %v8055_v61  ;;  %v1850_v11 = vpop.f32.mrb[48].mxu0 }
 0x303   : > { %2796 = vmatprep.mubr.f32.mxu1 %v2135_v21  ;;  %v2137_v62 = vmax.f32 %v2071_v35, 0.0  ;;  %v5895_v10 = vadd.f32 %v7884_v53, %v1850_v11  ;;  %v1852_v52 = vpop.f32.mrb[49].mxu0 }
 0x304   : > { %v8060_v49 = vld [vmem:[#allocation2 + $0x10a] sm:$0xff]  ;;  %v8064_v23 = vld [vmem:[#allocation2 + $0x112] sm:$0xff] }
 0x305   : > { %9449 = vst [vmem:[#allocation35_spill] sm:$0xff] %v8060_v49  ;;  %v8062_v18 = vld [vmem:[#allocation2 + $0x110] sm:$0xff]  ;;  %2313 = vst [vmem:[#allocation2 + $0x129] sm:$0xff] %v2137_v62  ;;  %v2076_v51 = vadd.f32 %v5895_v10, %v7840_v39  ;;  %5060 = vmatprep.mubr.f32.mxu0 %v8060_v49 }
 0x306   : > { %2797 = vmatmul.mubr.f32.gmra.mrb[78].mxu1 %v8062_v18  ;;  %v1855_v59 = vpop.f32.mrb[50].mxu0  ;;  %5061 = vmatmul.mubr.f32.gmra.mrb[82].mxu0 %v8064_v23 }
 0x307   : > { %2801 = vmatprep.mubr.f32.mxu1 %v2136_v55  ;;  %v2138_v21 = vmax.f32 %v2076_v51, 0.0  ;;  %v5896_v52 = vadd.f32 %v7884_v53, %v1855_v59  ;;  %v1857_v56 = vpop.f32.mrb[51].mxu0 }
 0x308   : > { %v8071_v46 = vld [vmem:[#allocation2 + $0x120] sm:$0xff] }
 0x309   : > { %2314 = vst [vmem:[#allocation2 + $0x139] sm:$0xff] %v2138_v21  ;;  %v2081_v35 = vadd.f32 %v5896_v52, %v7838_v17 }
 0x30a   : > { %2802 = vmatmul.mubr.f32.gmra.mrb[80].mxu1 %v8071_v46  ;;  %v1860_v39 = vpop.f32.mrb[52].mxu0 }
 0x30b   : > { %2806 = vmatprep.mubr.f32.mxu1 %v2137_v62  ;;  %v2139_v11 = vmax.f32 %v2081_v35, 0.0  ;;  %v5897_v10 = vadd.f32 %v7884_v53, %v1860_v39  ;;  %v1862_v44 = vpop.f32.mrb[53].mxu0 }
 0x30c   : > { %v8076_v49 = vld [vmem:[#allocation2 + $0x122] sm:$0xff]  ;;  %v8080_v51 = vld [vmem:[#allocation2 + $0x12a] sm:$0xff] }
 0x30d   : > { %v8078_v55 = vld [vmem:[#allocation2 + $0x128] sm:$0xff]  ;;  %9450 = vst [vmem:[#allocation36_spill] sm:$0xff] %v8080_v51  ;;  %2315 = vst [vmem:[#allocation2 + $0x141] sm:$0xff] %v2139_v11  ;;  %v2086_v59 = vadd.f32 %v5897_v10, %v7851_v50  ;;  %5063 = vmatprep.mubr.f32.mxu0 %v8076_v49 }
 0x30e   : > { %2807 = vmatmul.mubr.f32.gmra.mrb[82].mxu1 %v8078_v55  ;;  %v1865_v17 = vpop.f32.mrb[54].mxu0  ;;  %5064 = vmatmul.mubr.f32.gmra.mrb[84].mxu0 %v8080_v51 }
 0x30f   : > { %2811 = vmatprep.mubr.f32.mxu1 %v2138_v21  ;;  %v8086_v62 = vmax.f32 %v2086_v59, 0.0  ;;  %v5898_v44 = vadd.f32 %v7884_v53, %v1865_v17  ;;  %v1867_v52 = vpop.f32.mrb[55].mxu0 }
 0x310   : > { %v8089_v56 = vld [vmem:[#allocation2 + $0x138] sm:$0xff] }
 0x311   : > { %9451 = vst [vmem:[#allocation37_spill] sm:$0xff] %v8086_v62  ;;  %2316 = vst [vmem:[#allocation2 + $0x151] sm:$0xff] %v8086_v62  ;;  %v2091_v35 = vadd.f32 %v5898_v44, %v7849_v27 }
 0x312   : > { %2812 = vmatmul.mubr.f32.gmra.mrb[84].mxu1 %v8089_v56  ;;  %v1870_v50 = vpop.f32.mrb[56].mxu0 }
 0x313   : > { %2816 = vmatprep.mubr.f32.mxu1 %v2139_v11  ;;  %v8094_v39 = vmax.f32 %v2091_v35, 0.0  ;;  %v5899_v10 = vadd.f32 %v7884_v53, %v1870_v50  ;;  %v1872_v21 = vpop.f32.mrb[57].mxu0 }
 0x314   : > { %v8097_v59 = vld [vmem:[#allocation2 + $0x13a] sm:$0xff]  ;;  %v8101_v17 = vld [vmem:[#allocation2 + $0x142] sm:$0xff] }
 0x315   : > { %9452 = vst [vmem:[#allocation38_spill] sm:$0xff] %v8094_v39  ;;  %v8099_v51 = vld [vmem:[#allocation2 + $0x140] sm:$0xff]  ;;  %9453 = vst [vmem:[#allocation39_spill] sm:$0xff] %v8101_v17  ;;  %v2096_v52 = vadd.f32 %v5899_v10, %v7862_v57  ;;  %5066 = vmatprep.mubr.f32.mxu0 %v8097_v59 }
 0x316   : > { %2317 = vst [vmem:[#allocation2 + $0x159] sm:$0xff] %v8094_v39  ;;  %2817 = vmatmul.mubr.f32.gmra.mrb[86].mxu1 %v8099_v51  ;;  %v1875_v27 = vpop.f32.mrb[58].mxu0  ;;  %5067 = vmatmul.mubr.f32.gmra.mrb[86].mxu0 %v8101_v17 }
 0x317   : > { %2821 = vmatprep.mubr.f32.mxu1 %v8086_v62  ;;  %v8109_v11 = vmax.f32 %v2096_v52, 0.0  ;;  %v5900_v44 = vadd.f32 %v7884_v53, %v1875_v27  ;;  %v1877_v35 = vpop.f32.mrb[59].mxu0 }
 0x318   : > { %v8112_v50 = vld [vmem:[#allocation2 + $0x150] sm:$0xff] }
 0x319   : > { %9454 = vst [vmem:[#allocation40_spill] sm:$0xff] %v8109_v11  ;;  %2318 = vst [vmem:[#allocation2 + $0x169] sm:$0xff] %v8109_v11  ;;  %v2101_v57 = vadd.f32 %v5900_v44, %v7860_v63 }
 0x31a   : > { %2822 = vmatmul.mubr.f32.gmra.mrb[88].mxu1 %v8112_v50  ;;  %v1880_v10 = vpop.f32.mrb[60].mxu0 }
 0x31b   : > { %2826 = vmatprep.mubr.f32.mxu1 %v8094_v39  ;;  %v8118_v21 = vmax.f32 %v2101_v57, 0.0  ;;  %v5901_v62 = vadd.f32 %v7884_v53, %v1880_v10  ;;  %v1882_v52 = vpop.f32.mrb[61].mxu0 }
 0x31d   : > { %9455 = vst [vmem:[#allocation41_spill] sm:$0xff] %v8118_v21  ;;  %v8121_v17 = vld [vmem:[#allocation2 + $0x152] sm:$0xff]  ;;  %v8125_v35 = vld [vmem:[#allocation2 + $0x15a] sm:$0xff]  ;;  %2319 = vst [vmem:[#allocation2 + $0x171] sm:$0xff] %v8118_v21  ;;  %v8129_v63 = vadd.f32 %v5901_v62, %v7873_v58 }
 0x31e   : > { %v8123_v27 = vld [vmem:[#allocation2 + $0x158] sm:$0xff]  ;;  %5069 = vmatprep.mubr.f32.mxu0 %v8121_v17  ;;  %v1885_v44 = vpop.f32.mrb[62].mxu0 }
 0x31f   : > { %9456 = vst [vmem:[#allocation42_spill] sm:$0xff] %v8129_v63  ;;  %2827 = vmatmul.mubr.f32.gmra.mrb[90].mxu1 %v8123_v27  ;;  %5070 = vmatmul.mubr.f32.gmra.mrb[88].mxu0 %v8125_v35  ;;  %v9392_v57 = vmax.f32 %v8129_v63, 0.0  ;;  %v5902_v10 = vadd.f32 %v7884_v53, %v1885_v44  ;;  %v1887_v52 = vpop.f32.mrb[63].mxu0  ;;  %v2211_v53 = vld [vmem:[%s9338_s3 + $0x208] sm:$0xff]  ;;  %v2212_v63 = vld [vmem:[%s9338_s3 + $0x210] sm:$0xff] }
 0x320   : > { %2831 = vmatprep.mubr.f32.mxu1 %v8109_v11  ;;  %v8137_v39 = vld [vmem:[#allocation2 + $0x168] sm:$0xff]  ;;  %v2210_v11 = vld [vmem:[%s9338_s3 + $0x200] sm:$0xff] }
 0x321   : > { %2320 = vst [vmem:[#allocation2 + $0x181] sm:$0xff] %v9392_v57  ;;  %v8142_v58 = vadd.f32 %v5902_v10, %v7871_v5  ;;  %v2386_v10 = vld [vmem:[#allocation2 + $0x2] sm:$0xff]  ;;  %v5632_v57 = vpack.c.bf16 %v2211_v53, %v2210_v11 }
 0x323   : > { %9457 = vst [vmem:[#allocation43_spill] sm:$0xff] %v8142_v58  ;;  %2832 = vmatmul.mubr.f32.gmra.mrb[92].mxu1 %v8137_v39  ;;  %v9395_v62 = vmax.f32 %v8142_v58, 0.0 }
 0x324   : > { %2836 = vmatprep.mubr.f32.mxu1 %v8118_v21  ;;  %v8153_v44 = vld [vmem:[#allocation2 + $0x16a] sm:$0xff]  ;;  %v8157_v5 = vld [vmem:[#allocation2 + $0x172] sm:$0xff] }
 0x325   : > { %v8155_v52 = vld [vmem:[#allocation2 + $0x170] sm:$0xff]  ;;  %9458 = vst [vmem:[#allocation44_spill] sm:$0xff] %v8157_v5  ;;  %2321 = vst [vmem:[#allocation2 + $0x189] sm:$0xff] %v9395_v62  ;;  %5072 = vmatprep.mubr.f32.mxu0 %v8153_v44  ;;  %v2213_v21 = vld [vmem:[%s9338_s3 + $0x218] sm:$0xff] }
 0x326   : > { %5073 = vmatmul.mubr.f32.gmra.mrb[90].mxu0 %v8157_v5  ;;  %v2387_v62 = vld [vmem:[#allocation2 + $0xa] sm:$0xff]  ;;  %v5635_v58 = vpack.c.bf16 %v2213_v21, %v2212_v63  ;;  %v8186_v21 = vld [vmem:[#allocation2 + $0x1a] sm:$0xff] }
 0x327   : > { %2837 = vmatmul.mubr.f32.gmra.mrb[94].mxu1 %v8155_v52  ;;  %v2215_v5 = vld [vmem:[%s9338_s3 + $0x228] sm:$0xff]  ;;  %v2216_v63 = vld [vmem:[%s9338_s3 + $0x230] sm:$0xff] }
 0x328   : > { %2906 = vmatprep.mubr.f32.mxu1 %v7901_v13  ;;  %v2214_v13 = vld [vmem:[%s9338_s3 + $0x220] sm:$0xff] }
 0x32b   : > { %2907 = vmatmul.mubr.f32.vlgmr.msra.gmra.mrb[32].mxu1 %v2386_v10  ;;  %v2220_v10 = vld [vmem:[%s9338_s3 + $0x250] sm:$0xff] }
 0x32c   : > { %2911 = vmatprep.mubr.f32.mxu1 %v7906_v41  ;;  %5633 = vmatpush1.bf16.msra.mxu1 %v5632_v57  ;;  %v8176_v11 = vld [vmem:[#allocation2 + $0x182] sm:$0xff]  ;;  %v8178_v53 = vld [vmem:[#allocation2 + $0x18a] sm:$0xff]  ;;  %v5638_v41 = vpack.c.bf16 %v2215_v5, %v2214_v13  ;;  %v2217_v57 = vld [vmem:[%s9338_s3 + $0x238] sm:$0xff] }
 0x32d   : > { %5634 = vmatprep.subr.bf16.mxu1 %v9448_v8  ;;  %5075 = vmatprep.mubr.f32.mxu0 %v8176_v11  ;;  %v2219_v5 = vld [vmem:[%s9338_s3 + $0x248] sm:$0xff]  ;;  %v2221_v13 = vld [vmem:[%s9338_s3 + $0x258] sm:$0xff] }
 0x32e   : > { %5076 = vmatmul.mubr.f32.gmra.mrb[92].mxu0 %v8178_v53 }
 0x32f   : > { %2912 = vmatmul.mubr.f32.gmra.mrb[34].mxu1 %v2387_v62  ;;  %v2218_v62 = vld [vmem:[%s9338_s3 + $0x240] sm:$0xff] }
 0x330   : > { %2916 = vmatprep.mubr.f32.mxu1 %v7911_v38  ;;  %5636 = vmatpush1.bf16.msra.mxu1 %v5635_v58  ;;  %v5641_v38 = vpack.c.bf16 %v2217_v57, %v2216_v63  ;;  %v8197_v58 = vld [vmem:[#allocation2 + $0x22] sm:$0xff]  ;;  %v2225_v57 = vld [vmem:[%s9338_s3 + $0x278] sm:$0xff] }
 0x331   : > { %5637 = vmatprep.subr.bf16.mxu1 %v9448_v8  ;;  %v2223_v63 = vld [vmem:[%s9338_s3 + $0x268] sm:$0xff] }
 0x333   : > { %2917 = vmatmul.mubr.f32.gmra.mrb[36].mxu1 %v8186_v21 }
 0x334   : > { %2921 = vmatprep.mubr.f32.mxu1 %v7918_v9  ;;  %5639 = vmatpush1.bf16.msra.mxu1 %v5638_v41  ;;  %v5644_v9 = vpack.c.bf16 %v2219_v5, %v2218_v62  ;;  %v5647_v41 = vpack.c.bf16 %v2221_v13, %v2220_v10  ;;  %v2229_v62 = vld [vmem:[%s9338_s3 + $0x298] sm:$0xff]  ;;  %v2231_v5 = vld [vmem:[%s9338_s3 + $0x2a8] sm:$0xff] }
 0x335   : > { %5640 = vmatprep.subr.bf16.mxu1 %v9448_v8  ;;  %v2235_v10 = vld [vmem:[%s9338_s3 + $0x2c8] sm:$0xff]  ;;  %v2237_v13 = vld [vmem:[%s9338_s3 + $0x2d8] sm:$0xff] }
 0x337   : > { %2922 = vmatmul.mubr.f32.gmra.mrb[38].mxu1 %v8197_v58 }
 0x338   : > { %2926 = vmatprep.mubr.f32.mxu1 %v7927_v37  ;;  %5642 = vmatpush1.bf16.msra.mxu1 %v5641_v38  ;;  %v2222_v37 = vld [vmem:[%s9338_s3 + $0x260] sm:$0xff]  ;;  %v2227_v38 = vld [vmem:[%s9338_s3 + $0x288] sm:$0xff] }
 0x339   : > { %5643 = vmatprep.subr.bf16.mxu1 %v9448_v8 }
 0x33b   : > { %2927 = vmatmul.mubr.f32.gmra.mrb[40].mxu1 %v7916_v42  ;;  %v5650_v42 = vpack.c.bf16 %v2223_v63, %v2222_v37  ;;  %v2241_v37 = vld [vmem:[%s9338_s3 + $0x2f8] sm:$0xff]  ;;  %v2451_v63 = vld [vmem:[#allocation2 + $0x21] sm:$0xff] }
 0x33c   : > { %2931 = vmatprep.mubr.f32.mxu1 %v7934_v7  ;;  %5645 = vmatpush1.bf16.msra.mxu1 %v5644_v9  ;;  %v2224_v7 = vld [vmem:[%s9338_s3 + $0x270] sm:$0xff]  ;;  %v2233_v9 = vld [vmem:[%s9338_s3 + $0x2b8] sm:$0xff] }
 0x33d   : > { %5646 = vmatprep.subr.bf16.mxu1 %v9448_v8 }
 0x33f   : > { %2932 = vmatmul.mubr.f32.gmra.mrb[42].mxu1 %v7920_v3  ;;  %v5653_v3 = vpack.c.bf16 %v2225_v57, %v2224_v7  ;;  %v2249_v57 = vld [vmem:[%s9338_s3 + $0x338] sm:$0xff] }
 0x340   : > { %2936 = vmatprep.mubr.f32.mxu1 %v7943_v34  ;;  %5648 = vmatpush1.bf16.msra.mxu1 %v5647_v41  ;;  %v2226_v34 = vld [vmem:[%s9338_s3 + $0x280] sm:$0xff]  ;;  %v2239_v41 = vld [vmem:[%s9338_s3 + $0x2e8] sm:$0xff] }
 0x341   : > { %5649 = vmatprep.subr.bf16.mxu1 %v9448_v8 }
 0x343   : > { %2937 = vmatmul.mubr.f32.gmra.mrb[44].mxu1 %v7932_v1  ;;  %v5656_v1 = vpack.c.bf16 %v2227_v38, %v2226_v34  ;;  %v2485_v38 = vld [vmem:[#allocation2 + $0x3a] sm:$0xff] }
 0x344   : > { %2941 = vmatprep.mubr.f32.mxu1 %v7950_v26  ;;  %5651 = vmatpush1.bf16.msra.mxu1 %v5650_v42  ;;  %v2228_v26 = vld [vmem:[%s9338_s3 + $0x290] sm:$0xff] }
 0x345   : > { %5652 = vmatprep.subr.bf16.mxu1 %v9448_v8  ;;  %v2484_v42 = vld [vmem:[#allocation2 + $0x32] sm:$0xff] }
 0x347   : > { %2942 = vmatmul.mubr.f32.gmra.mrb[46].mxu1 %v7936_v4  ;;  %v5659_v4 = vpack.c.bf16 %v2229_v62, %v2228_v26  ;;  %v2250_v62 = vld [vmem:[%s9338_s3 + $0x340] sm:$0xff] }
 0x348   : > { %2946 = vmatprep.mubr.f32.mxu1 %v7959_v28  ;;  %5654 = vmatpush1.bf16.msra.mxu1 %v5653_v3  ;;  %v2230_v28 = vld [vmem:[%s9338_s3 + $0x2a0] sm:$0xff]  ;;  %v8390_v3 = vld [vmem:[#allocation2 + $0x31] sm:$0xff] }
 0x349   : > { %5655 = vmatprep.subr.bf16.mxu1 %v9448_v8 }
 0x34b   : > { %2947 = vmatmul.mubr.f32.gmra.mrb[48].mxu1 %v7948_v40  ;;  %v5662_v40 = vpack.c.bf16 %v2231_v5, %v2230_v28  ;;  %v8404_v28 = vld [vmem:[#allocation2 + $0x39] sm:$0xff]  ;;  %v2486_v5 = vld [vmem:[#allocation2 + $0x4a] sm:$0xff] }
 0x34c   : > { %2951 = vmatprep.mubr.f32.mxu1 %v7966_v43  ;;  %5657 = vmatpush1.bf16.msra.mxu1 %v5656_v1  ;;  %v2232_v43 = vld [vmem:[%s9338_s3 + $0x2b0] sm:$0xff] }
 0x34d   : > { %5658 = vmatprep.subr.bf16.mxu1 %v9448_v8 }
 0x34f   : > { %2952 = vmatmul.mubr.f32.gmra.mrb[50].mxu1 %v7952_v14  ;;  %v5665_v14 = vpack.c.bf16 %v2233_v9, %v2232_v43  ;;  %v2252_v43 = vld [vmem:[%s9338_s3 + $0x350] sm:$0xff]  ;;  %v2253_v9 = vld [vmem:[%s9338_s3 + $0x358] sm:$0xff] }
 0x350   : > { %2956 = vmatprep.mubr.f32.mxu1 %v7975_v45  ;;  %5660 = vmatpush1.bf16.msra.mxu1 %v5659_v4  ;;  %v2234_v45 = vld [vmem:[%s9338_s3 + $0x2c0] sm:$0xff]  ;;  %v2251_v4 = vld [vmem:[%s9338_s3 + $0x348] sm:$0xff] }
 0x351   : > { %5661 = vmatprep.subr.bf16.mxu1 %v9448_v8 }
 0x353   : > { %2957 = vmatmul.mubr.f32.gmra.mrb[52].mxu1 %v7964_v24  ;;  %v5668_v24 = vpack.c.bf16 %v2235_v10, %v2234_v45  ;;  %v2487_v10 = vld [vmem:[#allocation2 + $0x52] sm:$0xff] }
 0x354   : > { %2961 = vmatprep.mubr.f32.mxu1 %v7982_v48  ;;  %5663 = vmatpush1.bf16.msra.mxu1 %v5662_v40  ;;  %v2236_v48 = vld [vmem:[%s9338_s3 + $0x2d0] sm:$0xff]  ;;  %v5692_v40 = vpack.c.bf16 %v2251_v4, %v2250_v62  ;;  %v2262_v62 = vld [vmem:[%s9338_s3 + $0x3a0] sm:$0xff]  ;;  %v2263_v4 = vld [vmem:[%s9338_s3 + $0x3a8] sm:$0xff] }
 0x355   : > { %5664 = vmatprep.subr.bf16.mxu1 %v9448_v8 }
 0x357   : > { %2962 = vmatmul.mubr.f32.gmra.mrb[54].mxu1 %v7968_v29  ;;  %v5671_v29 = vpack.c.bf16 %v2237_v13, %v2236_v48  ;;  %v5695_v48 = vpack.c.bf16 %v2253_v9, %v2252_v43  ;;  %v2254_v13 = vld [vmem:[%s9338_s3 + $0x360] sm:$0xff]  ;;  %v5710_v43 = vpack.c.bf16 %v2263_v4, %v2262_v62  ;;  %v2264_v9 = vld [vmem:[%s9338_s3 + $0x3b0] sm:$0xff]  ;;  %v2271_v4 = vld [vmem:[%s9338_s3 + $0x3e8] sm:$0xff] }
 0x358   : > { %2966 = vmatprep.mubr.f32.mxu1 %v7991_v20  ;;  %5666 = vmatpush1.bf16.msra.mxu1 %v5665_v14  ;;  %v2238_v20 = vld [vmem:[%s9338_s3 + $0x2e0] sm:$0xff]  ;;  %v8414_v14 = vld [vmem:[#allocation2 + $0x49] sm:$0xff] }
 0x359   : > { %5667 = vmatprep.subr.bf16.mxu1 %v9448_v8  ;;  %v2270_v62 = vld [vmem:[%s9338_s3 + $0x3e0] sm:$0xff] }
 0x35b   : > { %2967 = vmatmul.mubr.f32.gmra.mrb[56].mxu1 %v7980_v12  ;;  %v5674_v12 = vpack.c.bf16 %v2239_v41, %v2238_v20  ;;  %v8428_v20 = vld [vmem:[#allocation2 + $0x51] sm:$0xff]  ;;  %v2488_v41 = vld [vmem:[#allocation2 + $0x62] sm:$0xff] }
 0x35c   : > { %2971 = vmatprep.mubr.f32.mxu1 %v7998_v33  ;;  %5669 = vmatpush1.bf16.msra.mxu1 %v5668_v24  ;;  %v2240_v33 = vld [vmem:[%s9338_s3 + $0x2f0] sm:$0xff] }
 0x35d   : > { %5670 = vmatprep.subr.bf16.mxu1 %v9448_v8 }
 0x35f   : > { %2972 = vmatmul.mubr.f32.gmra.mrb[58].mxu1 %v7984_v25  ;;  %v5677_v25 = vpack.c.bf16 %v2241_v37, %v2240_v33  ;;  %v2256_v33 = vld [vmem:[%s9338_s3 + $0x370] sm:$0xff]  ;;  %v2257_v37 = vld [vmem:[%s9338_s3 + $0x378] sm:$0xff] }
 0x360   : > { %2976 = vmatprep.mubr.f32.mxu1 %v8007_v32  ;;  %5672 = vmatpush1.bf16.msra.mxu1 %v5671_v29  ;;  %v9461_v32 = vld [vmem:[#allocation39_spill] sm:$0xff]  ;;  %v2255_v29 = vld [vmem:[%s9338_s3 + $0x368] sm:$0xff] }
 0x361   : > { %5673 = vmatprep.subr.bf16.mxu1 %v9448_v8 }
 0x363   : > { %2977 = vmatmul.mubr.f32.gmra.mrb[60].mxu1 %v7996_v19 }
 0x364   : > { %2981 = vmatprep.mubr.f32.mxu1 %v8014_v36  ;;  %5675 = vmatpush1.bf16.msra.mxu1 %v5674_v12  ;;  %v5698_v12 = vpack.c.bf16 %v2255_v29, %v2254_v13  ;;  %v2493_v29 = vld [vmem:[#allocation2 + $0x9a] sm:$0xff] }
 0x365   : > { %5676 = vmatprep.subr.bf16.mxu1 %v9448_v8 }
 0x367   : > { %2982 = vmatmul.mubr.f32.gmra.mrb[62].mxu1 %v8000_v15 }
 0x368   : > { %2986 = vmatprep.mubr.f32.mxu1 %v8023_v16  ;;  %5678 = vmatpush1.bf16.msra.mxu1 %v5677_v25  ;;  %v8346_v16 = vld [vmem:[#allocation2 + $0x180] sm:$0xff] }
 0x369   : > { %5679 = vmatprep.subr.bf16.mxu1 %v9448_v8  ;;  %v8438_v25 = vld [vmem:[#allocation2 + $0x61] sm:$0xff] }
 0x36b   : > { %2987 = vmatmul.mubr.f32.gmra.mrb[64].mxu1 %v8012_v22  ;;  %v9459_v22 = vld [vmem:[#allocation35_spill] sm:$0xff] }
 0x36c   : > { %2991 = vmatprep.mubr.f32.mxu1 %v8030_v2 }
 0x36f   : > { %2992 = vmatmul.mubr.f32.gmra.mrb[66].mxu1 %v8016_v30 }
 0x370   : > { %2996 = vmatprep.mubr.f32.mxu1 %v8039_v47 }
 0x373   : > { %2997 = vmatmul.mubr.f32.gmra.mrb[68].mxu1 %v8028_v60  ;;  %v9460_v60 = vld [vmem:[#allocation36_spill] sm:$0xff] }
 0x374   : > { %3001 = vmatprep.mubr.f32.mxu1 %v8046_v6  ;;  %v2242_v6 = vld [vmem:[%s9338_s3 + $0x300] sm:$0xff] }
 0x377   : > { %3002 = vmatmul.mubr.f32.gmra.mrb[70].mxu1 %v8032_v31  ;;  %v8352_v31 = vld [vmem:[#allocation2 + $0x188] sm:$0xff] }
 0x378   : > { %3006 = vmatprep.mubr.f32.mxu1 %v8055_v61  ;;  %v2243_v61 = vld [vmem:[%s9338_s3 + $0x308] sm:$0xff] }
 0x37b   : > { %3007 = vmatmul.mubr.f32.gmra.mrb[72].mxu1 %v8044_v54 }
 0x37c   : > { %3011 = vmatprep.mubr.f32.mxu1 %v8062_v18  ;;  %v9462_v18 = vld [vmem:[#allocation44_spill] sm:$0xff] }
 0x37f   : > { %3012 = vmatmul.mubr.f32.gmra.mrb[74].mxu1 %v8048_v0 }
 0x380   : > { %3016 = vmatprep.mubr.f32.mxu1 %v8071_v46  ;;  %v5680_v46 = vpack.c.bf16 %v2243_v61, %v2242_v6  ;;  %v2489_v61 = vld [vmem:[#allocation2 + $0x6a] sm:$0xff] }
 0x383   : > { %3017 = vmatmul.mubr.f32.gmra.mrb[76].mxu1 %v9459_v22 }
 0x384   : > { %3021 = vmatprep.mubr.f32.mxu1 %v8078_v55  ;;  %v2244_v55 = vld [vmem:[%s9338_s3 + $0x310] sm:$0xff] }
 0x387   : > { %3022 = vmatmul.mubr.f32.gmra.mrb[78].mxu1 %v8064_v23 }
 0x388   : > { %3026 = vmatprep.mubr.f32.mxu1 %v8089_v56  ;;  %v2450_v56 = vld [vmem:[#allocation2 + $0x19] sm:$0xff] }
 0x38b   : > { %3027 = vmatmul.mubr.f32.gmra.mrb[80].mxu1 %v8076_v49 }
 0x38c   : > { %3031 = vmatprep.mubr.f32.mxu1 %v8099_v51  ;;  %v2245_v51 = vld [vmem:[%s9338_s3 + $0x318] sm:$0xff] }
 0x38f   : > { %3032 = vmatmul.mubr.f32.gmra.mrb[82].mxu1 %v9460_v60 }
 0x390   : > { %3036 = vmatprep.mubr.f32.mxu1 %v8112_v50 }
 0x391   : > { %v8331_v19 = vpop.f32.mrb[64].mxu0 }
 0x392   : > { %v8334_v15 = vpop.f32.mrb[65].mxu0 }
 0x393   : > { %3037 = vmatmul.mubr.f32.gmra.mrb[84].mxu1 %v8097_v59 }
 0x394   : > { %3041 = vmatprep.mubr.f32.mxu1 %v8123_v27  ;;  %v5683_v27 = vpack.c.bf16 %v2245_v51, %v2244_v55  ;;  %v5701_v55 = vpack.c.bf16 %v2257_v37, %v2256_v33  ;;  %v2258_v51 = vld [vmem:[%s9338_s3 + $0x380] sm:$0xff]  ;;  %v2267_v37 = vld [vmem:[%s9338_s3 + $0x3c8] sm:$0xff] }
 0x395   : > { %v2266_v33 = vld [vmem:[%s9338_s3 + $0x3c0] sm:$0xff] }
 0x397   : > { %3042 = vmatmul.mubr.f32.gmra.mrb[86].mxu1 %v9461_v32 }
 0x398   : > { %3046 = vmatprep.mubr.f32.mxu1 %v8137_v39 }
 0x399   : > { %v8339_v36 = vpop.f32.mrb[66].mxu0 }
 0x39a   : > { %v8342_v30 = vpop.f32.mrb[67].mxu0 }
 0x39b   : > { %3047 = vmatmul.mubr.f32.gmra.mrb[88].mxu1 %v8121_v17 }
 0x39c   : > { %3051 = vmatprep.mubr.f32.mxu1 %v8155_v52  ;;  %v2246_v52 = vld [vmem:[%s9338_s3 + $0x320] sm:$0xff] }
 0x39f   : > { %3052 = vmatmul.mubr.f32.gmra.mrb[90].mxu1 %v8125_v35 }
 0x3a0   : > { %3056 = vmatprep.mubr.f32.mxu1 %v8346_v16 }
 0x3a1   : > { %v8349_v2 = vpop.f32.mrb[68].mxu0 }
 0x3a2   : > { %v8354_v47 = vpop.f32.mrb[69].mxu0 }
 0x3a3   : > { %3057 = vmatmul.mubr.f32.gmra.mrb[92].mxu1 %v8153_v44 }
 0x3a4   : > { %3061 = vmatprep.mubr.f32.mxu1 %v8352_v31 }
 0x3a7   : > { %3062 = vmatmul.mubr.f32.gmra.mrb[94].mxu1 %v9462_v18 }
 0x3a8   : > { %3131 = vmatprep.mubr.f32.mxu1 %v8186_v21  ;;  %v2247_v21 = vld [vmem:[%s9338_s3 + $0x328] sm:$0xff] }
 0x3a9   : > { %v8371_v39 = vpop.f32.mrb[70].mxu0  ;;  %v5686_v7 = vpack.c.bf16 %v2247_v21, %v2246_v52  ;;  %v2490_v52 = vld [vmem:[#allocation2 + $0x7a] sm:$0xff] }
 0x3aa   : > { %v8373_v50 = vpop.f32.mrb[71].mxu0 }
 0x3ab   : > { %3132 = vmatmul.mubr.f32.vlgmr.msra.gmra.mrb[32].mxu1 %v2450_v56  ;;  %v2259_v56 = vld [vmem:[%s9338_s3 + $0x388] sm:$0xff] }
 0x3ac   : > { %3136 = vmatprep.mubr.f32.mxu1 %v8197_v58  ;;  %5681 = vmatpush1.bf16.msra.mxu1 %v5680_v46  ;;  %v2248_v58 = vld [vmem:[%s9338_s3 + $0x330] sm:$0xff]  ;;  %v5704_v21 = vpack.c.bf16 %v2259_v56, %v2258_v51  ;;  %v5716_v51 = vpack.c.bf16 %v2267_v37, %v2266_v33 }
 0x3ad   : > { %5682 = vmatprep.subr.bf16.mxu1 %v9448_v8  ;;  %v5689_v26 = vpack.c.bf16 %v2249_v57, %v2248_v58  ;;  %v2491_v57 = vld [vmem:[#allocation2 + $0x82] sm:$0xff]  ;;  %v2268_v56 = vld [vmem:[%s9338_s3 + $0x3d0] sm:$0xff] }
 0x3ae   : > { %v2497_v37 = vld [vmem:[#allocation2 + $0xca] sm:$0xff] }
 0x3af   : > { %3137 = vmatmul.mubr.f32.gmra.mrb[34].mxu1 %v2451_v63  ;;  %v2260_v63 = vld [vmem:[%s9338_s3 + $0x390] sm:$0xff] }
 0x3b0   : > { %3141 = vmatprep.mubr.f32.mxu1 %v2484_v42  ;;  %5684 = vmatpush1.bf16.msra.mxu1 %v5683_v27  ;;  %v8452_v27 = vld [vmem:[#allocation2 + $0x69] sm:$0xff]  ;;  %v2261_v42 = vld [vmem:[%s9338_s3 + $0x398] sm:$0xff] }
 0x3b1   : > { %5685 = vmatprep.subr.bf16.mxu1 %v9448_v8  ;;  %v8392_v34 = vpop.f32.mrb[72].mxu0 }
 0x3b2   : > { %v8395_v1 = vpop.f32.mrb[73].mxu0 }
 0x3b3   : > { %3142 = vmatmul.mubr.f32.gmra.mrb[36].mxu1 %v8390_v3 }
 0x3b4   : > { %3146 = vmatprep.mubr.f32.mxu1 %v2485_v38  ;;  %5687 = vmatpush1.bf16.msra.mxu1 %v5686_v7  ;;  %v8462_v7 = vld [vmem:[#allocation2 + $0x79] sm:$0xff] }
 0x3b5   : > { %5688 = vmatprep.subr.bf16.mxu1 %v9448_v8 }
 0x3b7   : > { %3147 = vmatmul.mubr.f32.gmra.mrb[38].mxu1 %v8404_v28 }
 0x3b8   : > { %3151 = vmatprep.mubr.f32.mxu1 %v2486_v5  ;;  %5690 = vmatpush1.bf16.msra.mxu1 %v5689_v26  ;;  %v5707_v26 = vpack.c.bf16 %v2261_v42, %v2260_v63  ;;  %v8476_v5 = vld [vmem:[#allocation2 + $0x81] sm:$0xff]  ;;  %v2495_v42 = vld [vmem:[#allocation2 + $0xb2] sm:$0xff] }
 0x3b9   : > { %5691 = vmatprep.subr.bf16.mxu1 %v9448_v8  ;;  %v8416_v45 = vpop.f32.mrb[74].mxu0 }
 0x3ba   : > { %v8419_v24 = vpop.f32.mrb[75].mxu0 }
 0x3bb   : > { %3152 = vmatmul.mubr.f32.gmra.mrb[40].mxu1 %v8414_v14 }
 0x3bc   : > { %3156 = vmatprep.mubr.f32.mxu1 %v2487_v10  ;;  %5693 = vmatpush1.bf16.msra.mxu1 %v5692_v40  ;;  %v2492_v40 = vld [vmem:[#allocation2 + $0x92] sm:$0xff] }
 0x3bd   : > { %5694 = vmatprep.subr.bf16.mxu1 %v9448_v8  ;;  %v2265_v10 = vld [vmem:[%s9338_s3 + $0x3b8] sm:$0xff] }
 0x3bf   : > { %3157 = vmatmul.mubr.f32.gmra.mrb[42].mxu1 %v8428_v20 }
 0x3c0   : > { %3161 = vmatprep.mubr.f32.mxu1 %v2488_v41  ;;  %5696 = vmatpush1.bf16.msra.mxu1 %v5695_v48  ;;  %v8486_v48 = vld [vmem:[#allocation2 + $0x91] sm:$0xff] }
 0x3c1   : > { %5697 = vmatprep.subr.bf16.mxu1 %v9448_v8  ;;  %v8440_v6 = vpop.f32.mrb[76].mxu0 }
 0x3c2   : > { %v8443_v46 = vpop.f32.mrb[77].mxu0 }
 0x3c3   : > { %3162 = vmatmul.mubr.f32.gmra.mrb[44].mxu1 %v8438_v25 }
 0x3c4   : > { %3166 = vmatprep.mubr.f32.mxu1 %v2489_v61  ;;  %5699 = vmatpush1.bf16.msra.mxu1 %v5698_v12  ;;  %v5713_v12 = vpack.c.bf16 %v2265_v10, %v2264_v9  ;;  %v8500_v61 = vld [vmem:[#allocation2 + $0x99] sm:$0xff]  ;;  %v5722_v9 = vpack.c.bf16 %v2271_v4, %v2270_v62  ;;  %v2272_v10 = vld [vmem:[%s9338_s3 + $0x3f0] sm:$0xff]  ;;  %v2499_v62 = vld [vmem:[#allocation2 + $0xe2] sm:$0xff] }
 0x3c5   : > { %5700 = vmatprep.subr.bf16.mxu1 %v9448_v8 }
 0x3c7   : > { %3167 = vmatmul.mubr.f32.gmra.mrb[46].mxu1 %v8452_v27 }
 0x3c8   : > { %3171 = vmatprep.mubr.f32.mxu1 %v2490_v52  ;;  %5702 = vmatpush1.bf16.msra.mxu1 %v5701_v55  ;;  %v2494_v55 = vld [vmem:[#allocation2 + $0xaa] sm:$0xff]  ;;  %v2269_v52 = vld [vmem:[%s9338_s3 + $0x3d8] sm:$0xff] }
 0x3c9   : > { %5703 = vmatprep.subr.bf16.mxu1 %v9448_v8  ;;  %v8464_v58 = vpop.f32.mrb[78].mxu0 }
 0x3ca   : > { %v8467_v38 = vpop.f32.mrb[79].mxu0 }
 0x3cb   : > { %3172 = vmatmul.mubr.f32.gmra.mrb[48].mxu1 %v8462_v7 }
 0x3cc   : > { %3176 = vmatprep.mubr.f32.mxu1 %v2491_v57  ;;  %5705 = vmatpush1.bf16.msra.mxu1 %v5704_v21  ;;  %v8510_v21 = vld [vmem:[#allocation2 + $0xa9] sm:$0xff] }
 0x3cd   : > { %5706 = vmatprep.subr.bf16.mxu1 %v9448_v8 }
 0x3cf   : > { %3177 = vmatmul.mubr.f32.gmra.mrb[50].mxu1 %v8476_v5 }
 0x3d0   : > { %3181 = vmatprep.mubr.f32.mxu1 %v2492_v40  ;;  %5708 = vmatpush1.bf16.msra.mxu1 %v5707_v26  ;;  %v5719_v26 = vpack.c.bf16 %v2269_v52, %v2268_v56  ;;  %v8524_v40 = vld [vmem:[#allocation2 + $0xb1] sm:$0xff]  ;;  %v8542_v56 = vld [vmem:[#allocation2 + $0xc9] sm:$0xff]  ;;  %v2498_v52 = vld [vmem:[#allocation2 + $0xda] sm:$0xff] }
 0x3d1   : > { %5709 = vmatprep.subr.bf16.mxu1 %v9448_v8  ;;  %v8488_v13 = vpop.f32.mrb[80].mxu0 }
 0x3d2   : > { %v8491_v41 = vpop.f32.mrb[81].mxu0 }
 0x3d3   : > { %3182 = vmatmul.mubr.f32.gmra.mrb[52].mxu1 %v8486_v48 }
 0x3d4   : > { %3186 = vmatprep.mubr.f32.mxu1 %v2493_v29  ;;  %5711 = vmatpush1.bf16.msra.mxu1 %v5710_v43  ;;  %v2496_v43 = vld [vmem:[#allocation2 + $0xc2] sm:$0xff]  ;;  %v2273_v29 = vld [vmem:[%s9338_s3 + $0x3f8] sm:$0xff] }
 0x3d5   : > { %5712 = vmatprep.subr.bf16.mxu1 %v9448_v8 }
 0x3d7   : > { %3187 = vmatmul.mubr.f32.gmra.mrb[54].mxu1 %v8500_v61 }
 0x3d8   : > { %3191 = vmatprep.mubr.f32.mxu1 %v2494_v55  ;;  %5714 = vmatpush1.bf16.msra.mxu1 %v5713_v12  ;;  %v8534_v12 = vld [vmem:[#allocation2 + $0xc1] sm:$0xff] }
 0x3d9   : > { %5715 = vmatprep.subr.bf16.mxu1 %v9448_v8  ;;  %v8512_v63 = vpop.f32.mrb[82].mxu0 }
 0x3da   : > { %v8515_v57 = vpop.f32.mrb[83].mxu0 }
 0x3db   : > { %3192 = vmatmul.mubr.f32.gmra.mrb[56].mxu1 %v8510_v21 }
 0x3dc   : > { %3196 = vmatprep.mubr.f32.mxu1 %v2495_v42  ;;  %5717 = vmatpush1.bf16.msra.mxu1 %v5716_v51  ;;  %v5725_v51 = vpack.c.bf16 %v2273_v29, %v2272_v10  ;;  %v8545_v42 = vld [vmem:[#allocation2 + $0xd9] sm:$0xff] }
 0x3dd   : > { %5718 = vmatprep.subr.bf16.mxu1 %v9448_v8 }
 0x3df   : > { %3197 = vmatmul.mubr.f32.gmra.mrb[58].mxu1 %v8524_v40 }
 0x3e0   : > { %3201 = vmatprep.mubr.f32.mxu1 %v2496_v43  ;;  %5720 = vmatpush1.bf16.msra.mxu1 %v5719_v26  ;;  %v8552_v43 = vld [vmem:[#allocation2 + $0xe1] sm:$0xff] }
 0x3e1   : > { %5721 = vmatprep.subr.bf16.mxu1 %v9448_v8  ;;  %v8536_v33 = vpop.f32.mrb[84].mxu0 }
 0x3e2   : > { %v8539_v55 = vpop.f32.mrb[85].mxu0 }
 0x3e3   : > { %3202 = vmatmul.mubr.f32.gmra.mrb[60].mxu1 %v8534_v12 }
 0x3e4   : > { %3206 = vmatprep.mubr.f32.mxu1 %v2497_v37  ;;  %5723 = vmatpush1.bf16.msra.mxu1 %v5722_v9  ;;  %v8556_v9 = vld [vmem:[#allocation2 + $0xf1] sm:$0xff]  ;;  %v8564_v37 = vld [vmem:[#allocation2 + $0xf9] sm:$0xff] }
 0x3e5   : > { %5724 = vmatprep.subr.bf16.mxu1 %v9448_v8 }
 0x3e7   : > { %3207 = vmatmul.mubr.f32.gmra.mrb[62].mxu1 %v8542_v56 }
 0x3e8   : > { %3211 = vmatprep.mubr.f32.mxu1 %v2498_v52  ;;  %5726 = vmatpush1.bf16.msra.mxu1 %v5725_v51  ;;  %v8568_v51 = vld [vmem:[#allocation2 + $0x109] sm:$0xff] }
 0x3e9   : > { %v8547_v26 = vpop.f32.mrb[86].mxu0 }
 0x3ea   : > { %v8550_v4 = vpop.f32.mrb[87].mxu0 }
 0x3eb   : > { %3212 = vmatmul.mubr.f32.gmra.mrb[64].mxu1 %v8545_v42 }
 0x3ec   : > { %3216 = vmatprep.mubr.f32.mxu1 %v2499_v62  ;;  %v8576_v62 = vld [vmem:[#allocation2 + $0x111] sm:$0xff] }
 0x3ef   : > { %3217 = vmatmul.mubr.f32.gmra.mrb[66].mxu1 %v8552_v43 }
 0x3f0   : > { %3221 = vmatprep.mubr.f32.mxu1 %v8044_v54 }
 0x3f2   : > { %v8558_v10 = vpop.f32.mrb[88].mxu0 }
 0x3f3   : > { %9463 = vst [vmem:[#allocation35_spill] sm:$0xff] %v8558_v10  ;;  %3222 = vmatmul.mubr.f32.gmra.mrb[68].mxu1 %v8556_v9  ;;  %v8561_v29 = vpop.f32.mrb[89].mxu0 }
 0x3f4   : > { %9464 = vst [vmem:[#allocation36_spill] sm:$0xff] %v8561_v29  ;;  %3226 = vmatprep.mubr.f32.mxu1 %v8048_v0  ;;  %v8580_v0 = vld [vmem:[#allocation2 + $0x121] sm:$0xff] }
 0x3f5   : > { %v2609_v29 = vld [vmem:[#allocation2 + $0x1a2] sm:$0xff] }
 0x3f7   : > { %3227 = vmatmul.mubr.f32.gmra.mrb[70].mxu1 %v8564_v37 }
 0x3f8   : > { %3231 = vmatprep.mubr.f32.mxu1 %v9459_v22 }
 0x3f9   : > { %v8570_v52 = vpop.f32.mrb[90].mxu0 }
 0x3fa   : > { %9465 = vst [vmem:[#allocation39_spill] sm:$0xff] %v8570_v52  ;;  %v8573_v54 = vpop.f32.mrb[91].mxu0  ;;  %v8588_v52 = vld [vmem:[#allocation2 + $0x129] sm:$0xff] }
 0x3fb   : > { %3232 = vmatmul.mubr.f32.gmra.mrb[72].mxu1 %v8568_v51  ;;  %9466 = vst [vmem:[#allocation44_spill] sm:$0xff] %v8573_v54 }
 0x3fc   : > { %3236 = vmatprep.mubr.f32.mxu1 %v8064_v23  ;;  %v8592_v23 = vld [vmem:[#allocation2 + $0x139] sm:$0xff] }
 0x3ff   : > { %3237 = vmatmul.mubr.f32.gmra.mrb[74].mxu1 %v8576_v62 }
 0x400   : > { %3241 = vmatprep.mubr.f32.mxu1 %v8076_v49  ;;  %v8596_v49 = vld [vmem:[#allocation2 + $0x141] sm:$0xff] }
 0x401   : > { %v8582_v10 = vpop.f32.mrb[92].mxu0 }
 0x402   : > { %9467 = vst [vmem:[#allocation45_spill] sm:$0xff] %v8582_v10  ;;  %v8585_v22 = vpop.f32.mrb[93].mxu0  ;;  %v9469_v10 = vld [vmem:[#allocation37_spill] sm:$0xff] }
 0x403   : > { %3242 = vmatmul.mubr.f32.gmra.mrb[76].mxu1 %v8580_v0  ;;  %9468 = vst [vmem:[#allocation46_spill] sm:$0xff] %v8585_v22  ;;  %v9472_v22 = vld [vmem:[#allocation41_spill] sm:$0xff] }
 0x404   : > { %3246 = vmatprep.mubr.f32.mxu1 %v9460_v60  ;;  %v9470_v60 = vld [vmem:[#allocation38_spill] sm:$0xff] }
 0x407   : > { %3247 = vmatmul.mubr.f32.gmra.mrb[78].mxu1 %v8588_v52 }
 0x408   : > { %3251 = vmatprep.mubr.f32.mxu1 %v8097_v59  ;;  %v9471_v59 = vld [vmem:[#allocation40_spill] sm:$0xff] }
 0x40b   : > { %3252 = vmatmul.mubr.f32.gmra.mrb[80].mxu1 %v8592_v23 }
 0x40c   : > { %3256 = vmatprep.mubr.f32.mxu1 %v9461_v32  ;;  %v9473_v32 = vld [vmem:[#allocation42_spill] sm:$0xff] }
 0x40d   : > { %v9474_v54 = vmax.f32 %v9473_v32, 0.0  ;;  %v2515_v32 = vld [vmem:[#allocation2 + $0x38] sm:$0xff] }
 0x40f   : > { %3257 = vmatmul.mubr.f32.gmra.mrb[82].mxu1 %v8596_v49 }
 0x410   : > { %3261 = vmatprep.mubr.f32.mxu1 %v8121_v17  ;;  %v2608_v17 = vld [vmem:[#allocation2 + $0x19a] sm:$0xff] }
 0x411   : > { %5078 = vmatprep.mubr.f32.mxu0 %v2608_v17  ;;  %v3780_v17 = vld [vmem:[%s9340_s5 + $0x30] sm:$0xff] }
 0x412   : > { %5079 = vmatmul.mubr.f32.gmra.mrb[94].mxu0 %v2609_v29  ;;  %v3777_v29 = vld [vmem:[%s9340_s5 + $0x18] sm:$0xff] }
 0x413   : > { %3262 = vmatmul.mubr.f32.gmra.mrb[84].mxu1 %v9469_v10 }
 0x414   : > { %3266 = vmatprep.mubr.f32.mxu1 %v8125_v35  ;;  %v9475_v35 = vld [vmem:[#allocation43_spill] sm:$0xff] }
 0x415   : > { %v9476_v10 = vmax.f32 %v9475_v35, 0.0  ;;  %v3781_v35 = vld [vmem:[%s9340_s5 + $0x38] sm:$0xff] }
 0x417   : > { %3267 = vmatmul.mubr.f32.gmra.mrb[86].mxu1 %v9470_v60  ;;  %v3778_v60 = vld [vmem:[%s9340_s5 + $0x20] sm:$0xff] }
 0x418   : > { %3271 = vmatprep.mubr.f32.mxu1 %v8153_v44  ;;  %v3774_v44 = vld [vmem:[%s9340_s5] sm:$0xff] }
 0x41b   : > { %3272 = vmatmul.mubr.f32.gmra.mrb[88].mxu1 %v9471_v59  ;;  %v3779_v59 = vld [vmem:[%s9340_s5 + $0x28] sm:$0xff] }
 0x41c   : > { %3276 = vmatprep.mubr.f32.mxu1 %v9462_v18  ;;  %v3776_v18 = vld [vmem:[%s9340_s5 + $0x10] sm:$0xff] }
 0x41f   : > { %3277 = vmatmul.mubr.f32.gmra.mrb[90].mxu1 %v9472_v22  ;;  %v2514_v22 = vld [vmem:[#allocation2 + $0x30] sm:$0xff] }
 0x420   : > { %3281 = vmatprep.mubr.f32.mxu1 %v8176_v11  ;;  %v3775_v11 = vld [vmem:[%s9340_s5 + $0x8] sm:$0xff] }
 0x423   : > { %3282 = vmatmul.mubr.f32.gmra.mrb[92].mxu1 %v9474_v54  ;;  %v5763_v54 = vpack.c.bf16 %v3777_v29, %v3776_v18  ;;  %v3785_v29 = vld [vmem:[%s9340_s5 + $0x58] sm:$0xff] }
 0x424   : > { %3286 = vmatprep.mubr.f32.mxu1 %v8178_v53  ;;  %v5759_v53 = vpack.c.bf16 %v3775_v11, %v3774_v44  ;;  %v2516_v44 = vld [vmem:[#allocation2 + $0x48] sm:$0xff] }
 0x425   : > { %v3783_v11 = vld [vmem:[%s9340_s5 + $0x48] sm:$0xff] }
 0x426   : > { %5760 = vmatprep.subr.bf16.mxu1 %v5759_v53 }
 0x427   : > { %3287 = vmatmul.mubr.f32.gmra.mrb[94].mxu1 %v9476_v10  ;;  %v5771_v10 = vpack.c.bf16 %v3781_v35, %v3780_v17  ;;  %v2537_v17 = vld [vmem:[#allocation2 + $0x140] sm:$0xff]  ;;  %v2570_v35 = vld [vmem:[#allocation2 + $0x151] sm:$0xff] }
 0x428   : > { %3356 = vmatprep.mubr.f32.mxu1 %v8390_v3  ;;  %v5767_v3 = vpack.c.bf16 %v3779_v59, %v3778_v60  ;;  %v2520_v60 = vld [vmem:[#allocation2 + $0x78] sm:$0xff]  ;;  %v2521_v59 = vld [vmem:[#allocation2 + $0x80] sm:$0xff] }
 0x42b   : > { %3357 = vmatmul.mubr.f32.vlgmr.msra.gmra.mrb[32].mxu1 %v2514_v22  ;;  %v2518_v22 = vld [vmem:[#allocation2 + $0x60] sm:$0xff] }
 0x42c   : > { %3361 = vmatprep.mubr.f32.mxu1 %v8404_v28  ;;  %5762 = vmatpush3.bf16.msra.mxu1 %v5759_v53  ;;  %v3782_v28 = vld [vmem:[%s9340_s5 + $0x40] sm:$0xff]  ;;  %v2517_v53 = vld [vmem:[#allocation2 + $0x50] sm:$0xff] }
 0x42d   : > { %5764 = vmatprep.subr.bf16.mxu1 %v5763_v54  ;;  %v5775_v18 = vpack.c.bf16 %v3783_v11, %v3782_v28  ;;  %v2572_v28 = vld [vmem:[#allocation2 + $0x169] sm:$0xff] }
 0x42e   : > { %v2540_v11 = vld [vmem:[#allocation2 + $0x168] sm:$0xff] }
 0x42f   : > { %3362 = vmatmul.mubr.f32.gmra.mrb[34].mxu1 %v2515_v32  ;;  %v2536_v32 = vld [vmem:[#allocation2 + $0x138] sm:$0xff] }
 0x430   : > { %3366 = vmatprep.mubr.f32.mxu1 %v8414_v14  ;;  %5766 = vmatpush3.bf16.msra.mxu1 %v5763_v54  ;;  %v3784_v14 = vld [vmem:[%s9340_s5 + $0x50] sm:$0xff] }
 0x431   : > { %5768 = vmatprep.subr.bf16.mxu1 %v5767_v3  ;;  %v5779_v54 = vpack.c.bf16 %v3785_v29, %v3784_v14  ;;  %v2574_v14 = vld [vmem:[#allocation2 + $0x181] sm:$0xff]  ;;  %v2575_v29 = vld [vmem:[#allocation2 + $0x189] sm:$0xff] }
 0x433   : > { %3367 = vmatmul.mubr.f32.gmra.mrb[36].mxu1 %v2516_v44  ;;  %v2539_v44 = vld [vmem:[#allocation2 + $0x158] sm:$0xff] }
 0x434   : > { %3371 = vmatprep.mubr.f32.mxu1 %v8428_v20  ;;  %5770 = vmatpush3.bf16.msra.mxu1 %v5767_v3  ;;  %v2519_v20 = vld [vmem:[#allocation2 + $0x68] sm:$0xff] }
 0x435   : > { %5772 = vmatprep.subr.bf16.mxu1 %v5771_v10  ;;  %v2524_v3 = vld [vmem:[#allocation2 + $0xa8] sm:$0xff] }
 0x437   : > { %3372 = vmatmul.mubr.f32.gmra.mrb[38].mxu1 %v2517_v53  ;;  %v2541_v53 = vld [vmem:[#allocation2 + $0x170] sm:$0xff] }
 0x438   : > { %3376 = vmatprep.mubr.f32.mxu1 %v8438_v25  ;;  %5774 = vmatpush3.bf16.msra.mxu1 %v5771_v10  ;;  %v2522_v25 = vld [vmem:[#allocation2 + $0x90] sm:$0xff] }
 0x439   : > { %5776 = vmatprep.subr.bf16.mxu1 %v5775_v18  ;;  %v2538_v10 = vld [vmem:[#allocation2 + $0x150] sm:$0xff] }
 0x43b   : > { %3377 = vmatmul.mubr.f32.gmra.mrb[40].mxu1 %v2518_v22  ;;  %v2544_v22 = vld [vmem:[#allocation2 + $0x198] sm:$0xff] }
 0x43c   : > { %3381 = vmatprep.mubr.f32.mxu1 %v8452_v27  ;;  %5778 = vmatpush3.bf16.msra.mxu1 %v5775_v18  ;;  %v2523_v27 = vld [vmem:[#allocation2 + $0x98] sm:$0xff] }
 0x43d   : > { %5780 = vmatprep.subr.bf16.mxu1 %v5779_v54  ;;  %v2573_v18 = vld [vmem:[#allocation2 + $0x171] sm:$0xff] }
 0x43f   : > { %3382 = vmatmul.mubr.f32.gmra.mrb[42].mxu1 %v2519_v20  ;;  %v2577_v20 = vld [vmem:[#allocation2 + $0x1a1] sm:$0xff] }
 0x440   : > { %3386 = vmatprep.mubr.f32.mxu1 %v8462_v7  ;;  %5782 = vmatpush3.bf16.msra.mxu1 %v5779_v54  ;;  %v2525_v7 = vld [vmem:[#allocation2 + $0xb0] sm:$0xff]  ;;  %v2576_v54 = vld [vmem:[#allocation2 + $0x199] sm:$0xff] }
 0x443   : > { %3387 = vmatmul.mubr.f32.gmra.mrb[44].mxu1 %v2520_v60  ;;  %v8688_v60 = vld [vmem:[#allocation2 + $0x8] sm:$0xff] }
 0x444   : > { %3391 = vmatprep.mubr.f32.mxu1 %v8476_v5  ;;  %v2526_v5 = vld [vmem:[#allocation2 + $0xc0] sm:$0xff] }
 0x447   : > { %3392 = vmatmul.mubr.f32.gmra.mrb[46].mxu1 %v2521_v59 }
 0x448   : > { %3396 = vmatprep.mubr.f32.mxu1 %v8486_v48  ;;  %v2527_v48 = vld [vmem:[#allocation2 + $0xc8] sm:$0xff] }
 0x44b   : > { %3397 = vmatmul.mubr.f32.gmra.mrb[48].mxu1 %v2522_v25 }
 0x44c   : > { %3401 = vmatprep.mubr.f32.mxu1 %v8500_v61  ;;  %v2528_v61 = vld [vmem:[#allocation2 + $0xd8] sm:$0xff] }
 0x44f   : > { %3402 = vmatmul.mubr.f32.gmra.mrb[50].mxu1 %v2523_v27 }
 0x450   : > { %3406 = vmatprep.mubr.f32.mxu1 %v8510_v21  ;;  %v2529_v21 = vld [vmem:[#allocation2 + $0xe0] sm:$0xff] }
 0x453   : > { %3407 = vmatmul.mubr.f32.gmra.mrb[52].mxu1 %v2524_v3 }
 0x454   : > { %3411 = vmatprep.mubr.f32.mxu1 %v8524_v40  ;;  %v2530_v40 = vld [vmem:[#allocation2 + $0xf0] sm:$0xff] }
 0x457   : > { %3412 = vmatmul.mubr.f32.gmra.mrb[54].mxu1 %v2525_v7 }
 0x458   : > { %3416 = vmatprep.mubr.f32.mxu1 %v8534_v12  ;;  %v2531_v12 = vld [vmem:[#allocation2 + $0xf8] sm:$0xff] }
 0x45b   : > { %3417 = vmatmul.mubr.f32.gmra.mrb[56].mxu1 %v2526_v5  ;;  %v3790_v5 = vld [vmem:[%s9342_s7] sm:$0xff] }
 0x45c   : > { %3421 = vmatprep.mubr.f32.mxu1 %v8542_v56  ;;  %v2532_v56 = vld [vmem:[#allocation2 + $0x108] sm:$0xff] }
 0x45f   : > { %3422 = vmatmul.mubr.f32.gmra.mrb[58].mxu1 %v2527_v48  ;;  %v3791_v48 = vld [vmem:[%s9342_s7 + $0x8] sm:$0xff] }
 0x460   : > { %3426 = vmatprep.mubr.f32.mxu1 %v8545_v42  ;;  %v2533_v42 = vld [vmem:[#allocation2 + $0x110] sm:$0xff] }
 0x463   : > { %3427 = vmatmul.mubr.f32.gmra.mrb[60].mxu1 %v2528_v61  ;;  %v3792_v61 = vld [vmem:[%s9342_s7 + $0x10] sm:$0xff] }
 0x464   : > { %3431 = vmatprep.mubr.f32.mxu1 %v8552_v43  ;;  %v2534_v43 = vld [vmem:[#allocation2 + $0x120] sm:$0xff] }
 0x467   : > { %3432 = vmatmul.mubr.f32.gmra.mrb[62].mxu1 %v2529_v21 }
 0x468   : > { %3436 = vmatprep.mubr.f32.mxu1 %v8556_v9  ;;  %v2535_v9 = vld [vmem:[#allocation2 + $0x128] sm:$0xff] }
 0x46b   : > { %3437 = vmatmul.mubr.f32.gmra.mrb[64].mxu1 %v2530_v40  ;;  %v5791_v40 = vpack.c.bf16 %v3791_v48, %v3790_v5  ;;  %v3800_v5 = vld [vmem:[%s9342_s7 + $0x50] sm:$0xff] }
 0x46c   : > { %3441 = vmatprep.mubr.f32.mxu1 %v8564_v37  ;;  %v3786_v37 = vld [vmem:[%s9340_s5 + $0x60] sm:$0xff] }
 0x46d   : > { %5792 = vmatprep.subr.bf16.mxu0 %v5791_v40 }
 0x46e   : > { %5794 = vmatpush3.bf16.msra.mxu0 %v5791_v40 }
 0x46f   : > { %3442 = vmatmul.mubr.f32.gmra.mrb[66].mxu1 %v2531_v12  ;;  %v3793_v12 = vld [vmem:[%s9342_s7 + $0x18] sm:$0xff] }
 0x470   : > { %3446 = vmatprep.mubr.f32.mxu1 %v8568_v51  ;;  %v3787_v51 = vld [vmem:[%s9340_s5 + $0x68] sm:$0xff] }
 0x473   : > { %3447 = vmatmul.mubr.f32.gmra.mrb[68].mxu1 %v2532_v56 }
 0x474   : > { %3451 = vmatprep.mubr.f32.mxu1 %v8576_v62  ;;  %v5783_v62 = vpack.c.bf16 %v3787_v51, %v3786_v37  ;;  %v3794_v37 = vld [vmem:[%s9342_s7 + $0x20] sm:$0xff]  ;;  %v3795_v51 = vld [vmem:[%s9342_s7 + $0x28] sm:$0xff] }
 0x476   : > { %5784 = vmatprep.subr.bf16.mxu1 %v5783_v62 }
 0x477   : > { %3452 = vmatmul.mubr.f32.gmra.mrb[70].mxu1 %v2533_v42  ;;  %v9477_v42 = vld [vmem:[#allocation3_spill] sm:$0xff] }
 0x478   : > { %3456 = vmatprep.mubr.f32.mxu1 %v8580_v0  ;;  %5786 = vmatpush3.bf16.msra.mxu1 %v5783_v62  ;;  %v3789_v0 = vld [vmem:[%s9340_s5 + $0x78] sm:$0xff] }
 0x47b   : > { %3457 = vmatmul.mubr.f32.gmra.mrb[72].mxu1 %v2534_v43 }
 0x47c   : > { %3461 = vmatprep.mubr.f32.mxu1 %v8588_v52  ;;  %v3788_v52 = vld [vmem:[%s9340_s5 + $0x70] sm:$0xff] }
 0x47f   : > { %3462 = vmatmul.mubr.f32.gmra.mrb[74].mxu1 %v2535_v9  ;;  %v5795_v9 = vpack.c.bf16 %v3793_v12, %v3792_v61 }
 0x480   : > { %3466 = vmatprep.mubr.f32.mxu1 %v8592_v23  ;;  %v5787_v23 = vpack.c.bf16 %v3789_v0, %v3788_v52  ;;  %v5799_v52 = vpack.c.bf16 %v3795_v51, %v3794_v37  ;;  %v9478_v0 = vld [vmem:[#allocation4_spill] sm:$0xff] }
 0x481   : > { %5796 = vmatprep.subr.bf16.mxu0 %v5795_v9 }
 0x482   : > { %5788 = vmatprep.subr.bf16.mxu1 %v5787_v23  ;;  %5798 = vmatpush3.bf16.msra.mxu0 %v5795_v9 }
 0x483   : > { %3467 = vmatmul.mubr.f32.gmra.mrb[76].mxu1 %v2536_v32  ;;  %5800 = vmatprep.subr.bf16.mxu0 %v5799_v52 }
 0x484   : > { %3471 = vmatprep.mubr.f32.mxu1 %v8596_v49  ;;  %5790 = vmatpush3.bf16.msra.mxu1 %v5787_v23  ;;  %v2571_v49 = vld [vmem:[#allocation2 + $0x159] sm:$0xff] }
 0x485   : > { %5823 = vmatprep.subr.bf16.mxu1 %v9448_v8 }
 0x486   : > { %5802 = vmatpush3.bf16.msra.mxu0 %v5799_v52  ;;  %v9482_v52 = vld [vmem:[#allocation8_spill] sm:$0xff] }
 0x487   : > { %3472 = vmatmul.mubr.f32.gmra.mrb[78].mxu1 %v2537_v17 }
 0x488   : > { %3476 = vmatprep.mubr.f32.mxu1 %v2570_v35 }
 0x48b   : > { %3477 = vmatmul.mubr.f32.gmra.mrb[80].mxu1 %v2538_v10  ;;  %v3796_v10 = vld [vmem:[%s9342_s7 + $0x30] sm:$0xff] }
 0x48c   : > { %3481 = vmatprep.mubr.f32.mxu1 %v2571_v49 }
 0x48f   : > { %3482 = vmatmul.mubr.f32.gmra.mrb[82].mxu1 %v2539_v44 }
 0x490   : > { %3486 = vmatprep.mubr.f32.mxu1 %v2572_v28 }
 0x493   : > { %3487 = vmatmul.mubr.f32.gmra.mrb[84].mxu1 %v2540_v11 }
 0x494   : > { %3491 = vmatprep.mubr.f32.mxu1 %v2573_v18 }
 0x497   : > { %3492 = vmatmul.mubr.f32.gmra.mrb[86].mxu1 %v2541_v53  ;;  %v9479_v53 = vld [vmem:[#allocation5_spill] sm:$0xff] }
 0x498   : > { %3496 = vmatprep.mubr.f32.mxu1 %v2574_v14 }
 0x49b   : > { %3497 = vmatmul.mubr.f32.gmra.mrb[88].mxu1 %v8346_v16  ;;  %v8698_v16 = vld [vmem:[%s9339_s4] ss:$0 sm:$0xff] }
 0x49c   : > { %3501 = vmatprep.mubr.f32.mxu1 %v2575_v29  ;;  %v3798_v29 = vld [vmem:[%s9342_s7 + $0x40] sm:$0xff] }
 0x49f   : > { %3502 = vmatmul.mubr.f32.gmra.mrb[90].mxu1 %v8352_v31 }
 0x4a0   : > { %3506 = vmatprep.mubr.f32.mxu1 %v2576_v54 }
 0x4a3   : > { %3507 = vmatmul.mubr.f32.gmra.mrb[92].mxu1 %v2544_v22 }
 0x4a4   : > { %3511 = vmatprep.mubr.f32.mxu1 %v2577_v20 }
 0x4a7   : > { %3512 = vmatmul.mubr.f32.gmra.mrb[94].mxu1 %v8688_v60 }
 0x4e5   : > { %v8691_v59 = vpop.f32.mrb[94].mxu0 }
 0x4e6   : > { %v8693_v25 = vpop.f32.mrb[95].mxu0 }
 0x4fe   : > { %v3358_v27 = vpop.f32.mrb[32].mxu1 }
 0x4ff   : > { %v5903_v31 = vadd.f32 %v8698_v16, %v3358_v27  ;;  %v3360_v3 = vpop.f32.mrb[33].mxu1 }
 0x500   : > { %v9480_v3 = vld [vmem:[#allocation6_spill] sm:$0xff] }
 0x501   : > { %v3584_v7 = vadd.f32 %v5903_v31, %v8334_v15 }
 0x502   : > { %v3363_v21 = vpop.f32.mrb[34].mxu1 }
 0x503   : > { %v5904_v15 = vadd.f32 %v8698_v16, %v3363_v21  ;;  %v3365_v56 = vpop.f32.mrb[35].mxu1  ;;  %v8716_v43 = vadd.f32 %v9477_v42, %v3584_v7  ;;  %v3802_v42 = vld [vmem:[%s9342_s7 + $0x60] sm:$0xff] }
 0x505   : > { %v3589_v62 = vadd.f32 %v5904_v15, %v8331_v19  ;;  %5113 = vmatprep.mubr.f32.mxu1 %v8716_v43  ;;  %v3797_v19 = vld [vmem:[%s9342_s7 + $0x38] sm:$0xff]  ;;  %v9481_v15 = vld [vmem:[#allocation7_spill] sm:$0xff] }
 0x506   : > { %v3368_v32 = vpop.f32.mrb[36].mxu1  ;;  %v5803_v28 = vpack.c.bf16 %v3797_v19, %v3796_v10  ;;  %v9483_v19 = vld [vmem:[#allocation9_spill] sm:$0xff] }
 0x507   : > { %v8727_v23 = vadd.f32 %v9478_v0, %v3589_v62  ;;  %v5905_v17 = vadd.f32 %v8698_v16, %v3368_v32  ;;  %v3370_v35 = vpop.f32.mrb[37].mxu1 }
 0x508   : > { %5804 = vmatprep.subr.bf16.mxu0 %v5803_v28 }
 0x509   : > { %v3594_v49 = vadd.f32 %v5905_v17, %v8342_v30  ;;  %5114 = vmatmul.mubr.f32.vlgmr.msra.gmra.mrb[96].mxu1 %v8727_v23  ;;  %v3799_v30 = vld [vmem:[%s9342_s7 + $0x48] sm:$0xff]  ;;  %5806 = vmatpush3.bf16.msra.mxu0 %v5803_v28 }
 0x50a   : > { %v3373_v44 = vpop.f32.mrb[38].mxu1  ;;  %v5807_v20 = vpack.c.bf16 %v3799_v30, %v3798_v29 }
 0x50b   : > { %v5906_v11 = vadd.f32 %v8698_v16, %v3373_v44  ;;  %v3375_v18 = vpop.f32.mrb[39].mxu1  ;;  %v8740_v14 = vadd.f32 %v9479_v53, %v3594_v49 }
 0x50c   : > { %5808 = vmatprep.subr.bf16.mxu0 %v5807_v20  ;;  %v9484_v18 = vld [vmem:[#allocation10_spill] sm:$0xff] }
 0x50d   : > { %v3599_v54 = vadd.f32 %v5906_v11, %v8339_v36  ;;  %5116 = vmatprep.mubr.f32.mxu1 %v8740_v14  ;;  %v3801_v36 = vld [vmem:[%s9342_s7 + $0x58] sm:$0xff]  ;;  %5810 = vmatpush3.bf16.msra.mxu0 %v5807_v20  ;;  %v9485_v20 = vld [vmem:[#allocation11_spill] sm:$0xff] }
 0x50e   : > { %v3378_v22 = vpop.f32.mrb[40].mxu1  ;;  %v5811_v21 = vpack.c.bf16 %v3801_v36, %v3800_v5  ;;  %v9486_v36 = vld [vmem:[#allocation12_spill] sm:$0xff] }
 0x50f   : > { %v5907_v27 = vadd.f32 %v8698_v16, %v3378_v22  ;;  %v3380_v31 = vpop.f32.mrb[41].mxu1  ;;  %v8752_v7 = vadd.f32 %v9480_v3, %v3599_v54 }
 0x510   : > { %5812 = vmatprep.subr.bf16.mxu0 %v5811_v21 }
 0x511   : > { %v3604_v48 = vadd.f32 %v5907_v27, %v8354_v47  ;;  %5117 = vmatmul.mubr.f32.gmra.mrb[98].mxu1 %v8752_v7  ;;  %v3803_v47 = vld [vmem:[%s9342_s7 + $0x68] sm:$0xff]  ;;  %5814 = vmatpush3.bf16.msra.mxu0 %v5811_v21 }
 0x512   : > { %v3383_v61 = vpop.f32.mrb[42].mxu1  ;;  %v5815_v51 = vpack.c.bf16 %v3803_v47, %v3802_v42 }
 0x513   : > { %v5908_v40 = vadd.f32 %v8698_v16, %v3383_v61  ;;  %v3385_v12 = vpop.f32.mrb[43].mxu1  ;;  %v8764_v56 = vadd.f32 %v9481_v15, %v3604_v48 }
 0x514   : > { %5816 = vmatprep.subr.bf16.mxu0 %v5815_v51  ;;  %v9487_v12 = vld [vmem:[#allocation13_spill] sm:$0xff] }
 0x515   : > { %v3609_v9 = vadd.f32 %v5908_v40, %v8349_v2  ;;  %5119 = vmatprep.mubr.f32.mxu1 %v8764_v56  ;;  %5818 = vmatpush3.bf16.msra.mxu0 %v5815_v51 }
 0x516   : > { %v3388_v37 = vpop.f32.mrb[44].mxu1 }
 0x517   : > { %v5909_v62 = vadd.f32 %v8698_v16, %v3388_v37  ;;  %v3390_v32 = vpop.f32.mrb[45].mxu1  ;;  %v8776_v0 = vadd.f32 %v9482_v52, %v3609_v9  ;;  %v9488_v37 = vld [vmem:[#allocation14_spill] sm:$0xff] }
 0x519   : > { %v3614_v17 = vadd.f32 %v5909_v62, %v8373_v50  ;;  %5120 = vmatmul.mubr.f32.gmra.mrb[100].mxu1 %v8776_v0 }
 0x51a   : > { %v3393_v35 = vpop.f32.mrb[46].mxu1 }
 0x51b   : > { %v5910_v2 = vadd.f32 %v8698_v16, %v3393_v35  ;;  %v3395_v10 = vpop.f32.mrb[47].mxu1  ;;  %v8782_v49 = vadd.f32 %v9483_v19, %v3614_v17  ;;  %v9489_v17 = vld [vmem:[#allocation15_spill] sm:$0xff] }
 0x51d   : > { %v3619_v44 = vadd.f32 %v5910_v2, %v8371_v39  ;;  %5122 = vmatprep.mubr.f32.mxu1 %v8782_v49 }
 0x51e   : > { %v3398_v28 = vpop.f32.mrb[48].mxu1 }
 0x51f   : > { %v5911_v11 = vadd.f32 %v8698_v16, %v3398_v28  ;;  %v3400_v50 = vpop.f32.mrb[49].mxu1  ;;  %v8788_v53 = vadd.f32 %v9484_v18, %v3619_v44  ;;  %v9490_v44 = vld [vmem:[#allocation16_spill] sm:$0xff] }
 0x521   : > { %v3624_v29 = vadd.f32 %v5911_v11, %v8395_v1  ;;  %5123 = vmatmul.mubr.f32.gmra.mrb[102].mxu1 %v8788_v53 }
 0x522   : > { %v3403_v30 = vpop.f32.mrb[50].mxu1 }
 0x523   : > { %v5912_v54 = vadd.f32 %v8698_v16, %v3403_v30  ;;  %v3405_v22 = vpop.f32.mrb[51].mxu1  ;;  %v8794_v39 = vadd.f32 %v9485_v20, %v3624_v29  ;;  %v9491_v29 = vld [vmem:[#allocation17_spill] sm:$0xff] }
 0x525   : > { %v3629_v27 = vadd.f32 %v5912_v54, %v8392_v34  ;;  %5125 = vmatprep.mubr.f32.mxu1 %v8794_v39 }
 0x526   : > { %v3408_v31 = vpop.f32.mrb[52].mxu1 }
 0x527   : > { %v5913_v3 = vadd.f32 %v8698_v16, %v3408_v31  ;;  %v3410_v5 = vpop.f32.mrb[53].mxu1  ;;  %v8800_v48 = vadd.f32 %v9486_v36, %v3629_v27  ;;  %v9492_v27 = vld [vmem:[#allocation18_spill] sm:$0xff] }
 0x529   : > { %v3634_v1 = vadd.f32 %v5913_v3, %v8419_v24  ;;  %5126 = vmatmul.mubr.f32.gmra.mrb[104].mxu1 %v8800_v48 }
 0x52a   : > { %v3413_v61 = vpop.f32.mrb[54].mxu1 }
 0x52b   : > { %v5914_v21 = vadd.f32 %v8698_v16, %v3413_v61  ;;  %v3415_v40 = vpop.f32.mrb[55].mxu1  ;;  %v8806_v15 = vadd.f32 %v9487_v12, %v3634_v1  ;;  %v9493_v1 = vld [vmem:[#allocation19_spill] sm:$0xff] }
 0x52d   : > { %v3639_v34 = vadd.f32 %v5914_v21, %v8416_v45  ;;  %5128 = vmatprep.mubr.f32.mxu1 %v8806_v15 }
 0x52e   : > { %v3418_v42 = vpop.f32.mrb[56].mxu1 }
 0x52f   : > { %v5915_v47 = vadd.f32 %v8698_v16, %v3418_v42  ;;  %v3420_v9 = vpop.f32.mrb[57].mxu1  ;;  %v8812_v51 = vadd.f32 %v9488_v37, %v3639_v34  ;;  %v9495_v34 = vld [vmem:[#allocation20_spill] sm:$0xff] }
 0x531   : > { %v3644_v24 = vadd.f32 %v5915_v47, %v8443_v46  ;;  %5129 = vmatmul.mubr.f32.gmra.mrb[106].mxu1 %v8812_v51 }
 0x532   : > { %v3423_v62 = vpop.f32.mrb[58].mxu1 }
 0x533   : > { %v5916_v32 = vadd.f32 %v8698_v16, %v3423_v62  ;;  %v3425_v52 = vpop.f32.mrb[59].mxu1  ;;  %v8818_v35 = vadd.f32 %v9489_v17, %v3644_v24  ;;  %v9497_v24 = vld [vmem:[#allocation21_spill] sm:$0xff] }
 0x535   : > { %v3649_v45 = vadd.f32 %v5916_v32, %v8440_v6  ;;  %5131 = vmatprep.mubr.f32.mxu1 %v8818_v35 }
 0x536   : > { %v3428_v2 = vpop.f32.mrb[60].mxu1 }
 0x537   : > { %v5917_v10 = vadd.f32 %v8698_v16, %v3428_v2  ;;  %v3430_v19 = vpop.f32.mrb[61].mxu1  ;;  %v8824_v28 = vadd.f32 %v9490_v44, %v3649_v45  ;;  %v9499_v45 = vld [vmem:[#allocation22_spill] sm:$0xff] }
 0x539   : > { %v3654_v46 = vadd.f32 %v5917_v10, %v8467_v38  ;;  %5132 = vmatmul.mubr.f32.gmra.mrb[108].mxu1 %v8824_v28 }
 0x53a   : > { %v3433_v11 = vpop.f32.mrb[62].mxu1 }
 0x53b   : > { %v5918_v50 = vadd.f32 %v8698_v16, %v3433_v11  ;;  %v3435_v18 = vpop.f32.mrb[63].mxu1  ;;  %v8830_v30 = vadd.f32 %v9491_v29, %v3654_v46  ;;  %v9501_v46 = vld [vmem:[#allocation23_spill] sm:$0xff] }
 0x53d   : > { %v3659_v6 = vadd.f32 %v5918_v50, %v8464_v58  ;;  %5134 = vmatprep.mubr.f32.mxu1 %v8830_v30 }
 0x53e   : > { %v3438_v54 = vpop.f32.mrb[64].mxu1 }
 0x53f   : > { %v5919_v22 = vadd.f32 %v8698_v16, %v3438_v54  ;;  %v3440_v20 = vpop.f32.mrb[65].mxu1  ;;  %v8836_v31 = vadd.f32 %v9492_v27, %v3659_v6  ;;  %v9503_v6 = vld [vmem:[#allocation24_spill] sm:$0xff] }
 0x541   : > { %v3664_v38 = vadd.f32 %v5919_v22, %v8491_v41  ;;  %5135 = vmatmul.mubr.f32.gmra.mrb[110].mxu1 %v8836_v31 }
 0x542   : > { %v3443_v3 = vpop.f32.mrb[66].mxu1 }
 0x543   : > { %v5920_v5 = vadd.f32 %v8698_v16, %v3443_v3  ;;  %v3445_v36 = vpop.f32.mrb[67].mxu1  ;;  %v8842_v61 = vadd.f32 %v9493_v1, %v3664_v38  ;;  %v9505_v38 = vld [vmem:[#allocation25_spill] sm:$0xff] }
 0x544   : > { %v3804_v36 = vld [vmem:[%s9342_s7 + $0x70] sm:$0xff] }
 0x545   : > { %9494 = vst [vmem:[#allocation37_spill] sm:$0xff] %v8842_v61  ;;  %v3669_v58 = vadd.f32 %v5920_v5, %v8488_v13  ;;  %5137 = vmatprep.mubr.f32.mxu1 %v8842_v61 }
 0x546   : > { %v3448_v21 = vpop.f32.mrb[68].mxu1 }
 0x547   : > { %v5921_v40 = vadd.f32 %v8698_v16, %v3448_v21  ;;  %v3450_v12 = vpop.f32.mrb[69].mxu1  ;;  %v8848_v42 = vadd.f32 %v9495_v34, %v3669_v58  ;;  %v9507_v21 = vld [vmem:[#allocation26_spill] sm:$0xff]  ;;  %v9509_v34 = vld [vmem:[#allocation36_spill] sm:$0xff] }
 0x549   : > { %9496 = vst [vmem:[#allocation38_spill] sm:$0xff] %v8848_v42  ;;  %v3674_v41 = vadd.f32 %v5921_v40, %v8515_v57  ;;  %5138 = vmatmul.mubr.f32.gmra.mrb[112].mxu1 %v8848_v42 }
 0x54a   : > { %v3453_v47 = vpop.f32.mrb[70].mxu1 }
 0x54b   : > { %v5922_v9 = vadd.f32 %v8698_v16, %v3453_v47  ;;  %v3455_v37 = vpop.f32.mrb[71].mxu1  ;;  %v8854_v62 = vadd.f32 %v9497_v24, %v3674_v41 }
 0x54c   : > { %v9510_v37 = vld [vmem:[#allocation27_spill] sm:$0xff] }
 0x54d   : > { %9498 = vst [vmem:[#allocation40_spill] sm:$0xff] %v8854_v62  ;;  %v3679_v13 = vadd.f32 %v5922_v9, %v8512_v63  ;;  %5140 = vmatprep.mubr.f32.mxu1 %v8854_v62 }
 0x54e   : > { %v3458_v32 = vpop.f32.mrb[72].mxu1 }
 0x54f   : > { %v5923_v52 = vadd.f32 %v8698_v16, %v3458_v32  ;;  %v3460_v17 = vpop.f32.mrb[73].mxu1  ;;  %v8860_v2 = vadd.f32 %v9499_v45, %v3679_v13  ;;  %v9512_v13 = vld [vmem:[#allocation35_spill] sm:$0xff] }
 0x551   : > { %9500 = vst [vmem:[#allocation41_spill] sm:$0xff] %v8860_v2  ;;  %v3684_v57 = vadd.f32 %v5923_v52, %v8539_v55  ;;  %5141 = vmatmul.mubr.f32.gmra.mrb[114].mxu1 %v8860_v2 }
 0x552   : > { %v3463_v10 = vpop.f32.mrb[74].mxu1 }
 0x553   : > { %v5924_v19 = vadd.f32 %v8698_v16, %v3463_v10  ;;  %v3465_v44 = vpop.f32.mrb[75].mxu1  ;;  %v8866_v11 = vadd.f32 %v9501_v46, %v3684_v57  ;;  %v9513_v57 = vld [vmem:[#allocation28_spill] sm:$0xff] }
 0x555   : > { %9502 = vst [vmem:[#allocation42_spill] sm:$0xff] %v8866_v11  ;;  %v3689_v63 = vadd.f32 %v5924_v19, %v8536_v33  ;;  %5143 = vmatprep.mubr.f32.mxu1 %v8866_v11  ;;  %v9515_v19 = vld [vmem:[#allocation44_spill] sm:$0xff] }
 0x556   : > { %v3468_v50 = vpop.f32.mrb[76].mxu1 }
 0x557   : > { %v5925_v18 = vadd.f32 %v8698_v16, %v3468_v50  ;;  %v3470_v29 = vpop.f32.mrb[77].mxu1  ;;  %v8872_v54 = vadd.f32 %v9503_v6, %v3689_v63  ;;  %v9518_v6 = vld [vmem:[#allocation39_spill] sm:$0xff] }
 0x559   : > { %9504 = vst [vmem:[#allocation43_spill] sm:$0xff] %v8872_v54  ;;  %v3694_v55 = vadd.f32 %v5925_v18, %v8550_v4  ;;  %5144 = vmatmul.mubr.f32.gmra.mrb[116].mxu1 %v8872_v54  ;;  %v3805_v4 = vld [vmem:[%s9342_s7 + $0x78] sm:$0xff]  ;;  %v9516_v18 = vld [vmem:[#allocation29_spill] sm:$0xff] }
 0x55a   : > { %v3473_v22 = vpop.f32.mrb[78].mxu1  ;;  %v5819_v12 = vpack.c.bf16 %v3805_v4, %v3804_v36 }
 0x55b   : > { %v5926_v20 = vadd.f32 %v8698_v16, %v3473_v22  ;;  %v3475_v27 = vpop.f32.mrb[79].mxu1  ;;  %v8878_v3 = vadd.f32 %v9505_v38, %v3694_v55  ;;  %v9519_v38 = vld [vmem:[#allocation30_spill] sm:$0xff] }
 0x55c   : > { %5820 = vmatprep.subr.bf16.mxu0 %v5819_v12 }
 0x55d   : > { %9506 = vst [vmem:[#allocation3_spill] sm:$0xff] %v8878_v3  ;;  %v3699_v33 = vadd.f32 %v5926_v20, %v8547_v26  ;;  %5146 = vmatprep.mubr.f32.mxu1 %v8878_v3  ;;  %5822 = vmatpush3.bf16.msra.mxu0 %v5819_v12 }
 0x55e   : > { %v3478_v5 = vpop.f32.mrb[80].mxu1  ;;  %5847 = vmatprep.subr.bf16.mxu0 %v9448_v8 }
 0x55f   : > { %v5927_v1 = vadd.f32 %v8698_v16, %v3478_v5  ;;  %v3480_v58 = vpop.f32.mrb[81].mxu1  ;;  %v8890_v40 = vadd.f32 %v9507_v21, %v3699_v33  ;;  %v9521_v5 = vld [vmem:[#allocation46_spill] sm:$0xff]  ;;  %v9522_v21 = vld [vmem:[#allocation31_spill] sm:$0xff] }
 0x561   : > { %9508 = vst [vmem:[#allocation4_spill] sm:$0xff] %v8890_v40  ;;  %v3704_v26 = vadd.f32 %v5927_v1, %v9509_v34  ;;  %5147 = vmatmul.mubr.f32.gmra.mrb[118].mxu1 %v8890_v40  ;;  %v9524_v34 = vld [vmem:[#allocation45_spill] sm:$0xff] }
 0x562   : > { %v3483_v41 = vpop.f32.mrb[82].mxu1 }
 0x563   : > { %v5928_v47 = vadd.f32 %v8698_v16, %v3483_v41  ;;  %v3485_v9 = vpop.f32.mrb[83].mxu1  ;;  %v8896_v24 = vadd.f32 %v9510_v37, %v3704_v26  ;;  %v9525_v37 = vld [vmem:[#allocation32_spill] sm:$0xff] }
 0x565   : > { %9511 = vst [vmem:[#allocation5_spill] sm:$0xff] %v8896_v24  ;;  %v3709_v32 = vadd.f32 %v5928_v47, %v9512_v13  ;;  %5149 = vmatprep.mubr.f32.mxu1 %v8896_v24 }
 0x566   : > { %v3488_v52 = vpop.f32.mrb[84].mxu1 }
 0x567   : > { %v5929_v17 = vadd.f32 %v8698_v16, %v3488_v52  ;;  %v3490_v45 = vpop.f32.mrb[85].mxu1  ;;  %v8903_v10 = vadd.f32 %v9513_v57, %v3709_v32 }
 0x569   : > { %9514 = vst [vmem:[#allocation6_spill] sm:$0xff] %v8903_v10  ;;  %v3714_v44 = vadd.f32 %v5929_v17, %v9515_v19  ;;  %5150 = vmatmul.mubr.f32.gmra.mrb[120].mxu1 %v8903_v10  ;;  %v9527_v17 = vld [vmem:[#allocation33_spill] sm:$0xff] }
 0x56a   : > { %v3493_v46 = vpop.f32.mrb[86].mxu1 }
 0x56b   : > { %v5930_v63 = vadd.f32 %v8698_v16, %v3493_v46  ;;  %v3495_v50 = vpop.f32.mrb[87].mxu1  ;;  %v8909_v29 = vadd.f32 %v9516_v18, %v3714_v44  ;;  %v9529_v46 = vld [vmem:[#allocation34_spill] sm:$0xff] }
 0x56d   : > { %9517 = vst [vmem:[#allocation7_spill] sm:$0xff] %v8909_v29  ;;  %v3719_v55 = vadd.f32 %v5930_v63, %v9518_v6  ;;  %5152 = vmatprep.mubr.f32.mxu1 %v8909_v29 }
 0x56e   : > { %v3498_v22 = vpop.f32.mrb[88].mxu1 }
 0x56f   : > { %v5931_v20 = vadd.f32 %v8698_v16, %v3498_v22  ;;  %v3500_v27 = vpop.f32.mrb[89].mxu1  ;;  %v8915_v33 = vadd.f32 %v9519_v38, %v3719_v55 }
 0x571   : > { %9520 = vst [vmem:[#allocation8_spill] sm:$0xff] %v8915_v33  ;;  %v3724_v36 = vadd.f32 %v5931_v20, %v9521_v5  ;;  %5153 = vmatmul.mubr.f32.gmra.mrb[122].mxu1 %v8915_v33 }
 0x572   : > { %v3503_v4 = vpop.f32.mrb[90].mxu1 }
 0x573   : > { %v5932_v1 = vadd.f32 %v8698_v16, %v3503_v4  ;;  %v3505_v58 = vpop.f32.mrb[91].mxu1  ;;  %v8921_v12 = vadd.f32 %v9522_v21, %v3724_v36 }
 0x575   : > { %9523 = vst [vmem:[#allocation9_spill] sm:$0xff] %v8921_v12  ;;  %v3729_v26 = vadd.f32 %v5932_v1, %v9524_v34  ;;  %5155 = vmatprep.mubr.f32.mxu1 %v8921_v12 }
 0x576   : > { %v3508_v41 = vpop.f32.mrb[92].mxu1 }
 0x577   : > { %v5933_v47 = vadd.f32 %v8698_v16, %v3508_v41  ;;  %v3510_v9 = vpop.f32.mrb[93].mxu1  ;;  %v8927_v13 = vadd.f32 %v9525_v37, %v3729_v26 }
 0x579   : > { %9526 = vst [vmem:[#allocation10_spill] sm:$0xff] %v8927_v13  ;;  %v3734_v32 = vadd.f32 %v5933_v47, %v8693_v25  ;;  %5156 = vmatmul.mubr.f32.gmra.mrb[124].mxu1 %v8927_v13  ;;  %v8944_v25 = vld [vmem:[%s9341_s6] ss:$0 sm:$0xff] }
 0x57a   : > { %v3513_v52 = vpop.f32.mrb[94].mxu1 }
 0x57b   : > { %v8932_v45 = vadd.f32 %v9527_v17, %v3734_v32  ;;  %v5934_v57 = vadd.f32 %v8698_v16, %v3513_v52  ;;  %v3515_v19 = vpop.f32.mrb[95].mxu1 }
 0x57d   : > { %9528 = vst [vmem:[#allocation11_spill] sm:$0xff] %v8932_v45  ;;  %v3739_v44 = vadd.f32 %v5934_v57, %v8691_v59  ;;  %5158 = vmatprep.mubr.f32.mxu1 %v8932_v45 }
 0x57f   : > { %v8938_v63 = vadd.f32 %v9529_v46, %v3739_v44 }
 0x581   : > { %9530 = vst [vmem:[#allocation12_spill] sm:$0xff] %v8938_v63  ;;  %5159 = vmatmul.mubr.f32.gmra.mrb[126].mxu1 %v8938_v63 }
 0x582   : > { %5273 = vmatprep.mubr.msk.f32.mxu1 %vm6378_vm0, %v8688_v60 }
 0x5dc   : > { %v5115_v50 = vpop.f32.mrb[96].mxu1 }
 0x5dd   : > { %v3885_v18 = vadd.f32 %v5115_v50, %v8944_v25  ;;  %v3879_v6 = vpop.f32.mrb[97].mxu1 }
 0x5de   : > { %v3880_v16 = vadd.f32 %v8944_v25, %v3879_v6 }
 0x5df   : > { %v4039_v59 = vmax.f32 %v3885_v18, 0.0 }
 0x5e0   : > { %v4038_v55 = vmax.f32 %v3880_v16, 0.0 }
 0x5e2   : > { %5193 = vmatprep.mubr.f32.mxu0 %v4038_v55 }
 0x5e3   : > { %5194 = vmatmul.mubr.f32.vlgmr.msra.gmra.mrb[96].mxu0 %v4039_v59 }
 0x5e4   : > { %v5118_v22 = vpop.f32.mrb[98].mxu1 }
 0x5e5   : > { %v3895_v20 = vadd.f32 %v5118_v22, %v8944_v25  ;;  %v3889_v27 = vpop.f32.mrb[99].mxu1 }
 0x5e6   : > { %v3890_v38 = vadd.f32 %v8944_v25, %v3889_v27 }
 0x5e7   : > { %v4041_v36 = vmax.f32 %v3895_v20, 0.0 }
 0x5e8   : > { %v4040_v5 = vmax.f32 %v3890_v38, 0.0 }
 0x5ea   : > { %5196 = vmatprep.mubr.f32.mxu0 %v4040_v5 }
 0x5eb   : > { %5197 = vmatmul.mubr.f32.gmra.mrb[98].mxu0 %v4041_v36 }
 0x5ec   : > { %v5121_v4 = vpop.f32.mrb[100].mxu1 }
 0x5ed   : > { %v3905_v1 = vadd.f32 %v5121_v4, %v8944_v25  ;;  %v3899_v58 = vpop.f32.mrb[101].mxu1 }
 0x5ee   : > { %v3900_v21 = vadd.f32 %v8944_v25, %v3899_v58 }
 0x5ef   : > { %v4043_v26 = vmax.f32 %v3905_v1, 0.0 }
 0x5f0   : > { %v4042_v34 = vmax.f32 %v3900_v21, 0.0 }
 0x5f2   : > { %5199 = vmatprep.mubr.f32.mxu0 %v4042_v34 }
 0x5f3   : > { %5200 = vmatmul.mubr.f32.gmra.mrb[100].mxu0 %v4043_v26 }
 0x5f4   : > { %v5124_v41 = vpop.f32.mrb[102].mxu1 }
 0x5f5   : > { %v3915_v47 = vadd.f32 %v5124_v41, %v8944_v25  ;;  %v3909_v9 = vpop.f32.mrb[103].mxu1 }
 0x5f6   : > { %v3910_v37 = vadd.f32 %v8944_v25, %v3909_v9 }
 0x5f7   : > { %v4045_v52 = vmax.f32 %v3915_v47, 0.0 }
 0x5f8   : > { %v4044_v32 = vmax.f32 %v3910_v37, 0.0 }
 0x5fa   : > { %5202 = vmatprep.mubr.f32.mxu0 %v4044_v32 }
 0x5fb   : > { %5203 = vmatmul.mubr.f32.gmra.mrb[102].mxu0 %v4045_v52 }
 0x5fc   : > { %v5127_v17 = vpop.f32.mrb[104].mxu1 }
 0x5fd   : > { %v3925_v57 = vadd.f32 %v5127_v17, %v8944_v25  ;;  %v3919_v19 = vpop.f32.mrb[105].mxu1 }
 0x5fe   : > { %v3920_v44 = vadd.f32 %v8944_v25, %v3919_v19 }
 0x5ff   : > { %v4047_v50 = vmax.f32 %v3925_v57, 0.0 }
 0x600   : > { %v4046_v46 = vmax.f32 %v3920_v44, 0.0 }
 0x602   : > { %5205 = vmatprep.mubr.f32.mxu0 %v4046_v46 }
 0x603   : > { %5206 = vmatmul.mubr.f32.gmra.mrb[104].mxu0 %v4047_v50 }
 0x604   : > { %v5130_v18 = vpop.f32.mrb[106].mxu1 }
 0x605   : > { %v3935_v6 = vadd.f32 %v5130_v18, %v8944_v25  ;;  %v3929_v16 = vpop.f32.mrb[107].mxu1 }
 0x606   : > { %v3930_v55 = vadd.f32 %v8944_v25, %v3929_v16 }
 0x607   : > { %v4049_v22 = vmax.f32 %v3935_v6, 0.0 }
 0x608   : > { %v4048_v59 = vmax.f32 %v3930_v55, 0.0 }
 0x60a   : > { %5208 = vmatprep.mubr.f32.mxu0 %v4048_v59 }
 0x60b   : > { %5209 = vmatmul.mubr.f32.gmra.mrb[106].mxu0 %v4049_v22 }
 0x60c   : > { %v5133_v20 = vpop.f32.mrb[108].mxu1 }
 0x60d   : > { %v3945_v27 = vadd.f32 %v5133_v20, %v8944_v25  ;;  %v3939_v38 = vpop.f32.mrb[109].mxu1 }
 0x60e   : > { %v3940_v5 = vadd.f32 %v8944_v25, %v3939_v38 }
 0x60f   : > { %v4051_v4 = vmax.f32 %v3945_v27, 0.0 }
 0x610   : > { %v4050_v36 = vmax.f32 %v3940_v5, 0.0 }
 0x612   : > { %5211 = vmatprep.mubr.f32.mxu0 %v4050_v36 }
 0x613   : > { %5212 = vmatmul.mubr.f32.gmra.mrb[108].mxu0 %v4051_v4 }
 0x614   : > { %v5136_v1 = vpop.f32.mrb[110].mxu1 }
 0x615   : > { %v3955_v58 = vadd.f32 %v5136_v1, %v8944_v25  ;;  %v3949_v21 = vpop.f32.mrb[111].mxu1 }
 0x616   : > { %v3950_v34 = vadd.f32 %v8944_v25, %v3949_v21 }
 0x617   : > { %v4053_v41 = vmax.f32 %v3955_v58, 0.0 }
 0x618   : > { %v4052_v26 = vmax.f32 %v3950_v34, 0.0 }
 0x61a   : > { %5214 = vmatprep.mubr.f32.mxu0 %v4052_v26 }
 0x61b   : > { %5215 = vmatmul.mubr.f32.gmra.mrb[110].mxu0 %v4053_v41 }
 0x61c   : > { %v5139_v47 = vpop.f32.mrb[112].mxu1 }
 0x61d   : > { %v3965_v9 = vadd.f32 %v5139_v47, %v8944_v25  ;;  %v3959_v37 = vpop.f32.mrb[113].mxu1 }
 0x61e   : > { %v3960_v32 = vadd.f32 %v8944_v25, %v3959_v37 }
 0x61f   : > { %v4055_v17 = vmax.f32 %v3965_v9, 0.0 }
 0x620   : > { %v4054_v52 = vmax.f32 %v3960_v32, 0.0 }
 0x622   : > { %5217 = vmatprep.mubr.f32.mxu0 %v4054_v52 }
 0x623   : > { %5218 = vmatmul.mubr.f32.gmra.mrb[112].mxu0 %v4055_v17 }
 0x624   : > { %v5142_v57 = vpop.f32.mrb[114].mxu1 }
 0x625   : > { %v3975_v19 = vadd.f32 %v5142_v57, %v8944_v25  ;;  %v3969_v44 = vpop.f32.mrb[115].mxu1 }
 0x626   : > { %v3970_v46 = vadd.f32 %v8944_v25, %v3969_v44 }
 0x627   : > { %v4057_v18 = vmax.f32 %v3975_v19, 0.0 }
 0x628   : > { %v4056_v50 = vmax.f32 %v3970_v46, 0.0 }
 0x62a   : > { %5220 = vmatprep.mubr.f32.mxu0 %v4056_v50 }
 0x62b   : > { %5221 = vmatmul.mubr.f32.gmra.mrb[114].mxu0 %v4057_v18 }
 0x62c   : > { %v5145_v6 = vpop.f32.mrb[116].mxu1 }
 0x62d   : > { %v3985_v16 = vadd.f32 %v5145_v6, %v8944_v25  ;;  %v3979_v55 = vpop.f32.mrb[117].mxu1 }
 0x62e   : > { %v3980_v59 = vadd.f32 %v8944_v25, %v3979_v55 }
 0x62f   : > { %v4059_v20 = vmax.f32 %v3985_v16, 0.0 }
 0x630   : > { %v4058_v22 = vmax.f32 %v3980_v59, 0.0 }
 0x632   : > { %5223 = vmatprep.mubr.f32.mxu0 %v4058_v22 }
 0x633   : > { %5224 = vmatmul.mubr.f32.gmra.mrb[116].mxu0 %v4059_v20 }
 0x634   : > { %v5148_v27 = vpop.f32.mrb[118].mxu1 }
 0x635   : > { %v3995_v38 = vadd.f32 %v5148_v27, %v8944_v25  ;;  %v3989_v5 = vpop.f32.mrb[119].mxu1 }
 0x636   : > { %v3990_v36 = vadd.f32 %v8944_v25, %v3989_v5  ;;  %v4342_v5 = vld [vmem:[%s9344_s9 + $0x8] sm:$0xff] }
 0x637   : > { %v4061_v1 = vmax.f32 %v3995_v38, 0.0  ;;  %v4341_v38 = vld [vmem:[%s9344_s9] sm:$0xff] }
 0x638   : > { %v4060_v4 = vmax.f32 %v3990_v36, 0.0  ;;  %v5824_v36 = vpack.c.bf16 %v4342_v5, %v4341_v38  ;;  %v4431_v38 = vld [vmem:[%s9346_s11 + $0x10] sm:$0xff] }
 0x63a   : > { %5226 = vmatprep.mubr.f32.mxu0 %v4060_v4  ;;  %5825 = vmatpush3.bf16.msra.mxu1 %v5824_v36  ;;  %v4344_v4 = vld [vmem:[%s9344_s9 + $0x18] sm:$0xff] }
 0x63b   : > { %5227 = vmatmul.mubr.f32.gmra.mrb[118].mxu0 %v4061_v1  ;;  %5826 = vmatprep.subr.bf16.mxu1 %v9448_v8  ;;  %v4432_v36 = vld [vmem:[%s9346_s11 + $0x18] sm:$0xff] }
 0x63c   : > { %v5151_v58 = vpop.f32.mrb[120].mxu1 }
 0x63d   : > { %v4005_v21 = vadd.f32 %v5151_v58, %v8944_v25  ;;  %v3999_v34 = vpop.f32.mrb[121].mxu1  ;;  %v4345_v58 = vld [vmem:[%s9344_s9 + $0x20] sm:$0xff] }
 0x63e   : > { %v4000_v26 = vadd.f32 %v8944_v25, %v3999_v34 }
 0x63f   : > { %v4063_v47 = vmax.f32 %v4005_v21, 0.0  ;;  %v4346_v21 = vld [vmem:[%s9344_s9 + $0x28] sm:$0xff] }
 0x640   : > { %v4062_v41 = vmax.f32 %v4000_v26, 0.0  ;;  %v5830_v34 = vpack.c.bf16 %v4346_v21, %v4345_v58  ;;  %v4347_v26 = vld [vmem:[%s9344_s9 + $0x30] sm:$0xff]  ;;  %v4433_v58 = vld [vmem:[%s9346_s11 + $0x20] sm:$0xff]  ;;  %v4434_v21 = vld [vmem:[%s9346_s11 + $0x28] sm:$0xff] }
 0x642   : > { %5229 = vmatprep.mubr.f32.mxu0 %v4062_v41  ;;  %v4348_v41 = vld [vmem:[%s9344_s9 + $0x38] sm:$0xff] }
 0x643   : > { %5230 = vmatmul.mubr.f32.gmra.mrb[120].mxu0 %v4063_v47  ;;  %v5833_v47 = vpack.c.bf16 %v4348_v41, %v4347_v26  ;;  %v4436_v26 = vld [vmem:[%s9346_s11 + $0x38] sm:$0xff] }
 0x644   : > { %v5154_v9 = vpop.f32.mrb[122].mxu1 }
 0x645   : > { %v4015_v37 = vadd.f32 %v5154_v9, %v8944_v25  ;;  %v4009_v32 = vpop.f32.mrb[123].mxu1  ;;  %v4349_v9 = vld [vmem:[%s9344_s9 + $0x40] sm:$0xff] }
 0x646   : > { %v4010_v52 = vadd.f32 %v8944_v25, %v4009_v32 }
 0x647   : > { %v4065_v57 = vmax.f32 %v4015_v37, 0.0  ;;  %v4350_v37 = vld [vmem:[%s9344_s9 + $0x48] sm:$0xff] }
 0x648   : > { %v4064_v17 = vmax.f32 %v4010_v52, 0.0  ;;  %v5836_v32 = vpack.c.bf16 %v4350_v37, %v4349_v9  ;;  %v4351_v52 = vld [vmem:[%s9344_s9 + $0x50] sm:$0xff]  ;;  %v4437_v37 = vld [vmem:[%s9346_s11 + $0x40] sm:$0xff] }
 0x64a   : > { %5232 = vmatprep.mubr.f32.mxu0 %v4064_v17  ;;  %v4352_v17 = vld [vmem:[%s9344_s9 + $0x58] sm:$0xff] }
 0x64b   : > { %5233 = vmatmul.mubr.f32.gmra.mrb[122].mxu0 %v4065_v57  ;;  %v5839_v57 = vpack.c.bf16 %v4352_v17, %v4351_v52  ;;  %v4439_v17 = vld [vmem:[%s9346_s11 + $0x50] sm:$0xff] }
 0x64c   : > { %v5157_v19 = vpop.f32.mrb[124].mxu1 }
 0x64d   : > { %v4025_v44 = vadd.f32 %v5157_v19, %v8944_v25  ;;  %v4019_v46 = vpop.f32.mrb[125].mxu1 }
 0x64e   : > { %v4020_v50 = vadd.f32 %v8944_v25, %v4019_v46  ;;  %v4353_v46 = vld [vmem:[%s9344_s9 + $0x60] sm:$0xff] }
 0x64f   : > { %v4067_v6 = vmax.f32 %v4025_v44, 0.0 }
 0x650   : > { %v4066_v18 = vmax.f32 %v4020_v50, 0.0  ;;  %v4354_v50 = vld [vmem:[%s9344_s9 + $0x68] sm:$0xff] }
 0x652   : > { %5235 = vmatprep.mubr.f32.mxu0 %v4066_v18  ;;  %v5842_v18 = vpack.c.bf16 %v4354_v50, %v4353_v46  ;;  %v9078_v46 = vld [vmem:[%s9343_s8] ss:$0 sm:$0xff] }
 0x653   : > { %5236 = vmatmul.mubr.f32.gmra.mrb[124].mxu0 %v4067_v6 }
 0x654   : > { %v5160_v16 = vpop.f32.mrb[126].mxu1 }
 0x655   : > { %v4035_v55 = vadd.f32 %v5160_v16, %v8944_v25  ;;  %v4029_v59 = vpop.f32.mrb[127].mxu1 }
 0x656   : > { %v4030_v22 = vadd.f32 %v8944_v25, %v4029_v59  ;;  %v4343_v25 = vld [vmem:[%s9344_s9 + $0x10] sm:$0xff]  ;;  %v4356_v59 = vld [vmem:[%s9344_s9 + $0x78] sm:$0xff] }
 0x657   : > { %v4069_v27 = vmax.f32 %v4035_v55, 0.0  ;;  %v5827_v1 = vpack.c.bf16 %v4344_v4, %v4343_v25  ;;  %v4355_v55 = vld [vmem:[%s9344_s9 + $0x70] sm:$0xff] }
 0x658   : > { %v4068_v20 = vmax.f32 %v4030_v22, 0.0  ;;  %v5845_v22 = vpack.c.bf16 %v4356_v59, %v4355_v55 }
 0x659   : > { %5828 = vmatpush3.bf16.msra.mxu1 %v5827_v1  ;;  %v5851_v1 = vpack.c.bf16 %v4432_v36, %v4431_v38  ;;  %v4444_v36 = vld [vmem:[%s9346_s11 + $0x78] sm:$0xff] }
 0x65a   : > { %5238 = vmatprep.mubr.f32.mxu0 %v4068_v20  ;;  %5829 = vmatprep.subr.bf16.mxu1 %v9448_v8  ;;  %v4429_v20 = vld [vmem:[%s9346_s11] sm:$0xff] }
 0x65b   : > { %5239 = vmatmul.mubr.f32.gmra.mrb[126].mxu0 %v4069_v27  ;;  %v4430_v27 = vld [vmem:[%s9346_s11 + $0x8] sm:$0xff] }
 0x65c   : > { %5308 = vmatprep.mubr.msk.f32.mxu0 %vm6378_vm0, %v8688_v60  ;;  %v5848_v5 = vpack.c.bf16 %v4430_v27, %v4429_v20  ;;  %v5854_v60 = vpack.c.bf16 %v4434_v21, %v4433_v58  ;;  %v4441_v20 = vld [vmem:[%s9346_s11 + $0x60] sm:$0xff]  ;;  %v4442_v27 = vld [vmem:[%s9346_s11 + $0x68] sm:$0xff] }
 0x65d   : > { %5831 = vmatpush3.bf16.msra.mxu1 %v5830_v34  ;;  %v4435_v34 = vld [vmem:[%s9346_s11 + $0x30] sm:$0xff] }
 0x65e   : > { %5832 = vmatprep.subr.bf16.mxu1 %v9448_v8  ;;  %5849 = vmatpush3.bf16.msra.mxu0 %v5848_v5  ;;  %v5857_v9 = vpack.c.bf16 %v4436_v26, %v4435_v34  ;;  %v5866_v5 = vpack.c.bf16 %v4442_v27, %v4441_v20 }
 0x65f   : > { %5850 = vmatprep.subr.bf16.mxu0 %v9448_v8 }
 0x661   : > { %5834 = vmatpush3.bf16.msra.mxu1 %v5833_v47 }
 0x662   : > { %5835 = vmatprep.subr.bf16.mxu1 %v9448_v8  ;;  %5852 = vmatpush3.bf16.msra.mxu0 %v5851_v1 }
 0x663   : > { %5853 = vmatprep.subr.bf16.mxu0 %v9448_v8 }
 0x665   : > { %5837 = vmatpush3.bf16.msra.mxu1 %v5836_v32  ;;  %v4438_v32 = vld [vmem:[%s9346_s11 + $0x48] sm:$0xff] }
 0x666   : > { %5838 = vmatprep.subr.bf16.mxu1 %v9448_v8  ;;  %5855 = vmatpush3.bf16.msra.mxu0 %v5854_v60  ;;  %v5860_v52 = vpack.c.bf16 %v4438_v32, %v4437_v37 }
 0x667   : > { %5856 = vmatprep.subr.bf16.mxu0 %v9448_v8 }
 0x669   : > { %5840 = vmatpush3.bf16.msra.mxu1 %v5839_v57  ;;  %v4440_v57 = vld [vmem:[%s9346_s11 + $0x58] sm:$0xff] }
 0x66a   : > { %5841 = vmatprep.subr.bf16.mxu1 %v9448_v8  ;;  %5858 = vmatpush3.bf16.msra.mxu0 %v5857_v9  ;;  %v5863_v55 = vpack.c.bf16 %v4440_v57, %v4439_v17 }
 0x66b   : > { %5859 = vmatprep.subr.bf16.mxu0 %v9448_v8 }
 0x66d   : > { %5843 = vmatpush3.bf16.msra.mxu1 %v5842_v18 }
 0x66e   : > { %5844 = vmatprep.subr.bf16.mxu1 %v9448_v8  ;;  %5861 = vmatpush3.bf16.msra.mxu0 %v5860_v52 }
 0x66f   : > { %5862 = vmatprep.subr.bf16.mxu0 %v9448_v8 }
 0x671   : > { %5846 = vmatpush3.bf16.msra.mxu1 %v5845_v22 }
 0x672   : > { %5864 = vmatpush3.bf16.msra.mxu0 %v5863_v55 }
 0x673   : > { %5865 = vmatprep.subr.bf16.mxu0 %v9448_v8 }
 0x676   : > { %5867 = vmatpush3.bf16.msra.mxu0 %v5866_v5 }
 0x677   : > { %5868 = vmatprep.subr.bf16.mxu0 %v9448_v8 }
 0x6b6   : > { %v5195_v19 = vpop.f32.mrb[96].mxu0 }
 0x6b7   : > { %v4143_v44 = vpop.f32.mrb[97].mxu0  ;;  %v9081_v59 = vadd.f32 %v5195_v19, %v9078_v46 }
 0x6b8   : > { %v9084_v22 = vadd.f32 %v9078_v46, %v4143_v44  ;;  %v4443_v44 = vld [vmem:[%s9346_s11 + $0x70] sm:$0xff] }
 0x6b9   : > { %v5869_v21 = vpack.c.bf16 %v4444_v36, %v4443_v44 }
 0x6ba   : > { %v4302_v19 = vadd.f32 %v9081_v59, %v9084_v22 }
 0x6bb   : > { %5870 = vmatpush3.bf16.msra.mxu0 %v5869_v21 }
 0x6be   : > { %v5198_v6 = vpop.f32.mrb[98].mxu0 }
 0x6bf   : > { %v4153_v16 = vpop.f32.mrb[99].mxu0  ;;  %v9107_v60 = vadd.f32 %v5198_v6, %v9078_v46 }
 0x6c0   : > { %v9094_v38 = vadd.f32 %v9078_v46, %v4153_v16 }
 0x6c2   : > { %v4303_v1 = vadd.f32 %v4302_v19, %v9094_v38 }
 0x6c4   : > { %v4304_v26 = vadd.f32 %v4303_v1, %v9107_v60 }
 0x6c6   : > { %v5201_v25 = vpop.f32.mrb[100].mxu0 }
 0x6c7   : > { %v4163_v4 = vpop.f32.mrb[101].mxu0  ;;  %v9116_v37 = vadd.f32 %v5201_v25, %v9078_v46 }
 0x6c8   : > { %v9110_v34 = vadd.f32 %v9078_v46, %v4163_v4 }
 0x6ca   : > { %v4305_v9 = vadd.f32 %v4304_v26, %v9110_v34 }
 0x6cc   : > { %v4306_v6 = vadd.f32 %v4305_v9, %v9116_v37 }
 0x6ce   : > { %v5204_v41 = vpop.f32.mrb[102].mxu0 }
 0x6cf   : > { %v4173_v47 = vpop.f32.mrb[103].mxu0  ;;  %v9124_v57 = vadd.f32 %v5204_v41, %v9078_v46 }
 0x6d0   : > { %v9119_v32 = vadd.f32 %v9078_v46, %v4173_v47 }
 0x6d2   : > { %v4307_v4 = vadd.f32 %v4306_v6, %v9119_v32 }
 0x6d4   : > { %v4308_v55 = vadd.f32 %v4307_v4, %v9124_v57 }
 0x6d6   : > { %v5207_v50 = vpop.f32.mrb[104].mxu0 }
 0x6d7   : > { %v4183_v18 = vpop.f32.mrb[105].mxu0  ;;  %v9132_v47 = vadd.f32 %v5207_v50, %v9078_v46 }
 0x6d8   : > { %v9127_v8 = vadd.f32 %v9078_v46, %v4183_v18 }
 0x6da   : > { %v4309_v27 = vadd.f32 %v4308_v55, %v9127_v8 }
 0x6dc   : > { %v4310_v19 = vadd.f32 %v4309_v27, %v9132_v47 }
 0x6de   : > { %v5210_v58 = vpop.f32.mrb[106].mxu0 }
 0x6df   : > { %v4193_v16 = vpop.f32.mrb[107].mxu0  ;;  %v9140_v18 = vadd.f32 %v5210_v58, %v9078_v46 }
 0x6e0   : > { %v9135_v5 = vadd.f32 %v9078_v46, %v4193_v16 }
 0x6e2   : > { %v4311_v41 = vadd.f32 %v4310_v19, %v9135_v5 }
 0x6e4   : > { %v4312_v21 = vadd.f32 %v4311_v41, %v9140_v18 }
 0x6e6   : > { %v5213_v52 = vpop.f32.mrb[108].mxu0 }
 0x6e7   : > { %v4203_v17 = vpop.f32.mrb[109].mxu0  ;;  %v9148_v26 = vadd.f32 %v5213_v52, %v9078_v46 }
 0x6e8   : > { %v9143_v1 = vadd.f32 %v9078_v46, %v4203_v17 }
 0x6ea   : > { %v4313_v50 = vadd.f32 %v4312_v21, %v9143_v1 }
 0x6ec   : > { %v4314_v4 = vadd.f32 %v4313_v50, %v9148_v26 }
 0x6ee   : > { %v5216_v20 = vpop.f32.mrb[110].mxu0 }
 0x6ef   : > { %v4213_v25 = vpop.f32.mrb[111].mxu0  ;;  %v9156_v55 = vadd.f32 %v5216_v20, %v9078_v46 }
 0x6f0   : > { %v9151_v16 = vadd.f32 %v9078_v46, %v4213_v25 }
 0x6f2   : > { %v4315_v58 = vadd.f32 %v4314_v4, %v9151_v16 }
 0x6f4   : > { %v4316_v27 = vadd.f32 %v4315_v58, %v9156_v55 }
 0x6f6   : > { %v5219_v44 = vpop.f32.mrb[112].mxu0 }
 0x6f7   : > { %v4223_v36 = vpop.f32.mrb[113].mxu0  ;;  %v9164_v25 = vadd.f32 %v5219_v44, %v9078_v46 }
 0x6f8   : > { %v9159_v17 = vadd.f32 %v9078_v46, %v4223_v36 }
 0x6fa   : > { %v4317_v41 = vadd.f32 %v4316_v27, %v9159_v17 }
 0x6fc   : > { %v4318_v50 = vadd.f32 %v4317_v41, %v9164_v25 }
 0x6fe   : > { %v5222_v9 = vpop.f32.mrb[114].mxu0 }
 0x6ff   : > { %v4233_v6 = vpop.f32.mrb[115].mxu0  ;;  %v9172_v36 = vadd.f32 %v5222_v9, %v9078_v46 }
 0x700   : > { %v9167_v21 = vadd.f32 %v9078_v46, %v4233_v6 }
 0x702   : > { %v4319_v20 = vadd.f32 %v4318_v50, %v9167_v21 }
 0x704   : > { %v4320_v27 = vadd.f32 %v4319_v20, %v9172_v36 }
 0x706   : > { %v5225_v19 = vpop.f32.mrb[116].mxu0 }
 0x707   : > { %v4243_v52 = vpop.f32.mrb[117].mxu0  ;;  %v9180_v45 = vadd.f32 %v5225_v19, %v9078_v46 }
 0x708   : > { %v9175_v58 = vadd.f32 %v9078_v46, %v4243_v52 }
 0x70a   : > { %v4321_v44 = vadd.f32 %v4320_v27, %v9175_v58 }
 0x70c   : > { %v4322_v13 = vadd.f32 %v4321_v44, %v9180_v45 }
 0x70e   : > { %v5228_v4 = vpop.f32.mrb[118].mxu0 }
 0x70f   : > { %v4253_v63 = vpop.f32.mrb[119].mxu0  ;;  %v9188_v12 = vadd.f32 %v5228_v4, %v9078_v46 }
 0x710   : > { %v9183_v6 = vadd.f32 %v9078_v46, %v4253_v63 }
 0x712   : > { %v4323_v9 = vadd.f32 %v4322_v13, %v9183_v6 }
 0x714   : > { %v4324_v20 = vadd.f32 %v4323_v9, %v9188_v12 }
 0x716   : > { %v5231_v41 = vpop.f32.mrb[120].mxu0 }
 0x717   : > { %v4263_v50 = vpop.f32.mrb[121].mxu0  ;;  %v9196_v63 = vadd.f32 %v5231_v41, %v9078_v46 }
 0x718   : > { %v9191_v52 = vadd.f32 %v9078_v46, %v4263_v50 }
 0x71a   : > { %v4325_v33 = vadd.f32 %v4324_v20, %v9191_v52 }
 0x71c   : > { %v4326_v13 = vadd.f32 %v4325_v33, %v9196_v63 }
 0x71e   : > { %v5234_v27 = vpop.f32.mrb[122].mxu0 }
 0x71f   : > { %v4273_v19 = vpop.f32.mrb[123].mxu0  ;;  %v9204_v50 = vadd.f32 %v5234_v27, %v9078_v46 }
 0x720   : > { %v9199_v29 = vadd.f32 %v9078_v46, %v4273_v19 }
 0x722   : > { %v4327_v4 = vadd.f32 %v4326_v13, %v9199_v29 }
 0x724   : > { %v4328_v20 = vadd.f32 %v4327_v4, %v9204_v50 }
 0x726   : > { %v5237_v44 = vpop.f32.mrb[124].mxu0 }
 0x727   : > { %v4283_v10 = vpop.f32.mrb[125].mxu0  ;;  %v9212_v24 = vadd.f32 %v5237_v44, %v9078_v46 }
 0x728   : > { %v9207_v9 = vadd.f32 %v9078_v46, %v4283_v10 }
 0x72a   : > { %v4329_v41 = vadd.f32 %v4328_v20, %v9207_v9 }
 0x72c   : > { %v4330_v13 = vadd.f32 %v4329_v41, %v9212_v24 }
 0x72e   : > { %v5240_v19 = vpop.f32.mrb[126].mxu0 }
 0x72f   : > { %v4293_v40 = vpop.f32.mrb[127].mxu0  ;;  %v9219_v27 = vadd.f32 %v5240_v19, %v9078_v46 }
 0x730   : > { %v9215_v33 = vadd.f32 %v9078_v46, %v4293_v40  ;;  %v4357_v40 = vld [vmem:[%s9345_s10] sm:$0x1] }
 0x732   : > { %v4331_v10 = vadd.f32 %v4330_v13, %v9215_v33  ;;  %v4445_v13 = vld [vmem:[%s9347_s12] sm:$0x1] }
 0x734   : > { %v4332_v3 = vadd.f32 %v4331_v10, %v9219_v27 }
 0x736   : > { %v4333_v4 = vrot.slane %v4332_v3, 4 }
 0x738   : > { %v4334_v54 = vadd.f32 %v4333_v4, %v4332_v3 }
 0x73a   : > { %v4335_v20 = vrot.slane %v4334_v54, 2 }
 0x73c   : > { %v4336_v11 = vadd.f32 %v4335_v20, %v4334_v54 }
 0x73e   : > { %v4337_v44 = vrot.slane %v4336_v11, 1 }
 0x740   : > { %v4338_v2 = vadd.f32 %v4337_v44, %v4336_v11  ;;  %v4522_v11 = vlaneseq }
 0x742   : > { %v4340_v62 = vmul.f32 0.00390625, %v4338_v2  ;;  %v4523_v20 = vshrl.u32 %v4522_v11, 7  ;;  %v9537_v11 = vld [vmem:[#allocation3_spill] sm:$0xff] }
 0x744   : > { %5274 = vmatmul.mubr.f32.vlgmr.msra.gmra.mrb[128].mxu1 %v4340_v62  ;;  %v4524_v44 = vsub.s32 0, %v4523_v20 }
 0x817   : > { %v4424_v41 = vpop.f32.mrb[128].mxu1 }
 0x818   : > { %v4425_v42 = vadd.f32 %v4424_v41, %v4357_v40  ;;  %v5275_v46 = vpop.f32.mrb[129].mxu1 }
 0x81a   : > { %v4428_v19 = vmax.f32 %v4425_v42, 0.0 }
 0x81c   : > { %5309 = vmatmul.mubr.f32.vlgmr.msra.gmra.mrb[128].mxu0 %v4428_v19 }
 0x8ef   : > { %v4512_v3 = vpop.f32.mrb[128].mxu0 }
 0x8f0   : > { %v4513_v10 = vadd.f32 %v4512_v3, %v4445_v13  ;;  %v5310_v54 = vpop.f32.mrb[129].mxu0 }
 0x8f2   : > { %v4690_v4 = vmul.f32 -1.442695, %v4513_v10 }
 0x8f4   : > { %6330 = vpow2.f32 %v4690_v4 }
 0x8fe   : > { %v6331_v2 = vpop.eup %6330 }
 0x8ff   : > { %v4519_v62 = vadd.f32 1.0, %v6331_v2  ;;  %v9536_v2 = vld [vmem:[#allocation43_spill] sm:$0xff] }
 0x901   : > { %6332 = vrcp.f32 %v4519_v62 }
 0x90b   : > { %v6333_v61 = vpop.eup %6332 }
 0x90c   : > { %v4525_v40 = vrot.slane %v6333_v61, %v4524_v44  ;;  %v9538_v44 = vld [vmem:[#allocation4_spill] sm:$0xff] }
 0x90e   : > { %v4526_v42 = vmul.f32 %v4525_v40, %v9084_v22  ;;  %v4527_v41 = vmul.f32 %v4525_v40, %v9081_v59  ;;  %v4528_v46 = vmul.f32 %v4525_v40, %v9094_v38  ;;  %v4529_v19 = vmul.f32 %v4525_v40, %v9107_v60 }
 0x90f   : > { %v4530_v13 = vmul.f32 %v4525_v40, %v9110_v34  ;;  %v4531_v3 = vmul.f32 %v4525_v40, %v9116_v37  ;;  %v4532_v10 = vmul.f32 %v4525_v40, %v9119_v32  ;;  %v4533_v54 = vmul.f32 %v4525_v40, %v9124_v57 }
 0x910   : > { %v4534_v4 = vmul.f32 %v4525_v40, %v9127_v8  ;;  %v4535_v61 = vmul.f32 %v4525_v40, %v9132_v47  ;;  %v4536_v22 = vmul.f32 %v4525_v40, %v9135_v5  ;;  %v4537_v59 = vmul.f32 %v4525_v40, %v9140_v18 }
 0x911   : > { %v4538_v38 = vmul.f32 %v4525_v40, %v9143_v1  ;;  %v4539_v60 = vmul.f32 %v4525_v40, %v9148_v26  ;;  %v4540_v34 = vmul.f32 %v4525_v40, %v9151_v16  ;;  %v4541_v37 = vmul.f32 %v4525_v40, %v9156_v55 }
 0x912   : > { %v4542_v32 = vmul.f32 %v4525_v40, %v9159_v17  ;;  %v4543_v57 = vmul.f32 %v4525_v40, %v9164_v25  ;;  %v4544_v8 = vmul.f32 %v4525_v40, %v9167_v21  ;;  %v4545_v47 = vmul.f32 %v4525_v40, %v9172_v36 }
 0x913   : > { %v4546_v5 = vmul.f32 %v4525_v40, %v9175_v58  ;;  %v4547_v18 = vmul.f32 %v4525_v40, %v9180_v45  ;;  %v4548_v1 = vmul.f32 %v4525_v40, %v9183_v6  ;;  %v4549_v26 = vmul.f32 %v4525_v40, %v9188_v12 }
 0x914   : > { %v4550_v16 = vmul.f32 %v4525_v40, %v9191_v52  ;;  %v4551_v55 = vmul.f32 %v4525_v40, %v9196_v63  ;;  %v4552_v17 = vmul.f32 %v4525_v40, %v9199_v29  ;;  %v4553_v25 = vmul.f32 %v4525_v40, %v9204_v50 }
 0x915   : > { %v4554_v45 = vmul.f32 %v4525_v40, %v9207_v9  ;;  %v4555_v21 = vmul.f32 %v4525_v40, %v9212_v24  ;;  %v4556_v12 = vmul.f32 %v4525_v40, %v9215_v33  ;;  %v4557_v36 = vmul.f32 %v4525_v40, %v9219_v27  ;;  %v9533_v33 = vld [vmem:[#allocation40_spill] sm:$0xff]  ;;  %v9534_v27 = vld [vmem:[#allocation41_spill] sm:$0xff] }
 0x916   : > { %v4558_v29 = vadd.f32 %v4526_v42, %v8716_v43  ;;  %v4559_v58 = vadd.f32 %v4527_v41, %v8727_v23  ;;  %v4560_v6 = vadd.f32 %v4528_v46, %v8740_v14  ;;  %v4561_v52 = vadd.f32 %v4529_v19, %v8752_v7  ;;  %v9539_v42 = vld [vmem:[#allocation5_spill] sm:$0xff]  ;;  %v9540_v46 = vld [vmem:[#allocation6_spill] sm:$0xff] }
 0x917   : > { %v4562_v63 = vadd.f32 %v4530_v13, %v8764_v56  ;;  %v4563_v24 = vadd.f32 %v4531_v3, %v8776_v0  ;;  %v4564_v50 = vadd.f32 %v4532_v10, %v8782_v49  ;;  %v4565_v9 = vadd.f32 %v4533_v54, %v8788_v53  ;;  %v9541_v13 = vld [vmem:[#allocation7_spill] sm:$0xff]  ;;  %v9542_v10 = vld [vmem:[#allocation8_spill] sm:$0xff] }
 0x918   : > { %v4566_v43 = vadd.f32 %v4534_v4, %v8794_v39  ;;  %v4567_v23 = vadd.f32 %v4535_v61, %v8800_v48  ;;  %v4568_v14 = vadd.f32 %v4536_v22, %v8806_v15  ;;  %v4569_v7 = vadd.f32 %v4537_v59, %v8812_v51  ;;  %4590 = vst [vmem:[%s9262_s15] sm:$0xff] %v4558_v29  ;;  %v9531_v39 = vld [vmem:[#allocation37_spill] sm:$0xff]  ;;  %v9532_v15 = vld [vmem:[#allocation38_spill] sm:$0xff] }
 0x919   : > { %4591 = vst [vmem:[%s9262_s15 + $0x8] sm:$0xff] %v4559_v58  ;;  %4592 = vst [vmem:[%s9262_s15 + $0x10] sm:$0xff] %v4560_v6  ;;  %v4570_v56 = vadd.f32 %v4538_v38, %v8818_v35  ;;  %v4571_v0 = vadd.f32 %v4539_v60, %v8824_v28  ;;  %v4572_v49 = vadd.f32 %v4540_v34, %v8830_v30  ;;  %v9535_v30 = vld [vmem:[#allocation42_spill] sm:$0xff]  ;;  %v9543_v4 = vld [vmem:[#allocation9_spill] sm:$0xff] }
 0x91a   : > { %4593 = vst [vmem:[%s9262_s15 + $0x18] sm:$0xff] %v4561_v52  ;;  %v4573_v53 = vadd.f32 %v4541_v37, %v8836_v31  ;;  %4594 = vst [vmem:[%s9262_s15 + $0x20] sm:$0xff] %v4562_v63  ;;  %v4574_v48 = vadd.f32 %v4542_v32, %v9531_v39  ;;  %v4575_v51 = vadd.f32 %v4543_v57, %v9532_v15  ;;  %v9544_v22 = vld [vmem:[#allocation10_spill] sm:$0xff]  ;;  %v9545_v38 = vld [vmem:[#allocation11_spill] sm:$0xff] }
 0x91b   : > { %4595 = vst [vmem:[%s9262_s15 + $0x28] sm:$0xff] %v4563_v24  ;;  %4596 = vst [vmem:[%s9262_s15 + $0x30] sm:$0xff] %v4564_v50  ;;  %v4576_v35 = vadd.f32 %v4544_v8, %v9533_v33  ;;  %v4577_v28 = vadd.f32 %v4545_v47, %v9534_v27  ;;  %v4578_v31 = vadd.f32 %v4546_v5, %v9535_v30  ;;  %v9546_v34 = vld [vmem:[#allocation12_spill] sm:$0xff] }
 0x91c   : > { %4597 = vst [vmem:[%s9262_s15 + $0x38] sm:$0xff] %v4565_v9  ;;  %4598 = vst [vmem:[%s9262_s15 + $0x40] sm:$0xff] %v4566_v43  ;;  %v4579_v62 = vadd.f32 %v4547_v18, %v9536_v2  ;;  %v4580_v20 = vadd.f32 %v4548_v1, %v9537_v11  ;;  %v4581_v40 = vadd.f32 %v4549_v26, %v9538_v44 }
 0x91d   : > { %4599 = vst [vmem:[%s9262_s15 + $0x48] sm:$0xff] %v4567_v23  ;;  %4600 = vst [vmem:[%s9262_s15 + $0x50] sm:$0xff] %v4568_v14  ;;  %v4582_v41 = vadd.f32 %v4550_v16, %v9539_v42  ;;  %v4583_v19 = vadd.f32 %v4551_v55, %v9540_v46  ;;  %v4584_v3 = vadd.f32 %v4552_v17, %v9541_v13 }
 0x91e   : > { %4601 = vst [vmem:[%s9262_s15 + $0x58] sm:$0xff] %v4569_v7  ;;  %4602 = vst [vmem:[%s9262_s15 + $0x60] sm:$0xff] %v4570_v56  ;;  %v4585_v54 = vadd.f32 %v4553_v25, %v9542_v10  ;;  %v4586_v61 = vadd.f32 %v4554_v45, %v9543_v4  ;;  %v4587_v59 = vadd.f32 %v4555_v21, %v9544_v22 }
 0x91f   : > { %4603 = vst [vmem:[%s9262_s15 + $0x68] sm:$0xff] %v4571_v0  ;;  %4604 = vst [vmem:[%s9262_s15 + $0x70] sm:$0xff] %v4572_v49  ;;  %v4588_v60 = vadd.f32 %v4556_v12, %v9545_v38  ;;  %v4589_v37 = vadd.f32 %v4557_v36, %v9546_v34 }
 0x920   : > { %4605 = vst [vmem:[%s9262_s15 + $0x78] sm:$0xff] %v4573_v53  ;;  %4606 = vst [vmem:[%s9262_s15 + $0x80] sm:$0xff] %v4574_v48 }
 0x921   : > { %4607 = vst [vmem:[%s9262_s15 + $0x88] sm:$0xff] %v4575_v51  ;;  %4608 = vst [vmem:[%s9262_s15 + $0x90] sm:$0xff] %v4576_v35 }
 0x922   : > { %4609 = vst [vmem:[%s9262_s15 + $0x98] sm:$0xff] %v4577_v28  ;;  %4610 = vst [vmem:[%s9262_s15 + $0xa0] sm:$0xff] %v4578_v31 }
 0x923   : > { %4611 = vst [vmem:[%s9262_s15 + $0xa8] sm:$0xff] %v4579_v62  ;;  %4612 = vst [vmem:[%s9262_s15 + $0xb0] sm:$0xff] %v4580_v20 }
 0x924   : > { %4613 = vst [vmem:[%s9262_s15 + $0xb8] sm:$0xff] %v4581_v40  ;;  %4614 = vst [vmem:[%s9262_s15 + $0xc0] sm:$0xff] %v4582_v41 }
 0x925   : > { %4615 = vst [vmem:[%s9262_s15 + $0xc8] sm:$0xff] %v4583_v19  ;;  %4616 = vst [vmem:[%s9262_s15 + $0xd0] sm:$0xff] %v4584_v3 }
 0x926   : > { %4617 = vst [vmem:[%s9262_s15 + $0xd8] sm:$0xff] %v4585_v54  ;;  %4618 = vst [vmem:[%s9262_s15 + $0xe0] sm:$0xff] %v4586_v61 }
 0x927   : > { %4619 = vst [vmem:[%s9262_s15 + $0xe8] sm:$0xff] %v4587_v59  ;;  %4620 = vst [vmem:[%s9262_s15 + $0xf0] sm:$0xff] %v4588_v60 }
 0x928   : > { %4621 = vst [vmem:[%s9262_s15 + $0xf8] sm:$0xff] %v4589_v37 }
 0x929 PF: > { %s23_s25 = sadd.s32 1, %s6374_s25  }
 0x92a   : > { %p20_p4 = scmp.ge.s32.totalorder %s23_s25, 4  }
 0x92c   :  { %22 = sbr.rel (!%p20_p4) target bundleno = 1 (0x1), region = 105 }

</bundles_post_ra>
